<compile_context>
chip_gen: v7x
topology: tpu7x:2x2x1
jax: 0.10.0
libtpu: 0.0.40
codegen_flags: <defaults>
</compile_context>

<pallas_src>
import functools
import math

import jax
import jax.numpy as jnp
from jax.experimental import pallas as pl
from jax.experimental.pallas import tpu as pltpu

# Numerics knobs (flip for strict PyTorch parity; see header comment).
MATMUL_DTYPE = jnp.bfloat16
APPROX_GELU = True

_SQRT2_INV = 0.7071067811865476
_GELU_C = 0.7978845608028654  # sqrt(2/pi)
_LN_EPS = 1e-5


# --------------------------------------------------------------------------
# Shared math helpers (used both inside the kernel and in the JAX reference)
# --------------------------------------------------------------------------
def _gelu(x):
    if APPROX_GELU:
        return 0.5 * x * (1.0 + jnp.tanh(_GELU_C * (x + 0.044715 * (x * x * x))))
    return 0.5 * x * (1.0 + jax.lax.erf(x * _SQRT2_INV))


def _layernorm(x, gamma, beta, eps=_LN_EPS):
    mu = jnp.mean(x, axis=-1, keepdims=True)
    xc = x - mu
    var = jnp.mean(xc * xc, axis=-1, keepdims=True)
    return xc * jax.lax.rsqrt(var + eps) * gamma + beta


def _round_up(v, m):
    return ((v + m - 1) // m) * m


# --------------------------------------------------------------------------
# Fused kernel body (one row-tile per grid step; whole net per tile)
# --------------------------------------------------------------------------
def make_fused_kernel(num_layers, hidden_dim, ff_dim, pad_out):
    """Ref layout:
         x_ref      : (TILE_N, input_dim)   f32
         w_in_ref   : (input_dim, hidden)   MATMUL_DTYPE
         w1_ref     : (L, hidden, ff)       MATMUL_DTYPE
         w2_ref     : (L, ff, hidden)       MATMUL_DTYPE
         w_out_ref  : (hidden, pad_out)     MATMUL_DTYPE
         vec_ref    : (4 + 4L, slab_w)      f32  — packed bias/gamma/beta rows
         o_ref      : (TILE_N, pad_out)     f32  — lane-dense padded output
       vec_ref rows: 0=b_in, 1=gamma_out, 2=beta_out, 3=b_out,
                     4+4l..: gamma_l, beta_l, b1_l, b2_l
    """

    def kernel(x_ref, w_in_ref, w1_ref, w2_ref, w_out_ref, vec_ref, o_ref):
        # input linear + (dropout = identity in eval) + GELU
        b_in = vec_ref[0:1, :hidden_dim]
        h = jnp.dot(x_ref[...].astype(MATMUL_DTYPE), w_in_ref[...],
                    preferred_element_type=jnp.float32) + b_in
        h = _gelu(h)

        for l in range(num_layers):  # unrolled at trace time (static L)
            base = 4 + 4 * l
            gamma = vec_ref[base:base + 1, :hidden_dim]
            beta = vec_ref[base + 1:base + 2, :hidden_dim]
            b1 = vec_ref[base + 2:base + 3, :ff_dim]
            b2 = vec_ref[base + 3:base + 4, :hidden_dim]
            r = _layernorm(h, gamma, beta)
            r = jnp.dot(r.astype(MATMUL_DTYPE), w1_ref[l],
                        preferred_element_type=jnp.float32) + b1
            r = _gelu(r)
            r = jnp.dot(r.astype(MATMUL_DTYPE), w2_ref[l],
                        preferred_element_type=jnp.float32) + b2
            h = h + r

        gamma_o = vec_ref[1:2, :hidden_dim]
        beta_o = vec_ref[2:3, :hidden_dim]
        b_out = vec_ref[3:4, :pad_out]
        h = _layernorm(h, gamma_o, beta_o)
        # Lane-dense (multiple of 128) output matmul -> unmasked full-lane
        # stores; wrapper slices the real columns afterwards.
        o_ref[...] = jnp.dot(h.astype(MATMUL_DTYPE), w_out_ref[...],
                             preferred_element_type=jnp.float32) + b_out

    return kernel


# --------------------------------------------------------------------------
# Parameter construction (PyTorch-default-style init) and one-time packing
# --------------------------------------------------------------------------
def _linear_params(key, in_dim, out_dim):
    kw, kb = jax.random.split(key)
    bound = 1.0 / math.sqrt(in_dim)
    w = jax.random.uniform(kw, (in_dim, out_dim), jnp.float32, -bound, bound)
    b = jax.random.uniform(kb, (out_dim,), jnp.float32, -bound, bound)
    return w, b


def init_params(key, num_layers, input_dim, hidden_dim, output_dim,
                hidden_dim_multiplier):
    ff_dim = int(hidden_dim * hidden_dim_multiplier)
    keys = jax.random.split(key, 2 * num_layers + 2)
    p = {}
    p["w_in"], p["b_in"] = _linear_params(keys[0], input_dim, hidden_dim)
    p["blocks"] = []
    for l in range(num_layers):
        w1, b1 = _linear_params(keys[1 + 2 * l], hidden_dim, ff_dim)
        w2, b2 = _linear_params(keys[2 + 2 * l], ff_dim, hidden_dim)
        p["blocks"].append(dict(
            gamma=jnp.ones((hidden_dim,), jnp.float32),
            beta=jnp.zeros((hidden_dim,), jnp.float32),
            w1=w1, b1=b1, w2=w2, b2=b2,
        ))
    p["gamma_out"] = jnp.ones((hidden_dim,), jnp.float32)
    p["beta_out"] = jnp.zeros((hidden_dim,), jnp.float32)
    p["w_out"], p["b_out"] = _linear_params(keys[-1], hidden_dim, output_dim)
    return p


def pack_params(params):
    """Done ONCE outside jit: stacks per-layer weights, packs every 1-D vector
    into one lane-padded f32 slab, pads the output projection to 128 lanes,
    and pre-casts matmul weights to MATMUL_DTYPE."""
    hidden = params["w_in"].shape[1]
    num_layers = len(params["blocks"])
    ff = params["blocks"][0]["w1"].shape[1]
    output_dim = params["w_out"].shape[1]
    pad_out = _round_up(max(output_dim, 1), 128)
    slab_w = _round_up(max(hidden, ff, pad_out), 128)

    n_vec = 4 + 4 * num_layers
    slab = jnp.zeros((n_vec, slab_w), jnp.float32)
    slab = slab.at[0, :hidden].set(params["b_in"])
    slab = slab.at[1, :hidden].set(params["gamma_out"])
    slab = slab.at[2, :hidden].set(params["beta_out"])
    slab = slab.at[3, :output_dim].set(params["b_out"])
    for l, blk in enumerate(params["blocks"]):
        base = 4 + 4 * l
        slab = slab.at[base, :hidden].set(blk["gamma"])
        slab = slab.at[base + 1, :hidden].set(blk["beta"])
        slab = slab.at[base + 2, :ff].set(blk["b1"])
        slab = slab.at[base + 3, :hidden].set(blk["b2"])

    w1_stack = jnp.stack([b["w1"] for b in params["blocks"]]).astype(MATMUL_DTYPE)
    w2_stack = jnp.stack([b["w2"] for b in params["blocks"]]).astype(MATMUL_DTYPE)
    w_out_pad = (jnp.zeros((hidden, pad_out), jnp.float32)
                 .at[:, :output_dim].set(params["w_out"])
                 .astype(MATMUL_DTYPE))

    return dict(
        w_in=params["w_in"].astype(MATMUL_DTYPE),
        w1=w1_stack,
        w2=w2_stack,
        w_out=w_out_pad,
        vecs=slab,
    )


# --------------------------------------------------------------------------
# Model forward — single fused pallas_call, row-tiled grid
# --------------------------------------------------------------------------
@functools.partial(jax.jit, static_argnames=("output_dim",))
def model_forward(packed, x, *, output_dim):
    w_in, w1, w2 = packed["w_in"], packed["w1"], packed["w2"]
    w_out, vecs = packed["w_out"], packed["vecs"]

    n = x.shape[0]
    input_dim = w_in.shape[0]
    hidden = w_in.shape[1]
    num_layers = w1.shape[0]
    ff = w1.shape[2]
    pad_out = w_out.shape[1]

    # Row tile: >= 256 rows per MXU push when possible (multiple of 8).
    tile_n = 256 if n >= 256 else _round_up(max(n, 1), 8)
    n_pad = _round_up(n, tile_n)
    if n_pad != n:
        x = jnp.pad(x, ((0, n_pad - n), (0, 0)))
    grid = (n_pad // tile_n,)

    # Explicit VMEM budget (v7x: 64 MiB physical / 32 MiB default scoped).
    param_bytes = sum(int(a.size) * a.dtype.itemsize
                      for a in (w_in, w1, w2, w_out, vecs))
    io_tile_bytes = tile_n * (input_dim + pad_out) * 4
    act_bytes = tile_n * (3 * hidden + ff) * 4
    vmem_limit = min(max(4 * (param_bytes + io_tile_bytes + act_bytes),
                         8 << 20), 64 << 20)

    def _const(shape):
        zeros = (0,) * len(shape)
        return pl.BlockSpec(shape, lambda i, _z=zeros: _z)

    out = pl.pallas_call(
        make_fused_kernel(num_layers, hidden, ff, pad_out),
        out_shape=jax.ShapeDtypeStruct((n_pad, pad_out), jnp.float32),
        grid=grid,
        in_specs=[
            pl.BlockSpec((tile_n, input_dim), lambda i: (i, 0)),  # x tile
            _const(w_in.shape),    # weights: constant index_map -> resident
            _const(w1.shape),
            _const(w2.shape),
            _const(w_out.shape),
            _const(vecs.shape),
        ],
        out_specs=pl.BlockSpec((tile_n, pad_out), lambda i: (i, 0)),
        compiler_params=pltpu.CompilerParams(
            dimension_semantics=("parallel",),   # megacore sharding on v7x
            vmem_limit_bytes=int(vmem_limit),
        ),
    )(x, w_in, w1, w2, w_out, vecs)

    out = out[:n, :output_dim]
    if output_dim == 1:
        out = jnp.squeeze(out, axis=1)
    return out


# --------------------------------------------------------------------------
# Pure-JAX reference with matched numerics (same casts / same GELU / f32 acc)
# --------------------------------------------------------------------------
def reference_forward(packed, x, *, output_dim):
    w_in, w1, w2 = packed["w_in"], packed["w1"], packed["w2"]
    w_out, vecs = packed["w_out"], packed["vecs"]
    hidden, ff = w_in.shape[1], w1.shape[2]
    num_layers = w1.shape[0]
    pad_out = w_out.shape[1]

    h = jnp.dot(x.astype(MATMUL_DTYPE), w_in,
                preferred_element_type=jnp.float32) + vecs[0:1, :hidden]
    h = _gelu(h)
    for l in range(num_layers):
        base = 4 + 4 * l
        r = _layernorm(h, vecs[base:base + 1, :hidden],
                       vecs[base + 1:base + 2, :hidden])
        r = jnp.dot(r.astype(MATMUL_DTYPE), w1[l],
                    preferred_element_type=jnp.float32) + vecs[base + 2:base + 3, :ff]
        r = _gelu(r)
        r = jnp.dot(r.astype(MATMUL_DTYPE), w2[l],
                    preferred_element_type=jnp.float32) + vecs[base + 3:base + 4, :hidden]
        h = h + r
    h = _layernorm(h, vecs[1:2, :hidden], vecs[2:3, :hidden])
    out = jnp.dot(h.astype(MATMUL_DTYPE), w_out,
                  preferred_element_type=jnp.float32) + vecs[3:4, :pad_out]
    out = out[:, :output_dim]
    if output_dim == 1:
        out = jnp.squeeze(out, axis=1)
    return out


# --------------------------------------------------------------------------
if __name__ == "__main__":
    # Small, consistent shapes: N graph nodes with input_dim features each.
    num_nodes = 512
    input_dim = 32
    hidden_dim = 64
    output_dim = 1
    num_layers = 2
    hidden_dim_multiplier = 2

    key = jax.random.PRNGKey(0)
    kx, kp = jax.random.split(key)
    x = jax.random.normal(kx, (num_nodes, input_dim), jnp.float32)
    raw_params = init_params(kp, num_layers, input_dim, hidden_dim, output_dim,
                             hidden_dim_multiplier)
    packed = pack_params(raw_params)

    out = model_forward(packed, x, output_dim=output_dim)
    out = jax.block_until_ready(out)

    ref = reference_forward(packed, x, output_dim=output_dim)
    assert out.shape == (num_nodes,), out.shape
    assert jnp.allclose(out, ref, atol=2e-4, rtol=2e-4), float(
        jnp.max(jnp.abs(out - ref)))

    print("KERNEL_OK")
</pallas_src>

<mosaic_0001>
module attributes {stable_mosaic.version = 11 : i64} {
  func.func @kernel(%arg0: i32, %arg1: memref<256x32xf32, #tpu.memory_space<vmem>>, %arg2: memref<32x64xbf16, #tpu.memory_space<vmem>>, %arg3: memref<2x64x128xbf16, #tpu.memory_space<vmem>>, %arg4: memref<2x128x64xbf16, #tpu.memory_space<vmem>>, %arg5: memref<64x128xbf16, #tpu.memory_space<vmem>>, %arg6: memref<12x128xf32, #tpu.memory_space<vmem>>, %arg7: memref<256x128xf32, #tpu.memory_space<vmem>>) attributes {dimension_semantics = [#tpu.dimension_semantics<parallel>], iteration_bounds = array<i64: 2>, scalar_prefetch = 0 : i64, scratch_operands = 0 : i64, tpu.core_type = #tpu.core_type<tc>, window_params = [{transform_indices = @transform_0, window_bounds = array<i64: 256, 32>}, {pipeline_mode = #tpu.pipeline_mode<synchronous>, transform_indices = @transform_1, window_bounds = array<i64: 32, 64>}, {pipeline_mode = #tpu.pipeline_mode<synchronous>, transform_indices = @transform_2, window_bounds = array<i64: 2, 64, 128>}, {pipeline_mode = #tpu.pipeline_mode<synchronous>, transform_indices = @transform_3, window_bounds = array<i64: 2, 128, 64>}, {pipeline_mode = #tpu.pipeline_mode<synchronous>, transform_indices = @transform_4, window_bounds = array<i64: 64, 128>}, {pipeline_mode = #tpu.pipeline_mode<synchronous>, transform_indices = @transform_5, window_bounds = array<i64: 12, 128>}, {transform_indices = @transform_6, window_bounds = array<i64: 256, 128>}]} {
    %c0 = arith.constant 0 : index
    %c0_0 = arith.constant 0 : index
    %0 = vector.load %arg6[%c0, %c0_0] : memref<12x128xf32, #tpu.memory_space<vmem>>, vector<1x64xf32>
    %c0_1 = arith.constant 0 : index
    %c0_2 = arith.constant 0 : index
    %1 = vector.load %arg1[%c0_1, %c0_2] : memref<256x32xf32, #tpu.memory_space<vmem>>, vector<256x32xf32>
    %2 = arith.truncf %1 : vector<256x32xf32> to vector<256x32xbf16>
    %c0_3 = arith.constant 0 : index
    %c0_4 = arith.constant 0 : index
    %3 = vector.load %arg2[%c0_3, %c0_4] : memref<32x64xbf16, #tpu.memory_space<vmem>>, vector<32x64xbf16>
    %cst = arith.constant dense<0.000000e+00> : vector<256x64xf32>
    %4 = tpu.matmul %2, %3, %cst {dimension_numbers = #tpu.dot_dimension_numbers<[1], [0], [0], [1], [0, 0, 1, 1], [], []>} : vector<256x32xbf16>, vector<32x64xbf16>, vector<256x64xf32> -> vector<256x64xf32>
    %5 = vector.broadcast %0 : vector<1x64xf32> to vector<256x64xf32>
    %6 = arith.addf %4, %5 : vector<256x64xf32>
    %cst_5 = arith.constant 5.000000e-01 : f32
    %7 = vector.broadcast %cst_5 : f32 to vector<256x64xf32>
    %8 = arith.mulf %7, %6 : vector<256x64xf32>
    %9 = arith.mulf %6, %6 : vector<256x64xf32>
    %10 = arith.mulf %9, %6 : vector<256x64xf32>
    %cst_6 = arith.constant 4.471500e-02 : f32
    %11 = vector.broadcast %cst_6 : f32 to vector<256x64xf32>
    %12 = arith.mulf %11, %10 : vector<256x64xf32>
    %13 = arith.addf %6, %12 : vector<256x64xf32>
    %cst_7 = arith.constant 0.797884583 : f32
    %14 = vector.broadcast %cst_7 : f32 to vector<256x64xf32>
    %15 = arith.mulf %14, %13 : vector<256x64xf32>
    %16 = math.tanh %15 : vector<256x64xf32>
    %cst_8 = arith.constant 1.000000e+00 : f32
    %17 = vector.broadcast %cst_8 : f32 to vector<256x64xf32>
    %18 = arith.addf %17, %16 : vector<256x64xf32>
    %19 = arith.mulf %8, %18 : vector<256x64xf32>
    %c4 = arith.constant 4 : index
    %c0_9 = arith.constant 0 : index
    %20 = vector.load %arg6[%c4, %c0_9] : memref<12x128xf32, #tpu.memory_space<vmem>>, vector<1x64xf32>
    %c5 = arith.constant 5 : index
    %c0_10 = arith.constant 0 : index
    %21 = vector.load %arg6[%c5, %c0_10] : memref<12x128xf32, #tpu.memory_space<vmem>>, vector<1x64xf32>
    %c6 = arith.constant 6 : index
    %c0_11 = arith.constant 0 : index
    %22 = vector.load %arg6[%c6, %c0_11] : memref<12x128xf32, #tpu.memory_space<vmem>>, vector<1x128xf32>
    %c7 = arith.constant 7 : index
    %c0_12 = arith.constant 0 : index
    %23 = vector.load %arg6[%c7, %c0_12] : memref<12x128xf32, #tpu.memory_space<vmem>>, vector<1x64xf32>
    %cst_13 = arith.constant dense<0.000000e+00> : vector<256xf32>
    %24 = vector.multi_reduction <add>, %19, %cst_13 [1] : vector<256x64xf32> to vector<256xf32>
    %25 = vector.shape_cast %24 : vector<256xf32> to vector<256x1xf32>
    %cst_14 = arith.constant 6.400000e+01 : f32
    %26 = vector.broadcast %cst_14 : f32 to vector<256x1xf32>
    %27 = arith.divf %25, %26 : vector<256x1xf32>
    %28 = vector.broadcast %27 : vector<256x1xf32> to vector<256x64xf32>
    %29 = arith.subf %19, %28 : vector<256x64xf32>
    %30 = arith.mulf %29, %29 : vector<256x64xf32>
    %cst_15 = arith.constant dense<0.000000e+00> : vector<256xf32>
    %31 = vector.multi_reduction <add>, %30, %cst_15 [1] : vector<256x64xf32> to vector<256xf32>
    %32 = vector.shape_cast %31 : vector<256xf32> to vector<256x1xf32>
    %cst_16 = arith.constant 6.400000e+01 : f32
    %33 = vector.broadcast %cst_16 : f32 to vector<256x1xf32>
    %34 = arith.divf %32, %33 : vector<256x1xf32>
    %cst_17 = arith.constant 9.99999974E-6 : f32
    %35 = vector.broadcast %cst_17 : f32 to vector<256x1xf32>
    %36 = arith.addf %34, %35 : vector<256x1xf32>
    %37 = math.rsqrt %36 : vector<256x1xf32>
    %38 = vector.broadcast %37 : vector<256x1xf32> to vector<256x64xf32>
    %39 = arith.mulf %29, %38 : vector<256x64xf32>
    %40 = vector.broadcast %20 : vector<1x64xf32> to vector<256x64xf32>
    %41 = arith.mulf %39, %40 : vector<256x64xf32>
    %42 = vector.broadcast %21 : vector<1x64xf32> to vector<256x64xf32>
    %43 = arith.addf %41, %42 : vector<256x64xf32>
    %44 = arith.truncf %43 : vector<256x64xf32> to vector<256x64xbf16>
    %c0_18 = arith.constant 0 : index
    %c0_19 = arith.constant 0 : index
    %c0_20 = arith.constant 0 : index
    %45 = vector.load %arg3[%c0_18, %c0_19, %c0_20] : memref<2x64x128xbf16, #tpu.memory_space<vmem>>, vector<1x64x128xbf16>
    %46 = vector.shape_cast %45 : vector<1x64x128xbf16> to vector<64x128xbf16>
    %cst_21 = arith.constant dense<0.000000e+00> : vector<256x128xf32>
    %47 = tpu.matmul %44, %46, %cst_21 {dimension_numbers = #tpu.dot_dimension_numbers<[1], [0], [0], [1], [0, 0, 1, 1], [], []>} : vector<256x64xbf16>, vector<64x128xbf16>, vector<256x128xf32> -> vector<256x128xf32>
    %48 = vector.broadcast %22 : vector<1x128xf32> to vector<256x128xf32>
    %49 = arith.addf %47, %48 : vector<256x128xf32>
    %cst_22 = arith.constant 5.000000e-01 : f32
    %50 = vector.broadcast %cst_22 : f32 to vector<256x128xf32>
    %51 = arith.mulf %50, %49 : vector<256x128xf32>
    %52 = arith.mulf %49, %49 : vector<256x128xf32>
    %53 = arith.mulf %52, %49 : vector<256x128xf32>
    %cst_23 = arith.constant 4.471500e-02 : f32
    %54 = vector.broadcast %cst_23 : f32 to vector<256x128xf32>
    %55 = arith.mulf %54, %53 : vector<256x128xf32>
    %56 = arith.addf %49, %55 : vector<256x128xf32>
    %cst_24 = arith.constant 0.797884583 : f32
    %57 = vector.broadcast %cst_24 : f32 to vector<256x128xf32>
    %58 = arith.mulf %57, %56 : vector<256x128xf32>
    %59 = math.tanh %58 : vector<256x128xf32>
    %cst_25 = arith.constant 1.000000e+00 : f32
    %60 = vector.broadcast %cst_25 : f32 to vector<256x128xf32>
    %61 = arith.addf %60, %59 : vector<256x128xf32>
    %62 = arith.mulf %51, %61 : vector<256x128xf32>
    %63 = arith.truncf %62 : vector<256x128xf32> to vector<256x128xbf16>
    %c0_26 = arith.constant 0 : index
    %c0_27 = arith.constant 0 : index
    %c0_28 = arith.constant 0 : index
    %64 = vector.load %arg4[%c0_26, %c0_27, %c0_28] : memref<2x128x64xbf16, #tpu.memory_space<vmem>>, vector<1x128x64xbf16>
    %65 = vector.shape_cast %64 : vector<1x128x64xbf16> to vector<128x64xbf16>
    %cst_29 = arith.constant dense<0.000000e+00> : vector<256x64xf32>
    %66 = tpu.matmul %63, %65, %cst_29 {dimension_numbers = #tpu.dot_dimension_numbers<[1], [0], [0], [1], [0, 0, 1, 1], [], []>} : vector<256x128xbf16>, vector<128x64xbf16>, vector<256x64xf32> -> vector<256x64xf32>
    %67 = vector.broadcast %23 : vector<1x64xf32> to vector<256x64xf32>
    %68 = arith.addf %66, %67 : vector<256x64xf32>
    %69 = arith.addf %19, %68 : vector<256x64xf32>
    %c8 = arith.constant 8 : index
    %c0_30 = arith.constant 0 : index
    %70 = vector.load %arg6[%c8, %c0_30] : memref<12x128xf32, #tpu.memory_space<vmem>>, vector<1x64xf32>
    %c9 = arith.constant 9 : index
    %c0_31 = arith.constant 0 : index
    %71 = vector.load %arg6[%c9, %c0_31] : memref<12x128xf32, #tpu.memory_space<vmem>>, vector<1x64xf32>
    %c10 = arith.constant 10 : index
    %c0_32 = arith.constant 0 : index
    %72 = vector.load %arg6[%c10, %c0_32] : memref<12x128xf32, #tpu.memory_space<vmem>>, vector<1x128xf32>
    %c11 = arith.constant 11 : index
    %c0_33 = arith.constant 0 : index
    %73 = vector.load %arg6[%c11, %c0_33] : memref<12x128xf32, #tpu.memory_space<vmem>>, vector<1x64xf32>
    %cst_34 = arith.constant dense<0.000000e+00> : vector<256xf32>
    %74 = vector.multi_reduction <add>, %69, %cst_34 [1] : vector<256x64xf32> to vector<256xf32>
    %75 = vector.shape_cast %74 : vector<256xf32> to vector<256x1xf32>
    %cst_35 = arith.constant 6.400000e+01 : f32
    %76 = vector.broadcast %cst_35 : f32 to vector<256x1xf32>
    %77 = arith.divf %75, %76 : vector<256x1xf32>
    %78 = vector.broadcast %77 : vector<256x1xf32> to vector<256x64xf32>
    %79 = arith.subf %69, %78 : vector<256x64xf32>
    %80 = arith.mulf %79, %79 : vector<256x64xf32>
    %cst_36 = arith.constant dense<0.000000e+00> : vector<256xf32>
    %81 = vector.multi_reduction <add>, %80, %cst_36 [1] : vector<256x64xf32> to vector<256xf32>
    %82 = vector.shape_cast %81 : vector<256xf32> to vector<256x1xf32>
    %cst_37 = arith.constant 6.400000e+01 : f32
    %83 = vector.broadcast %cst_37 : f32 to vector<256x1xf32>
    %84 = arith.divf %82, %83 : vector<256x1xf32>
    %cst_38 = arith.constant 9.99999974E-6 : f32
    %85 = vector.broadcast %cst_38 : f32 to vector<256x1xf32>
    %86 = arith.addf %84, %85 : vector<256x1xf32>
    %87 = math.rsqrt %86 : vector<256x1xf32>
    %88 = vector.broadcast %87 : vector<256x1xf32> to vector<256x64xf32>
    %89 = arith.mulf %79, %88 : vector<256x64xf32>
    %90 = vector.broadcast %70 : vector<1x64xf32> to vector<256x64xf32>
    %91 = arith.mulf %89, %90 : vector<256x64xf32>
    %92 = vector.broadcast %71 : vector<1x64xf32> to vector<256x64xf32>
    %93 = arith.addf %91, %92 : vector<256x64xf32>
    %94 = arith.truncf %93 : vector<256x64xf32> to vector<256x64xbf16>
    %c1 = arith.constant 1 : index
    %c0_39 = arith.constant 0 : index
    %c0_40 = arith.constant 0 : index
    %95 = vector.load %arg3[%c1, %c0_39, %c0_40] : memref<2x64x128xbf16, #tpu.memory_space<vmem>>, vector<1x64x128xbf16>
    %96 = vector.shape_cast %95 : vector<1x64x128xbf16> to vector<64x128xbf16>
    %cst_41 = arith.constant dense<0.000000e+00> : vector<256x128xf32>
    %97 = tpu.matmul %94, %96, %cst_41 {dimension_numbers = #tpu.dot_dimension_numbers<[1], [0], [0], [1], [0, 0, 1, 1], [], []>} : vector<256x64xbf16>, vector<64x128xbf16>, vector<256x128xf32> -> vector<256x128xf32>
    %98 = vector.broadcast %72 : vector<1x128xf32> to vector<256x128xf32>
    %99 = arith.addf %97, %98 : vector<256x128xf32>
    %cst_42 = arith.constant 5.000000e-01 : f32
    %100 = vector.broadcast %cst_42 : f32 to vector<256x128xf32>
    %101 = arith.mulf %100, %99 : vector<256x128xf32>
    %102 = arith.mulf %99, %99 : vector<256x128xf32>
    %103 = arith.mulf %102, %99 : vector<256x128xf32>
    %cst_43 = arith.constant 4.471500e-02 : f32
    %104 = vector.broadcast %cst_43 : f32 to vector<256x128xf32>
    %105 = arith.mulf %104, %103 : vector<256x128xf32>
    %106 = arith.addf %99, %105 : vector<256x128xf32>
    %cst_44 = arith.constant 0.797884583 : f32
    %107 = vector.broadcast %cst_44 : f32 to vector<256x128xf32>
    %108 = arith.mulf %107, %106 : vector<256x128xf32>
    %109 = math.tanh %108 : vector<256x128xf32>
    %cst_45 = arith.constant 1.000000e+00 : f32
    %110 = vector.broadcast %cst_45 : f32 to vector<256x128xf32>
    %111 = arith.addf %110, %109 : vector<256x128xf32>
    %112 = arith.mulf %101, %111 : vector<256x128xf32>
    %113 = arith.truncf %112 : vector<256x128xf32> to vector<256x128xbf16>
    %c1_46 = arith.constant 1 : index
    %c0_47 = arith.constant 0 : index
    %c0_48 = arith.constant 0 : index
    %114 = vector.load %arg4[%c1_46, %c0_47, %c0_48] : memref<2x128x64xbf16, #tpu.memory_space<vmem>>, vector<1x128x64xbf16>
    %115 = vector.shape_cast %114 : vector<1x128x64xbf16> to vector<128x64xbf16>
    %cst_49 = arith.constant dense<0.000000e+00> : vector<256x64xf32>
    %116 = tpu.matmul %113, %115, %cst_49 {dimension_numbers = #tpu.dot_dimension_numbers<[1], [0], [0], [1], [0, 0, 1, 1], [], []>} : vector<256x128xbf16>, vector<128x64xbf16>, vector<256x64xf32> -> vector<256x64xf32>
    %117 = vector.broadcast %73 : vector<1x64xf32> to vector<256x64xf32>
    %118 = arith.addf %116, %117 : vector<256x64xf32>
    %119 = arith.addf %69, %118 : vector<256x64xf32>
    %c1_50 = arith.constant 1 : index
    %c0_51 = arith.constant 0 : index
    %120 = vector.load %arg6[%c1_50, %c0_51] : memref<12x128xf32, #tpu.memory_space<vmem>>, vector<1x64xf32>
    %c2 = arith.constant 2 : index
    %c0_52 = arith.constant 0 : index
    %121 = vector.load %arg6[%c2, %c0_52] : memref<12x128xf32, #tpu.memory_space<vmem>>, vector<1x64xf32>
    %c3 = arith.constant 3 : index
    %c0_53 = arith.constant 0 : index
    %122 = vector.load %arg6[%c3, %c0_53] : memref<12x128xf32, #tpu.memory_space<vmem>>, vector<1x128xf32>
    %cst_54 = arith.constant dense<0.000000e+00> : vector<256xf32>
    %123 = vector.multi_reduction <add>, %119, %cst_54 [1] : vector<256x64xf32> to vector<256xf32>
    %124 = vector.shape_cast %123 : vector<256xf32> to vector<256x1xf32>
    %cst_55 = arith.constant 6.400000e+01 : f32
    %125 = vector.broadcast %cst_55 : f32 to vector<256x1xf32>
    %126 = arith.divf %124, %125 : vector<256x1xf32>
    %127 = vector.broadcast %126 : vector<256x1xf32> to vector<256x64xf32>
    %128 = arith.subf %119, %127 : vector<256x64xf32>
    %129 = arith.mulf %128, %128 : vector<256x64xf32>
    %cst_56 = arith.constant dense<0.000000e+00> : vector<256xf32>
    %130 = vector.multi_reduction <add>, %129, %cst_56 [1] : vector<256x64xf32> to vector<256xf32>
    %131 = vector.shape_cast %130 : vector<256xf32> to vector<256x1xf32>
    %cst_57 = arith.constant 6.400000e+01 : f32
    %132 = vector.broadcast %cst_57 : f32 to vector<256x1xf32>
    %133 = arith.divf %131, %132 : vector<256x1xf32>
    %cst_58 = arith.constant 9.99999974E-6 : f32
    %134 = vector.broadcast %cst_58 : f32 to vector<256x1xf32>
    %135 = arith.addf %133, %134 : vector<256x1xf32>
    %136 = math.rsqrt %135 : vector<256x1xf32>
    %137 = vector.broadcast %136 : vector<256x1xf32> to vector<256x64xf32>
    %138 = arith.mulf %128, %137 : vector<256x64xf32>
    %139 = vector.broadcast %120 : vector<1x64xf32> to vector<256x64xf32>
    %140 = arith.mulf %138, %139 : vector<256x64xf32>
    %141 = vector.broadcast %121 : vector<1x64xf32> to vector<256x64xf32>
    %142 = arith.addf %140, %141 : vector<256x64xf32>
    %143 = arith.truncf %142 : vector<256x64xf32> to vector<256x64xbf16>
    %c0_59 = arith.constant 0 : index
    %c0_60 = arith.constant 0 : index
    %144 = vector.load %arg5[%c0_59, %c0_60] : memref<64x128xbf16, #tpu.memory_space<vmem>>, vector<64x128xbf16>
    %cst_61 = arith.constant dense<0.000000e+00> : vector<256x128xf32>
    %145 = tpu.matmul %143, %144, %cst_61 {dimension_numbers = #tpu.dot_dimension_numbers<[1], [0], [0], [1], [0, 0, 1, 1], [], []>} : vector<256x64xbf16>, vector<64x128xbf16>, vector<256x128xf32> -> vector<256x128xf32>
    %146 = vector.broadcast %122 : vector<1x128xf32> to vector<256x128xf32>
    %147 = arith.addf %145, %146 : vector<256x128xf32>
    %c0_62 = arith.constant 0 : index
    %c0_63 = arith.constant 0 : index
    %148 = vector.load %arg7[%c0_62, %c0_63] : memref<256x128xf32, #tpu.memory_space<vmem>>, vector<256x128xf32>
    tpu.vector_store %arg7[%c0_62, %c0_63], %147 {strides = array<i32>} : memref<256x128xf32, #tpu.memory_space<vmem>>, vector<256x128xf32>,
    return
  }
  func.func @transform_0(%arg0: i32) -> (i32, i32) {
    %c0_i32 = arith.constant 0 : i32
    %c0_i32_0 = arith.constant 0 : i32
    return %arg0, %c0_i32 : i32, i32
  }
  func.func @transform_1(%arg0: i32) -> (i32, i32) {
    %c0_i32 = arith.constant 0 : i32
    %c0_i32_0 = arith.constant 0 : i32
    %c0_i32_1 = arith.constant 0 : i32
    return %c0_i32, %c0_i32_0 : i32, i32
  }
  func.func @transform_2(%arg0: i32) -> (i32, i32, i32) {
    %c0_i32 = arith.constant 0 : i32
    %c0_i32_0 = arith.constant 0 : i32
    %c0_i32_1 = arith.constant 0 : i32
    %c0_i32_2 = arith.constant 0 : i32
    return %c0_i32, %c0_i32_0, %c0_i32_1 : i32, i32, i32
  }
  func.func @transform_3(%arg0: i32) -> (i32, i32, i32) {
    %c0_i32 = arith.constant 0 : i32
    %c0_i32_0 = arith.constant 0 : i32
    %c0_i32_1 = arith.constant 0 : i32
    %c0_i32_2 = arith.constant 0 : i32
    return %c0_i32, %c0_i32_0, %c0_i32_1 : i32, i32, i32
  }
  func.func @transform_4(%arg0: i32) -> (i32, i32) {
    %c0_i32 = arith.constant 0 : i32
    %c0_i32_0 = arith.constant 0 : i32
    %c0_i32_1 = arith.constant 0 : i32
    return %c0_i32, %c0_i32_0 : i32, i32
  }
  func.func @transform_5(%arg0: i32) -> (i32, i32) {
    %c0_i32 = arith.constant 0 : i32
    %c0_i32_0 = arith.constant 0 : i32
    %c0_i32_1 = arith.constant 0 : i32
    return %c0_i32, %c0_i32_0 : i32, i32
  }
  func.func @transform_6(%arg0: i32) -> (i32, i32) {
    %c0_i32 = arith.constant 0 : i32
    %c0_i32_0 = arith.constant 0 : i32
    return %arg0, %c0_i32 : i32, i32
  }
}

</mosaic_0001>

<bundles_post_ra>
// kernel: model_forward.1
= control target key start
LH: loop header
LB: loop body
LE: loop exit
PB: predicated region body
PF: predicated region fallthrough
CT: control target
= control target key end

     0   :  { %s5287_s21 = smov 0   ;;  %s7758_s0 = inlined_call_operand.vmem [shape: f32[512,32], index: 0, kind: input, shape index: {}]   ;;  %s7759_s1 = inlined_call_operand.vmem [shape: bf16[32,64], index: 1, kind: input, shape index: {}]   ;;  %s7760_s2 = inlined_call_operand.vmem [shape: bf16[2,64,128], index: 2, kind: input, shape index: {}]   ;;  %s7761_s3 = inlined_call_operand.vmem [shape: bf16[2,128,64], index: 3, kind: input, shape index: {}]   ;;  %s7762_s4 = inlined_call_operand.vmem [shape: bf16[64,128], index: 4, kind: input, shape index: {}]   ;;  %s7763_s5 = inlined_call_operand.vmem [shape: f32[12,128], index: 5, kind: input, shape index: {}]   ;;  %s7764_s6 = inlined_call_operand.vmem [shape: f32[512,128], index: 6, kind: output, shape index: {}]  }
   0x1 LB: > { %s4303_s22 = sadd.s32 4294967295, %s5250_s21   ;;  %p4307_p0 = scmp.ge.s32.totalorder %s5250_s21, 1  ;;  %s5250_s21 = sphi %s5287_s21, %s16_s21  }
   0x2   : > { %p213_p1 = scmp.lt.s32.totalorder %s5250_s21, 3 }
   0x4   : > { %p214_p2 = pnand %p4307_p0, %p213_p1 }
   0x6   : > { %217 = sbr.rel (%p214_p2) target bundleno = 2464 (0x9a0), region = 44 }
   0xd   : > { %v4830_v0 = vld [vmem:[%s7759_s1] sm:$0xff]   ;;  %s4308_s25 = sshll.u32 %s4303_s22, 5  ;;  %v4831_v1 = vld [vmem:[%s7759_s1 + $0x8] sm:$0xff]   ;;  %vm325_vm0 = vcmask 261120   ;;  %vm827_vm1 = vcmask 523264  }
   0xe   : > { %p244_p3 = scmp.lt.s32.totalorder %s4308_s25, 63  ;;  %4570 = vmatprep.subr.bf16.mxu0 %v4830_v0  ;;  %v5362_v50 = vld [vmem:[%s7763_s5] ss:$0 sm:$0xff] }
   0xf   : > { %4571 = vmatpush3.bf16.msra.mxu0 %v4830_v0 }
  0x10   : > { %s7880_s25 = smov (!%p244_p3, %s4308_s25), 63  ;;  %4572 = vmatprep.subr.bf16.mxu0 %v4831_v1 }
  0x11   : > { %s4309_s28 = sshll.u32 %s7880_s25, 3 }
  0x12   : > { %s5309_s7 = scalar_lea.vmem %s7758_s0, %s4309_s28  ;;  %s7689_s30 = scalar_lea.vmem %s7764_s6, %s4309_s28 }
  0x13   : > { %4573 = vmatpush3.bf16.msra.mxu0 %v4831_v1  ;;  %v257_v2 = vld [vmem:[%s5309_s7] sm:$0xff]  ;;  %v258_v3 = vld [vmem:[%s5309_s7 + $0x8] sm:$0xff]  ;;  %v259_v4 = vld [vmem:[%s5309_s7 + $0x10] sm:$0xff] }
  0x14   : > { %v289_v5 = vpack.c.bf16 %v258_v3, %v257_v2  ;;  %v260_v6 = vld [vmem:[%s5309_s7 + $0x18] sm:$0xff]  ;;  %v261_v7 = vld [vmem:[%s5309_s7 + $0x20] sm:$0xff]  ;;  %v262_v8 = vld [vmem:[%s5309_s7 + $0x28] sm:$0xff] }
  0x15   : > { %v290_v9 = vpack.c.bf16 %v260_v6, %v259_v4  ;;  %v291_v10 = vpack.c.bf16 %v262_v8, %v261_v7  ;;  %v263_v11 = vld [vmem:[%s5309_s7 + $0x30] sm:$0xff]  ;;  %v264_v12 = vld [vmem:[%s5309_s7 + $0x38] sm:$0xff]  ;;  %v265_v13 = vld [vmem:[%s5309_s7 + $0x40] sm:$0xff] }
  0x16   : > { %4574 = vmatprep.mubr.msk.bf16.mxu0 %vm325_vm0, %v289_v5  ;;  %v266_v14 = vld [vmem:[%s5309_s7 + $0x48] sm:$0xff]  ;;  %v292_v15 = vpack.c.bf16 %v264_v12, %v263_v11  ;;  %v267_v17 = vld [vmem:[%s5309_s7 + $0x50] sm:$0xff]  ;;  %v268_v18 = vld [vmem:[%s5309_s7 + $0x58] sm:$0xff] }
  0x17   : > { %4575 = vmatmul.mubr.msk.bf16.vlgmr.msra.gmra.mrb[0].mxu0 %vm325_vm0, %v290_v9  ;;  %v293_v16 = vpack.c.bf16 %v266_v14, %v265_v13  ;;  %v269_v19 = vld [vmem:[%s5309_s7 + $0x60] sm:$0xff]  ;;  %v270_v20 = vld [vmem:[%s5309_s7 + $0x68] sm:$0xff]  ;;  %v294_v21 = vpack.c.bf16 %v268_v18, %v267_v17  ;;  %v271_v23 = vld [vmem:[%s5309_s7 + $0x70] sm:$0xff] }
  0x18   : > { %4578 = vmatprep.mubr.msk.bf16.mxu0 %vm325_vm0, %v291_v10  ;;  %v295_v22 = vpack.c.bf16 %v270_v20, %v269_v19  ;;  %v272_v24 = vld [vmem:[%s5309_s7 + $0x78] sm:$0xff]  ;;  %v273_v25 = vld [vmem:[%s5309_s7 + $0x80] sm:$0xff]  ;;  %v274_v26 = vld [vmem:[%s5309_s7 + $0x88] sm:$0xff] }
  0x19   : > { %v296_v27 = vpack.c.bf16 %v272_v24, %v271_v23  ;;  %v297_v28 = vpack.c.bf16 %v274_v26, %v273_v25  ;;  %v275_v29 = vld [vmem:[%s5309_s7 + $0x90] sm:$0xff]  ;;  %v276_v30 = vld [vmem:[%s5309_s7 + $0x98] sm:$0xff]  ;;  %v277_v31 = vld [vmem:[%s5309_s7 + $0xa0] sm:$0xff] }
  0x1a   : > { %v278_v32 = vld [vmem:[%s5309_s7 + $0xa8] sm:$0xff]  ;;  %v298_v33 = vpack.c.bf16 %v276_v30, %v275_v29  ;;  %v279_v35 = vld [vmem:[%s5309_s7 + $0xb0] sm:$0xff]  ;;  %v280_v36 = vld [vmem:[%s5309_s7 + $0xb8] sm:$0xff] }
  0x1b   : > { %v299_v34 = vpack.c.bf16 %v278_v32, %v277_v31  ;;  %v281_v37 = vld [vmem:[%s5309_s7 + $0xc0] sm:$0xff]  ;;  %v282_v38 = vld [vmem:[%s5309_s7 + $0xc8] sm:$0xff]  ;;  %v300_v39 = vpack.c.bf16 %v280_v36, %v279_v35  ;;  %v283_v41 = vld [vmem:[%s5309_s7 + $0xd0] sm:$0xff] }
  0x1c   : > { %v301_v40 = vpack.c.bf16 %v282_v38, %v281_v37  ;;  %v284_v42 = vld [vmem:[%s5309_s7 + $0xd8] sm:$0xff]  ;;  %v285_v43 = vld [vmem:[%s5309_s7 + $0xe0] sm:$0xff]  ;;  %v286_v44 = vld [vmem:[%s5309_s7 + $0xe8] sm:$0xff] }
  0x1d   : > { %v302_v45 = vpack.c.bf16 %v284_v42, %v283_v41  ;;  %v303_v46 = vpack.c.bf16 %v286_v44, %v285_v43  ;;  %v287_v47 = vld [vmem:[%s5309_s7 + $0xf0] sm:$0xff]  ;;  %v288_v48 = vld [vmem:[%s5309_s7 + $0xf8] sm:$0xff] }
  0x1e   : > { %v304_v49 = vpack.c.bf16 %v288_v48, %v287_v47 }
  0x1f   : > { %4579 = vmatmul.mubr.msk.bf16.gmra.mrb[4].mxu0 %vm325_vm0, %v292_v15 }
  0x20   : > { %4582 = vmatprep.mubr.msk.bf16.mxu0 %vm325_vm0, %v293_v16 }
  0x27   : > { %4583 = vmatmul.mubr.msk.bf16.gmra.mrb[8].mxu0 %vm325_vm0, %v294_v21 }
  0x28   : > { %4586 = vmatprep.mubr.msk.bf16.mxu0 %vm325_vm0, %v295_v22 }
  0x2f   : > { %4587 = vmatmul.mubr.msk.bf16.gmra.mrb[12].mxu0 %vm325_vm0, %v296_v27 }
  0x30   : > { %4590 = vmatprep.mubr.msk.bf16.mxu0 %vm325_vm0, %v297_v28 }
  0x37   : > { %4591 = vmatmul.mubr.msk.bf16.gmra.mrb[16].mxu0 %vm325_vm0, %v298_v33 }
  0x38   : > { %4594 = vmatprep.mubr.msk.bf16.mxu0 %vm325_vm0, %v299_v34 }
  0x3f   : > { %4595 = vmatmul.mubr.msk.bf16.gmra.mrb[20].mxu0 %vm325_vm0, %v300_v39 }
  0x40   : > { %4598 = vmatprep.mubr.msk.bf16.mxu0 %vm325_vm0, %v301_v40 }
  0x47   : > { %4599 = vmatmul.mubr.msk.bf16.gmra.mrb[24].mxu0 %vm325_vm0, %v302_v45 }
  0x48   : > { %4602 = vmatprep.mubr.msk.bf16.mxu0 %vm325_vm0, %v303_v46 }
  0x4f   : > { %4603 = vmatmul.mubr.msk.bf16.gmra.mrb[28].mxu0 %vm325_vm0, %v304_v49 }
  0xea   : > { %v4576_v51 = vpop.f32.mrb[0].mxu0 }
  0xeb   : > { %v417_v52 = vadd.f32 %v4576_v51, %v5362_v50  ;;  %v408_v53 = vpop.f32.mrb[1].mxu0 }
  0xec   : > { %v409_v54 = vadd.f32 %v5362_v50, %v408_v53  ;;  %v4577_v55 = vpop.f32.mrb[2].mxu0 }
  0xed   : > { %v569_v56 = vmul.f32 %v417_v52, %v417_v52  ;;  %v420_v57 = vadd.f32 %v4577_v55, %v5362_v50  ;;  %v411_v58 = vpop.f32.mrb[3].mxu0  ;;  %v5371_v10 = vmul.f32 0.5, %v417_v52 }
  0xee   : > { %v567_v59 = vmul.f32 %v409_v54, %v409_v54  ;;  %v412_v60 = vadd.f32 %v5362_v50, %v411_v58  ;;  %v5374_v15 = vmul.f32 0.5, %v409_v54 }
  0xef   : > { %v601_v61 = vmul.f32 %v569_v56, %v417_v52  ;;  %v570_v62 = vmul.f32 %v420_v57, %v420_v57  ;;  %v5386_v33 = vmul.f32 0.5, %v420_v57 }
  0xf0   : > { %v599_v63 = vmul.f32 %v567_v59, %v409_v54  ;;  %v568_v0 = vmul.f32 %v412_v60, %v412_v60  ;;  %v5388_v34 = vmul.f32 0.5, %v412_v60 }
  0xf1   : > { %v633_v1 = vmul.f32 0.044715, %v601_v61  ;;  %v602_v2 = vmul.f32 %v570_v62, %v420_v57 }
  0xf2   : > { %v631_v3 = vmul.f32 0.044715, %v599_v63  ;;  %v600_v4 = vmul.f32 %v568_v0, %v412_v60  ;;  %v4580_v5 = vpop.f32.mrb[4].mxu0 }
  0xf3   : > { %v665_v6 = vadd.f32 %v633_v1, %v417_v52  ;;  %v634_v7 = vmul.f32 0.044715, %v602_v2  ;;  %v5369_v8 = vadd.f32 %v4580_v5, %v5362_v50  ;;  %v424_v9 = vpop.f32.mrb[5].mxu0 }
  0xf4   : > { %v663_v11 = vadd.f32 %v631_v3, %v409_v54  ;;  %v632_v12 = vmul.f32 0.044715, %v600_v4  ;;  %v425_v13 = vadd.f32 %v5362_v50, %v424_v9  ;;  %v4581_v14 = vpop.f32.mrb[6].mxu0 }
  0xf5   : > { %v697_v16 = vmul.f32 0.7978846, %v665_v6  ;;  %v666_v17 = vadd.f32 %v634_v7, %v420_v57  ;;  %v573_v18 = vmul.f32 %v5369_v8, %v5369_v8  ;;  %v5379_v19 = vadd.f32 %v4581_v14, %v5362_v50  ;;  %v427_v20 = vpop.f32.mrb[7].mxu0 }
  0xf6   : > { %v695_v21 = vmul.f32 0.7978846, %v663_v11  ;;  %v664_v22 = vadd.f32 %v632_v12, %v412_v60  ;;  %v571_v23 = vmul.f32 %v425_v13, %v425_v13  ;;  %v428_v24 = vadd.f32 %v5362_v50, %v427_v20 }
  0xf7   : > { %v698_v25 = vmul.f32 0.7978846, %v666_v17  ;;  %v605_v26 = vmul.f32 %v573_v18, %v5369_v8  ;;  %v574_v27 = vmul.f32 %v5379_v19, %v5379_v19  ;;  %4860 = vtanh.f32 %v697_v16 }
  0xf8   : > { %v696_v28 = vmul.f32 0.7978846, %v664_v22  ;;  %v603_v29 = vmul.f32 %v571_v23, %v425_v13  ;;  %v572_v30 = vmul.f32 %v428_v24, %v428_v24  ;;  %4862 = vtanh.f32 %v695_v21 }
  0xf9   : > { %v637_v31 = vmul.f32 0.044715, %v605_v26  ;;  %v606_v32 = vmul.f32 %v574_v27, %v5379_v19  ;;  %4864 = vtanh.f32 %v698_v25  ;;  %v5390_v38 = vmul.f32 0.5, %v425_v13 }
  0xfa   : > { %v635_v35 = vmul.f32 0.044715, %v603_v29  ;;  %v604_v36 = vmul.f32 %v572_v30, %v428_v24  ;;  %v4584_v37 = vpop.f32.mrb[8].mxu0  ;;  %4866 = vtanh.f32 %v696_v28  ;;  %v5399_v47 = vmul.f32 0.5, %v428_v24 }
  0xfb   : > { %v669_v39 = vadd.f32 %v637_v31, %v5369_v8  ;;  %v638_v40 = vmul.f32 0.044715, %v606_v32  ;;  %v5394_v41 = vadd.f32 %v4584_v37, %v5362_v50  ;;  %v440_v42 = vpop.f32.mrb[9].mxu0  ;;  %v5420_v3 = vmul.f32 0.5, %v5369_v8 }
  0xfc   : > { %v667_v43 = vadd.f32 %v635_v35, %v425_v13  ;;  %v636_v44 = vmul.f32 0.044715, %v604_v36  ;;  %v5397_v45 = vadd.f32 %v5362_v50, %v440_v42  ;;  %v4585_v46 = vpop.f32.mrb[10].mxu0 }
  0xfd   : > { %v701_v48 = vmul.f32 0.7978846, %v669_v39  ;;  %v670_v49 = vadd.f32 %v638_v40, %v5379_v19  ;;  %v577_v51 = vmul.f32 %v5394_v41, %v5394_v41  ;;  %v5405_v52 = vadd.f32 %v4585_v46, %v5362_v50  ;;  %v443_v53 = vpop.f32.mrb[11].mxu0 }
  0xfe   : > { %v699_v54 = vmul.f32 0.7978846, %v667_v43  ;;  %v668_v55 = vadd.f32 %v636_v44, %v428_v24  ;;  %v575_v56 = vmul.f32 %v5397_v45, %v5397_v45  ;;  %v5410_v57 = vadd.f32 %v5362_v50, %v443_v53 }
  0xff   : > { %4868 = vtanh.f32 %v701_v48  ;;  %v702_v58 = vmul.f32 0.7978846, %v670_v49  ;;  %v609_v59 = vmul.f32 %v577_v51, %v5394_v41  ;;  %v578_v60 = vmul.f32 %v5405_v52, %v5405_v52 }
 0x100   : > { %4870 = vtanh.f32 %v699_v54  ;;  %v700_v61 = vmul.f32 0.7978846, %v668_v55  ;;  %v607_v62 = vmul.f32 %v575_v56, %v5397_v45  ;;  %v576_v63 = vmul.f32 %v5410_v57, %v5410_v57 }
 0x101   : > { %v4861_v0 = vpop.eup %4860  ;;  %4872 = vtanh.f32 %v702_v58  ;;  %v641_v1 = vmul.f32 0.044715, %v609_v59  ;;  %v610_v2 = vmul.f32 %v578_v60, %v5405_v52 }
 0x102   : > { %v4863_v4 = vpop.eup %4862  ;;  %4874 = vtanh.f32 %v700_v61  ;;  %v639_v5 = vmul.f32 0.044715, %v607_v62  ;;  %v608_v6 = vmul.f32 %v576_v63, %v5410_v57  ;;  %v4588_v7 = vpop.f32.mrb[12].mxu0  ;;  %v761_v9 = vadd.f32 1.0, %v4861_v0 }
 0x103   : > { %v673_v11 = vadd.f32 %v641_v1, %v5394_v41  ;;  %v642_v12 = vmul.f32 0.044715, %v610_v2  ;;  %v5425_v13 = vadd.f32 %v4588_v7, %v5362_v50  ;;  %v456_v14 = vpop.f32.mrb[13].mxu0  ;;  %v759_v16 = vadd.f32 1.0, %v4863_v4  ;;  %v4865_v17 = vpop.eup %4864 }
 0x104   : > { %v671_v18 = vadd.f32 %v639_v5, %v5397_v45  ;;  %v640_v8 = vmul.f32 0.044715, %v608_v6  ;;  %v5429_v20 = vadd.f32 %v5362_v50, %v456_v14  ;;  %v4589_v21 = vpop.f32.mrb[14].mxu0  ;;  %v5432_v22 = vmul.f32 %v761_v9, %v5371_v10  ;;  %v5434_v23 = vpop.eup %4866 }
 0x105   : > { %v705_v24 = vmul.f32 0.7978846, %v673_v11  ;;  %v674_v25 = vadd.f32 %v642_v12, %v5405_v52  ;;  %v581_v26 = vmul.f32 %v5425_v13, %v5425_v13  ;;  %v5440_v27 = vadd.f32 %v4589_v21, %v5362_v50  ;;  %v459_v28 = vpop.f32.mrb[15].mxu0 }
 0x106   : > { %v703_v29 = vmul.f32 0.7978846, %v671_v18  ;;  %v672_v30 = vadd.f32 %v640_v8, %v5410_v57  ;;  %v579_v31 = vmul.f32 %v5429_v20, %v5429_v20  ;;  %v5446_v10 = vadd.f32 %v5362_v50, %v459_v28 }
 0x107   : > { %4876 = vtanh.f32 %v705_v24  ;;  %v706_v32 = vmul.f32 0.7978846, %v674_v25  ;;  %v613_v35 = vmul.f32 %v581_v26, %v5425_v13  ;;  %v582_v36 = vmul.f32 %v5440_v27, %v5440_v27 }
 0x108   : > { %4878 = vtanh.f32 %v703_v29  ;;  %v704_v37 = vmul.f32 0.7978846, %v672_v30  ;;  %v611_v39 = vmul.f32 %v579_v31, %v5429_v20  ;;  %v580_v40 = vmul.f32 %v5446_v10, %v5446_v10 }
 0x109   : > { %v5454_v42 = vpop.eup %4868  ;;  %4880 = vtanh.f32 %v706_v32  ;;  %v645_v43 = vmul.f32 0.044715, %v613_v35  ;;  %v614_v44 = vmul.f32 %v582_v36, %v5440_v27  ;;  %v834_v46 = vsel %vm827_vm1, %v5432_v22, 0.0 }
 0x10a   : > { %v4871_v48 = vpop.eup %4870  ;;  %4882 = vtanh.f32 %v704_v37  ;;  %v643_v49 = vmul.f32 0.044715, %v611_v39  ;;  %v612_v51 = vmul.f32 %v580_v40, %v5446_v10  ;;  %835 = vadd.xlane.f32.xlu1 %v834_v46  ;;  %v5461_v53 = vmul.f32 %v759_v16, %v5374_v15  ;;  %v4592_v54 = vpop.f32.mrb[16].mxu0 }
 0x10b   : > { %v5463_v55 = vpop.eup %4872  ;;  %v677_v56 = vadd.f32 %v645_v43, %v5425_v13  ;;  %v646_v58 = vmul.f32 0.044715, %v614_v44  ;;  %v5467_v59 = vadd.f32 %v4592_v54, %v5362_v50  ;;  %v762_v60 = vadd.f32 1.0, %v4865_v17  ;;  %v472_v61 = vpop.f32.mrb[17].mxu0 }
 0x10c   : > { %v4875_v62 = vpop.eup %4874  ;;  %v675_v63 = vadd.f32 %v643_v49, %v5429_v20  ;;  %v644_v0 = vmul.f32 0.044715, %v612_v51  ;;  %v828_v1 = vsel %vm827_vm1, %v5461_v53, 0.0  ;;  %v5473_v15 = vadd.f32 %v5362_v50, %v472_v61  ;;  %v4593_v2 = vpop.f32.mrb[18].mxu0 }
 0x10d   : > { %v709_v4 = vmul.f32 0.7978846, %v677_v56  ;;  %v678_v5 = vadd.f32 %v646_v58, %v5440_v27  ;;  %829 = vadd.xlane.f32.xlu0 %v828_v1  ;;  %v585_v6 = vmul.f32 %v5467_v59, %v5467_v59  ;;  %v5479_v7 = vmul.f32 %v762_v60, %v5386_v33  ;;  %v475_v9 = vpop.f32.mrb[19].mxu0 }
 0x10e   : > { %v707_v11 = vmul.f32 0.7978846, %v675_v63  ;;  %v676_v12 = vadd.f32 %v644_v0, %v5446_v10  ;;  %v583_v14 = vmul.f32 %v5473_v15, %v5473_v15  ;;  %v5485_v16 = vadd.f32 %v4593_v2, %v5362_v50 }
 0x10f   : > { %4884 = vtanh.f32 %v709_v4  ;;  %v710_v17 = vmul.f32 0.7978846, %v678_v5  ;;  %v617_v18 = vmul.f32 %v585_v6, %v5467_v59  ;;  %v837_v8 = vsel %vm827_vm1, %v5479_v7, 0.0 }
 0x110   : > { %4886 = vtanh.f32 %v707_v11  ;;  %838 = vadd.xlane.f32.xlu1 %v837_v8  ;;  %v615_v33 = vmul.f32 %v583_v14, %v5473_v15  ;;  %v586_v21 = vmul.f32 %v5485_v16, %v5485_v16  ;;  %v5494_v24 = vmul.f32 0.5, %v5379_v19 }
 0x111   : > { %v5496_v25 = vpop.eup %4876  ;;  %v708_v26 = vmul.f32 0.7978846, %v676_v12  ;;  %v649_v28 = vmul.f32 0.044715, %v617_v18  ;;  %v760_v29 = vadd.f32 1.0, %v5434_v23  ;;  %v5500_v30 = vadd.f32 %v5362_v50, %v475_v9 }
 0x112   : > { %v4879_v31 = vpop.eup %4878  ;;  %4888 = vtanh.f32 %v710_v17  ;;  %v647_v32 = vmul.f32 0.044715, %v615_v33  ;;  %v618_v35 = vmul.f32 %v586_v21, %v5485_v16  ;;  %v763_v36 = vadd.f32 1.0, %v4871_v48  ;;  %v4596_v37 = vpop.f32.mrb[20].mxu0 }
 0x113   : > { %v5503_v39 = vpop.eup %4880  ;;  %v681_v19 = vadd.f32 %v649_v28, %v5467_v59  ;;  %v5507_v40 = vmul.f32 %v760_v29, %v5388_v34  ;;  %v584_v23 = vmul.f32 %v5500_v30, %v5500_v30  ;;  %v5512_v43 = vadd.f32 %v4596_v37, %v5362_v50  ;;  %v488_v44 = vpop.f32.mrb[21].mxu0 }
 0x114   : > { %v5514_v46 = vpop.eup %4882  ;;  %v679_v49 = vadd.f32 %v647_v32, %v5473_v15  ;;  %v650_v48 = vmul.f32 0.044715, %v618_v35  ;;  %v5518_v51 = vmul.f32 %v763_v36, %v5390_v38  ;;  %v764_v54 = vadd.f32 1.0, %v4875_v62  ;;  %v4597_v56 = vpop.f32.mrb[22].mxu0 }
 0x115   : > { %v713_v58 = vmul.f32 0.7978846, %v681_v19  ;;  %v831_v34 = vsel %vm827_vm1, %v5507_v40, 0.0  ;;  %v616_v60 = vmul.f32 %v584_v23, %v5500_v30  ;;  %v589_v61 = vmul.f32 %v5512_v43, %v5512_v43  ;;  %v491_v63 = vpop.f32.mrb[23].mxu0 }
 0x116   : > { %4890 = vtanh.f32 %v708_v26  ;;  %v682_v0 = vadd.f32 %v650_v48, %v5485_v16  ;;  %832 = vadd.xlane.f32.xlu0 %v831_v34  ;;  %v5527_v1 = vmul.f32 %v764_v54, %v5399_v47  ;;  %v543_v38 = vmul.f32 0.5, %v5397_v45 }
 0x117   : > { %v648_v62 = vmul.f32 0.044715, %v616_v60  ;;  %v840_v2 = vsel %vm827_vm1, %v5518_v51, 0.0  ;;  %v621_v4 = vmul.f32 %v589_v61, %v5512_v43  ;;  %v5534_v5 = vadd.f32 %v5362_v50, %v488_v44 }
 0x118   : > { %4892 = vtanh.f32 %v713_v58  ;;  %v711_v6 = vmul.f32 0.7978846, %v679_v49  ;;  %v843_v9 = vsel %vm827_vm1, %v5527_v1, 0.0  ;;  %v5539_v11 = vadd.f32 %v4597_v56, %v5362_v50 }
 0x119   : > { %v5541_v47 = vpop.eup %4884  ;;  %v680_v45 = vadd.f32 %v648_v62, %v5500_v30  ;;  %v653_v12 = vmul.f32 0.044715, %v621_v4  ;;  %844 = vadd.xlane.f32.xlu1 %v843_v9  ;;  %v587_v14 = vmul.f32 %v5534_v5, %v5534_v5  ;;  %v765_v17 = vadd.f32 1.0, %v5454_v42 }
 0x11a   : > { %v5547_v18 = vpop.eup %4886  ;;  %v714_v8 = vmul.f32 0.7978846, %v682_v0  ;;  %841 = vadd.xlane.f32.xlu0 %v840_v2  ;;  %v590_v33 = vmul.f32 %v5539_v11, %v5539_v11  ;;  %v5552_v21 = vadd.f32 %v5362_v50, %v491_v63  ;;  %v766_v26 = vadd.f32 1.0, %v5463_v55  ;;  %v4600_v28 = vpop.f32.mrb[24].mxu0 }
 0x11b   : > { %v712_v29 = vmul.f32 0.7978846, %v680_v45  ;;  %v685_v32 = vadd.f32 %v653_v12, %v5512_v43  ;;  %v619_v35 = vmul.f32 %v587_v14, %v5534_v5  ;;  %v5558_v42 = vmul.f32 %v765_v17, %v5420_v3  ;;  %v504_v36 = vpop.f32.mrb[25].mxu0 }
 0x11c   : > { %v5560_v37 = vpop.eup %4888  ;;  %v622_v19 = vmul.f32 %v590_v33, %v5539_v11  ;;  %v588_v23 = vmul.f32 %v5552_v21, %v5552_v21  ;;  %v5566_v44 = vmul.f32 %v766_v26, %v5494_v24  ;;  %v767_v55 = vadd.f32 1.0, %v4879_v31  ;;  %v4601_v49 = vpop.f32.mrb[26].mxu0 }
 0x11d   : > { %4894 = vtanh.f32 %v711_v6  ;;  %v717_v48 = vmul.f32 0.7978846, %v685_v32  ;;  %v651_v54 = vmul.f32 0.044715, %v619_v35  ;;  %v846_v3 = vsel %vm827_vm1, %v5558_v42, 0.0  ;;  %v507_v56 = vpop.f32.mrb[27].mxu0 }
 0x11e   : > { %v654_v58 = vmul.f32 0.044715, %v622_v19  ;;  %847 = vadd.xlane.f32.xlu0 %v846_v3  ;;  %v620_v34 = vmul.f32 %v588_v23, %v5552_v21  ;;  %v849_v60 = vsel %vm827_vm1, %v5566_v44, 0.0  ;;  %v5573_v61 = vmul.f32 %v767_v55, %v543_v38 }
 0x11f   : > { %4896 = vtanh.f32 %v714_v8  ;;  %v683_v24 = vadd.f32 %v651_v54, %v5534_v5  ;;  %850 = vadd.xlane.f32.xlu1 %v849_v60  ;;  %v5577_v31 = vadd.f32 %v4600_v28, %v5362_v50  ;;  %v544_v2 = vmul.f32 0.5, %v5410_v57 }
 0x120   : > { %v5579_v63 = vpop.eup %4890  ;;  %v652_v0 = vmul.f32 0.044715, %v620_v34  ;;  %v852_v62 = vsel %vm827_vm1, %v5573_v61, 0.0  ;;  %v768_v4 = vadd.f32 1.0, %v5514_v46  ;;  %4898 = vtanh.f32 %v712_v29 }
 0x121   : > { %v593_v38 = vmul.f32 %v5577_v31, %v5577_v31  ;;  %v5588_v6 = vadd.f32 %v5362_v50, %v504_v36  ;;  %v5591_v9 = vadd.f32 %v4601_v49, %v5362_v50  ;;  %4900 = vtanh.f32 %v717_v48 }
 0x122   : > { %v5593_v45 = vpop.eup %4892  ;;  %v686_v12 = vadd.f32 %v654_v58, %v5539_v11  ;;  %853 = vadd.xlane.f32.xlu0 %v852_v62  ;;  %v5596_v14 = vmul.f32 %v768_v4, %v544_v2  ;;  %v4604_v57 = vpop.f32.mrb[28].mxu0  ;;  %v715_v46 = vmul.f32 0.7978846, %v683_v24  ;;  %v684_v28 = vadd.f32 %v652_v0, %v5552_v21 }
 0x123   : > { %v625_v17 = vmul.f32 %v593_v38, %v5577_v31  ;;  %v591_v8 = vmul.f32 %v5588_v6, %v5588_v6  ;;  %v594_v33 = vmul.f32 %v5591_v9, %v5591_v9  ;;  %v520_v26 = vpop.f32.mrb[29].mxu0  ;;  %v545_v32 = vmul.f32 0.5, %v5394_v41 }
 0x124   : > { %v855_v29 = vsel %vm827_vm1, %v5596_v14, 0.0  ;;  %v769_v35 = vadd.f32 1.0, %v5496_v25  ;;  %v4605_v36 = vpop.f32.mrb[30].mxu0  ;;  %v5611_v49 = vadd.f32 %v5362_v50, %v507_v56  ;;  %v718_v54 = vmul.f32 0.7978846, %v686_v12 }
 0x125   : > { %v657_v19 = vmul.f32 0.044715, %v625_v17  ;;  %856 = vadd.xlane.f32.xlu1 %v855_v29  ;;  %v623_v23 = vmul.f32 %v591_v8, %v5588_v6  ;;  %v626_v55 = vmul.f32 %v594_v33, %v5591_v9  ;;  %v523_v48 = vpop.f32.mrb[31].mxu0  ;;  %v546_v58 = vmul.f32 0.5, %v5405_v52 }
 0x126   : > { %v5613_v3 = vmul.f32 %v769_v35, %v545_v32  ;;  %v770_v41 = vadd.f32 1.0, %v5503_v39  ;;  %4902 = vtanh.f32 %v715_v46  ;;  %v592_v24 = vmul.f32 %v5611_v49, %v5611_v49 }
 0x127   : > { %v4895_v34 = vpop.eup %4894  ;;  %v655_v25 = vmul.f32 0.044715, %v623_v23  ;;  %v658_v60 = vmul.f32 0.044715, %v626_v55  ;;  %v547_v62 = vmul.f32 0.5, %v5429_v20  ;;  %v771_v2 = vadd.f32 1.0, %v5547_v18 }
 0x128   : > { %v858_v0 = vsel %vm827_vm1, %v5613_v3, 0.0  ;;  %v5621_v56 = vmul.f32 %v770_v41, %v546_v58  ;;  %v716_v52 = vmul.f32 0.7978846, %v684_v28  ;;  %v689_v39 = vadd.f32 %v657_v19, %v5577_v31 }
 0x129   : > { %v5625_v4 = vpop.eup %4896  ;;  %v687_v38 = vadd.f32 %v655_v25, %v5588_v6  ;;  %859 = vadd.xlane.f32.xlu0 %v858_v0  ;;  %v624_v12 = vmul.f32 %v592_v24, %v5611_v49  ;;  %4904 = vtanh.f32 %v718_v54  ;;  %v5632_v17 = vmul.f32 %v771_v2, %v547_v62 }
 0x12a   : > { %v861_v46 = vsel %vm827_vm1, %v5621_v56, 0.0  ;;  %v5635_v20 = vadd.f32 %v4604_v57, %v5362_v50  ;;  %v4899_v18 = vpop.eup %4898  ;;  %v690_v33 = vadd.f32 %v658_v60, %v5591_v9  ;;  %v548_v29 = vmul.f32 0.5, %v5446_v10 }
 0x12b   : > { %7803 = vst [vmem:[#allocation2_spill] sm:$0xff] %v5632_v17  ;;  %v719_v8 = vmul.f32 0.7978846, %v687_v38  ;;  %v656_v28 = vmul.f32 0.044715, %v624_v12  ;;  %862 = vadd.xlane.f32.xlu1 %v861_v46  ;;  %v5639_v32 = vpop.eup %4900  ;;  %v864_v35 = vsel %vm827_vm1, %v5632_v17, 0.0  ;;  %v5647_v57 = vadd.f32 %v5362_v50, %v520_v26 }
 0x12c   : > { %v597_v19 = vmul.f32 %v5635_v20, %v5635_v20  ;;  %v772_v23 = vadd.f32 1.0, %v5579_v63  ;;  %4906 = vtanh.f32 %v716_v52  ;;  %v721_v55 = vmul.f32 0.7978846, %v689_v39 }
 0x12d   : > { %v688_v54 = vadd.f32 %v656_v28, %v5611_v49  ;;  %865 = vadd.xlane.f32.xlu0 %v864_v35  ;;  %v5651_v10 = vadd.f32 %v4605_v36, %v5362_v50  ;;  %v595_v25 = vmul.f32 %v5647_v57, %v5647_v57  ;;  %v549_v63 = vmul.f32 0.5, %v5425_v13 }
 0x12e   : > { %v629_v58 = vmul.f32 %v597_v19, %v5635_v20  ;;  %v5654_v41 = vmul.f32 %v772_v23, %v548_v29  ;;  %v773_v24 = vadd.f32 1.0, %v5541_v47  ;;  %v5663_v0 = vadd.f32 %v5362_v50, %v523_v48 }
 0x12f   : > { %v720_v60 = vmul.f32 0.7978846, %v688_v54  ;;  %v598_v26 = vmul.f32 %v5651_v10, %v5651_v10  ;;  %4908 = vtanh.f32 %v719_v8  ;;  %v722_v36 = vmul.f32 0.7978846, %v690_v33 }
 0x130   : > { %7804 = vst [vmem:[#allocation3_spill] sm:$0xff] %v5654_v41  ;;  %v867_v62 = vsel %vm827_vm1, %v5654_v41, 0.0  ;;  %v627_v2 = vmul.f32 %v595_v25, %v5647_v57  ;;  %v4903_v52 = vpop.eup %4902  ;;  %v661_v39 = vmul.f32 0.044715, %v629_v58  ;;  %v5669_v38 = vmul.f32 %v773_v24, %v549_v63 }
 0x131   : > { %868 = vadd.xlane.f32.xlu1 %v867_v62  ;;  %v630_v13 = vmul.f32 %v598_v26, %v5651_v10  ;;  %v596_v47 = vmul.f32 %v5663_v0, %v5663_v0  ;;  %4910 = vtanh.f32 %v720_v60  ;;  %v550_v48 = vmul.f32 0.5, %v5440_v27 }
 0x132   : > { %7805 = vst [vmem:[#allocation4_spill] sm:$0xff] %v5669_v38  ;;  %v659_v50 = vmul.f32 0.044715, %v627_v2  ;;  %v774_v12 = vadd.f32 1.0, %v5560_v37  ;;  %v870_v46 = vsel %vm827_vm1, %v5669_v38, 0.0  ;;  %v551_v33 = vmul.f32 0.5, %v5473_v15 }
 0x133   : > { %v628_v8 = vmul.f32 %v596_v47, %v5663_v0  ;;  %v775_v28 = vadd.f32 1.0, %v4895_v34  ;;  %v4905_v29 = vpop.eup %4904  ;;  %4912 = vtanh.f32 %v721_v55  ;;  %v662_v19 = vmul.f32 0.044715, %v630_v13  ;;  %871 = vadd.xlane.f32.xlu0 %v870_v46 }
 0x134   : > { %v691_v35 = vadd.f32 %v659_v50, %v5647_v57  ;;  %v5680_v23 = vmul.f32 %v774_v12, %v550_v48  ;;  %v552_v37 = vmul.f32 0.5, %v5500_v30  ;;  %v776_v58 = vadd.f32 1.0, %v4899_v18 }
 0x135   : > { %v660_v54 = vmul.f32 0.044715, %v628_v8  ;;  %v5682_v27 = vmul.f32 %v775_v28, %v551_v33  ;;  %4914 = vtanh.f32 %v722_v36  ;;  %v693_v55 = vadd.f32 %v661_v39, %v5635_v20 }
 0x136   : > { %7806 = vst [vmem:[#allocation5_spill] sm:$0xff] %v5680_v23  ;;  %v723_v25 = vmul.f32 0.7978846, %v691_v35  ;;  %v873_v15 = vsel %vm827_vm1, %v5680_v23, 0.0  ;;  %v4907_v34 = vpop.eup %4906  ;;  %v5691_v26 = vmul.f32 %v776_v58, %v552_v37  ;;  %v553_v30 = vmul.f32 0.5, %v5467_v59 }
 0x137   : > { %7807 = vst [vmem:[#allocation6_spill] sm:$0xff] %v5682_v27  ;;  %v692_v63 = vadd.f32 %v660_v54, %v5663_v0  ;;  %874 = vadd.xlane.f32.xlu1 %v873_v15  ;;  %v876_v60 = vsel %vm827_vm1, %v5682_v27, 0.0  ;;  %v777_v18 = vadd.f32 1.0, %v5593_v45  ;;  %v554_v24 = vmul.f32 0.5, %v5485_v16 }
 0x138   : > { %7808 = vst [vmem:[#allocation7_spill] sm:$0xff] %v5691_v26  ;;  %877 = vadd.xlane.f32.xlu0 %v876_v60  ;;  %v778_v36 = vadd.f32 1.0, %v5625_v4  ;;  %4916 = vtanh.f32 %v723_v25  ;;  %v694_v62 = vadd.f32 %v662_v19, %v5651_v10  ;;  %v879_v39 = vsel %vm827_vm1, %v5691_v26, 0.0 }
 0x139   : > { %v724_v2 = vmul.f32 0.7978846, %v692_v63  ;;  %v4909_v13 = vpop.eup %4908  ;;  %v5700_v47 = vmul.f32 %v777_v18, %v553_v30  ;;  %v555_v59 = vmul.f32 0.5, %v5534_v5  ;;  %v779_v48 = vadd.f32 1.0, %v4903_v52 }
 0x13a   : > { %v5702_v50 = vmul.f32 %v778_v36, %v554_v24  ;;  %v725_v45 = vmul.f32 0.7978846, %v693_v55  ;;  %v556_v16 = vmul.f32 0.5, %v5552_v21  ;;  %v780_v4 = vadd.f32 1.0, %v4907_v34 }
 0x13b   : > { %7809 = vst [vmem:[#allocation8_spill] sm:$0xff] %v5700_v47  ;;  %4918 = vtanh.f32 %v724_v2  ;;  %880 = vadd.xlane.f32.xlu1 %v879_v39  ;;  %v4911_v12 = vpop.eup %4910  ;;  %v882_v46 = vsel %vm827_vm1, %v5700_v47, 0.0  ;;  %v5708_v8 = vmul.f32 %v779_v48, %v555_v59  ;;  %v781_v33 = vadd.f32 1.0, %v5639_v32 }
 0x13c   : > { %7810 = vst [vmem:[#allocation9_spill] sm:$0xff] %v5702_v50  ;;  %v726_v28 = vmul.f32 0.7978846, %v694_v62  ;;  %883 = vadd.xlane.f32.xlu0 %v882_v46  ;;  %v5711_v35 = vmul.f32 %v780_v4, %v556_v16  ;;  %v557_v5 = vmul.f32 0.5, %v5512_v43  ;;  %v885_v19 = vsel %vm827_vm1, %v5702_v50, 0.0 }
 0x13d   : > { %7811 = vst [vmem:[#allocation10_spill] sm:$0xff] %v5708_v8  ;;  %v4913_v52 = vpop.eup %4912  ;;  %v888_v21 = vsel %vm827_vm1, %v5708_v8, 0.0  ;;  %v782_v54 = vadd.f32 1.0, %v4905_v29  ;;  %v783_v37 = vadd.f32 1.0, %v4909_v13  ;;  %4920 = vtanh.f32 %v725_v45 }
 0x13e   : > { %7812 = vst [vmem:[#allocation11_spill] sm:$0xff] %v5711_v35  ;;  %v558_v58 = vmul.f32 0.5, %v5539_v11  ;;  %v891_v25 = vsel %vm827_vm1, %v5711_v35, 0.0  ;;  %v5721_v15 = vmul.f32 %v781_v33, %v557_v5  ;;  %v559_v43 = vmul.f32 0.5, %v5588_v6 }
 0x13f   : > { %886 = vadd.xlane.f32.xlu1 %v885_v19  ;;  %v4915_v32 = vpop.eup %4914  ;;  %v784_v34 = vadd.f32 1.0, %v4911_v12  ;;  %4922 = vtanh.f32 %v726_v28  ;;  %v560_v29 = vmul.f32 0.5, %v5611_v49  ;;  %v785_v18 = vadd.f32 1.0, %v4913_v52 }
 0x140   : > { %7813 = vst [vmem:[#allocation12_spill] sm:$0xff] %v5721_v15  ;;  %889 = vadd.xlane.f32.xlu0 %v888_v21  ;;  %v5724_v55 = vmul.f32 %v782_v54, %v558_v58  ;;  %v5726_v63 = vmul.f32 %v783_v37, %v559_v43  ;;  %v894_v11 = vsel %vm827_vm1, %v5721_v15, 0.0  ;;  %v561_v6 = vmul.f32 0.5, %v5577_v31 }
 0x141   : > { %v5731_v30 = vmul.f32 %v784_v34, %v560_v29  ;;  %v786_v2 = vadd.f32 1.0, %v4915_v32  ;;  %v562_v39 = vmul.f32 0.5, %v5591_v9  ;;  %v563_v48 = vmul.f32 0.5, %v5647_v57 }
 0x142   : > { %7814 = vst [vmem:[#allocation13_spill] sm:$0xff] %v5724_v55  ;;  %7815 = vst [vmem:[#allocation14_spill] sm:$0xff] %v5726_v63  ;;  %v4917_v60 = vpop.eup %4916  ;;  %v897_v36 = vsel %vm827_vm1, %v5724_v55, 0.0  ;;  %v900_v62 = vsel %vm827_vm1, %v5726_v63, 0.0  ;;  %v5741_v59 = vmul.f32 %v785_v18, %v561_v6  ;;  %v564_v12 = vmul.f32 0.5, %v5663_v0 }
 0x143   : > { %892 = vadd.xlane.f32.xlu1 %v891_v25  ;;  %7816 = vst [vmem:[#allocation15_spill] sm:$0xff] %v5731_v30  ;;  %v787_v49 = vadd.f32 1.0, %v4917_v60  ;;  %v903_v13 = vsel %vm827_vm1, %v5731_v30, 0.0  ;;  %v5744_v16 = vmul.f32 %v786_v2, %v562_v39  ;;  %v565_v52 = vmul.f32 0.5, %v5635_v20 }
 0x144   : > { %895 = vadd.xlane.f32.xlu0 %v894_v11  ;;  %7817 = vst [vmem:[#allocation16_spill] sm:$0xff] %v5741_v59  ;;  %v906_v9 = vsel %vm827_vm1, %v5741_v59, 0.0  ;;  %v566_v54 = vmul.f32 0.5, %v5651_v10 }
 0x145   : > { %v4919_v24 = vpop.eup %4918  ;;  %7818 = vst [vmem:[#allocation17_spill] sm:$0xff] %v5744_v16  ;;  %v5746_v4 = vmul.f32 %v787_v49, %v563_v48  ;;  %v909_v57 = vsel %vm827_vm1, %v5744_v16, 0.0 }
 0x146   : > { %v788_v45 = vadd.f32 1.0, %v4919_v24 }
 0x147   : > { %898 = vadd.xlane.f32.xlu1 %v897_v36  ;;  %v4921_v31 = vpop.eup %4920  ;;  %7819 = vst [vmem:[#allocation18_spill] sm:$0xff] %v5746_v4  ;;  %v912_v5 = vsel %vm827_vm1, %v5746_v4, 0.0 }
 0x148   : > { %901 = vadd.xlane.f32.xlu0 %v900_v62  ;;  %v5751_v33 = vmul.f32 %v788_v45, %v564_v12  ;;  %v789_v28 = vadd.f32 1.0, %v4921_v31 }
 0x149   : > { %v4923_v46 = vpop.eup %4922 }
 0x14a   : > { %7820 = vst [vmem:[#allocation19_spill] sm:$0xff] %v5751_v33  ;;  %v790_v19 = vadd.f32 1.0, %v4923_v46  ;;  %v915_v0 = vsel %vm827_vm1, %v5751_v33, 0.0  ;;  %v5760_v21 = vmul.f32 %v789_v28, %v565_v52 }
 0x14b   : > { %904 = vadd.xlane.f32.xlu1 %v903_v13 }
 0x14c   : > { %907 = vadd.xlane.f32.xlu0 %v906_v9  ;;  %7821 = vst [vmem:[#allocation20_spill] sm:$0xff] %v5760_v21  ;;  %v5763_v37 = vmul.f32 %v790_v19, %v566_v54  ;;  %v918_v58 = vsel %vm827_vm1, %v5760_v21, 0.0 }
 0x14e   : > { %7822 = vst [vmem:[#allocation21_spill] sm:$0xff] %v5763_v37  ;;  %v921_v20 = vsel %vm827_vm1, %v5763_v37, 0.0 }
 0x14f   : > { %910 = vadd.xlane.f32.xlu1 %v909_v57 }
 0x150   : > { %913 = vadd.xlane.f32.xlu0 %v912_v5 }
 0x153   : > { %916 = vadd.xlane.f32.xlu1 %v915_v0 }
 0x154   : > { %919 = vadd.xlane.f32.xlu0 %v918_v58 }
 0x157   : > { %922 = vadd.xlane.f32.xlu1 %v921_v20 }
 0x197   : > { %v836_v32 = vpop.xlane.xlu1 %835 }
 0x198   : > { %v927_v25 = vmul.f32 0.015625, %v836_v32 }
 0x19a   : > { %v830_v43 = vpop.xlane.xlu0 %829  ;;  %v5770_v29 = vsub.f32 %v5432_v22, %v927_v25 }
 0x19b   : > { %v925_v34 = vmul.f32 0.015625, %v830_v43 }
 0x19c   : > { %v991_v24 = vmul.f32 %v5770_v29, %v5770_v29 }
 0x19d   : > { %v5773_v10 = vsub.f32 %v5461_v53, %v925_v34  ;;  %v839_v60 = vpop.xlane.xlu1 %838 }
 0x19e   : > { %v928_v6 = vmul.f32 0.015625, %v839_v60  ;;  %v1027_v2 = vsel %vm827_vm1, %v991_v24, 0.0 }
 0x19f   : > { %v989_v11 = vmul.f32 %v5773_v10, %v5773_v10 }
 0x1a0   : > { %v5782_v49 = vsub.f32 %v5479_v7, %v928_v6 }
 0x1a1   : > { %v1021_v18 = vsel %vm827_vm1, %v989_v11, 0.0 }
 0x1a2   : > { %1022 = vadd.xlane.f32.xlu0 %v1021_v18  ;;  %v992_v57 = vmul.f32 %v5782_v49, %v5782_v49 }
 0x1a3   : > { %v833_v36 = vpop.xlane.xlu0 %832 }
 0x1a4   : > { %v926_v62 = vmul.f32 0.015625, %v833_v36  ;;  %v1030_v20 = vsel %vm827_vm1, %v992_v57, 0.0 }
 0x1a6   : > { %v5785_v39 = vsub.f32 %v5507_v40, %v926_v62  ;;  %v845_v13 = vpop.xlane.xlu1 %844  ;;  %1028 = vadd.xlane.f32.xlu0 %v1027_v2 }
 0x1a7   : > { %v842_v48 = vpop.xlane.xlu0 %841  ;;  %v930_v45 = vmul.f32 0.015625, %v845_v13 }
 0x1a8   : > { %v929_v31 = vmul.f32 0.015625, %v842_v48  ;;  %v990_v12 = vmul.f32 %v5785_v39, %v5785_v39 }
 0x1a9   : > { %v5793_v9 = vsub.f32 %v5527_v1, %v930_v45 }
 0x1aa   : > { %v5790_v46 = vsub.f32 %v5518_v51, %v929_v31  ;;  %v1024_v28 = vsel %vm827_vm1, %v990_v12, 0.0 }
 0x1ab   : > { %1025 = vadd.xlane.f32.xlu1 %v1024_v28  ;;  %v848_v5 = vpop.xlane.xlu0 %847  ;;  %v994_v25 = vmul.f32 %v5793_v9, %v5793_v9 }
 0x1ac   : > { %v931_v52 = vmul.f32 0.015625, %v848_v5  ;;  %v851_v19 = vpop.xlane.xlu1 %850  ;;  %v993_v0 = vmul.f32 %v5790_v46, %v5790_v46 }
 0x1ad   : > { %v932_v54 = vmul.f32 0.015625, %v851_v19  ;;  %v1036_v6 = vsel %vm827_vm1, %v994_v25, 0.0 }
 0x1ae   : > { %v5801_v58 = vsub.f32 %v5558_v42, %v931_v52  ;;  %v1033_v32 = vsel %vm827_vm1, %v993_v0, 0.0 }
 0x1af   : > { %v5808_v43 = vsub.f32 %v5566_v44, %v932_v54  ;;  %1031 = vadd.xlane.f32.xlu1 %v1030_v20  ;;  %1034 = vadd.xlane.f32.xlu0 %v1033_v32  ;;  %v854_v34 = vpop.xlane.xlu0 %853 }
 0x1b0   : > { %v933_v60 = vmul.f32 0.015625, %v854_v34  ;;  %v995_v11 = vmul.f32 %v5801_v58, %v5801_v58 }
 0x1b1   : > { %v996_v62 = vmul.f32 %v5808_v43, %v5808_v43 }
 0x1b2   : > { %v5813_v18 = vsub.f32 %v5573_v61, %v933_v60  ;;  %v857_v24 = vpop.xlane.xlu1 %856  ;;  %v1039_v36 = vsel %vm827_vm1, %v995_v11, 0.0 }
 0x1b3   : > { %v934_v2 = vmul.f32 0.015625, %v857_v24  ;;  %1037 = vadd.xlane.f32.xlu1 %v1036_v6  ;;  %1040 = vadd.xlane.f32.xlu0 %v1039_v36  ;;  %v1042_v31 = vsel %vm827_vm1, %v996_v62, 0.0 }
 0x1b4   : > { %v997_v13 = vmul.f32 %v5813_v18, %v5813_v18 }
 0x1b5   : > { %v5822_v48 = vsub.f32 %v5596_v14, %v934_v2 }
 0x1b6   : > { %v860_v45 = vpop.xlane.xlu0 %859  ;;  %v1045_v12 = vsel %vm827_vm1, %v997_v13, 0.0 }
 0x1b7   : > { %v935_v28 = vmul.f32 0.015625, %v860_v45  ;;  %1043 = vadd.xlane.f32.xlu1 %v1042_v31  ;;  %1046 = vadd.xlane.f32.xlu0 %v1045_v12  ;;  %v998_v57 = vmul.f32 %v5822_v48, %v5822_v48 }
 0x1b8   : > { %v863_v5 = vpop.xlane.xlu1 %862 }
 0x1b9   : > { %v5829_v52 = vsub.f32 %v5613_v3, %v935_v28  ;;  %v936_v19 = vmul.f32 0.015625, %v863_v5  ;;  %v1048_v54 = vsel %vm827_vm1, %v998_v57, 0.0 }
 0x1ba   : > { %v866_v0 = vpop.xlane.xlu0 %865 }
 0x1bb   : > { %v5833_v20 = vsub.f32 %v5621_v56, %v936_v19  ;;  %v937_v32 = vmul.f32 0.015625, %v866_v0  ;;  %1049 = vadd.xlane.f32.xlu1 %v1048_v54  ;;  %v999_v25 = vmul.f32 %v5829_v52, %v5829_v52 }
 0x1bd   : > { %v5838_v34 = vsub.f32 %v5632_v17, %v937_v32  ;;  %v1051_v60 = vsel %vm827_vm1, %v999_v25, 0.0  ;;  %v1000_v11 = vmul.f32 %v5833_v20, %v5833_v20  ;;  %v4832_v25 = vld [vmem:[%s7760_s2] sm:$0xff]  }
 0x1be   : > { %v869_v24 = vpop.xlane.xlu1 %868  ;;  %1052 = vadd.xlane.f32.xlu0 %v1051_v60  ;;  %4606 = vmatprep.subr.bf16.mxu1 %v4832_v25 }
 0x1bf   : > { %v938_v6 = vmul.f32 0.015625, %v869_v24  ;;  %v1054_v36 = vsel %vm827_vm1, %v1000_v11, 0.0  ;;  %v1001_v62 = vmul.f32 %v5838_v34, %v5838_v34  ;;  %4607 = vmatpush3.bf16.msra.mxu1 %v4832_v25 }
 0x1c0   : > { %1055 = vadd.xlane.f32.xlu1 %v1054_v36  ;;  %v872_v13 = vpop.xlane.xlu0 %871 }
 0x1c1   : > { %v5847_v2 = vsub.f32 %v5654_v41, %v938_v6  ;;  %v1057_v45 = vsel %vm827_vm1, %v1001_v62, 0.0  ;;  %v939_v31 = vmul.f32 0.015625, %v872_v13 }
 0x1c2   : > { %1058 = vadd.xlane.f32.xlu0 %v1057_v45 }
 0x1c3   : > { %v1002_v12 = vmul.f32 %v5847_v2, %v5847_v2  ;;  %v5853_v28 = vsub.f32 %v5669_v38, %v939_v31  ;;  %v4833_v31 = vld [vmem:[%s7760_s2 + $0x8] sm:$0xff]  }
 0x1c4   : > { %v875_v57 = vpop.xlane.xlu1 %874  ;;  %4608 = vmatprep.subr.bf16.mxu1 %v4833_v31 }
 0x1c5   : > { %v940_v5 = vmul.f32 0.015625, %v875_v57  ;;  %v878_v19 = vpop.xlane.xlu0 %877  ;;  %v1060_v0 = vsel %vm827_vm1, %v1002_v12, 0.0  ;;  %v1003_v32 = vmul.f32 %v5853_v28, %v5853_v28  ;;  %4609 = vmatpush3.bf16.msra.mxu1 %v4833_v31 }
 0x1c6   : > { %v941_v54 = vmul.f32 0.015625, %v878_v19  ;;  %1061 = vadd.xlane.f32.xlu1 %v1060_v0 }
 0x1c7   : > { %v5862_v60 = vsub.f32 %v5680_v23, %v940_v5  ;;  %v1063_v6 = vsel %vm827_vm1, %v1003_v32, 0.0 }
 0x1c8   : > { %v5865_v11 = vsub.f32 %v5682_v27, %v941_v54  ;;  %v881_v24 = vpop.xlane.xlu1 %880  ;;  %1064 = vadd.xlane.f32.xlu0 %v1063_v6 }
 0x1c9   : > { %v942_v36 = vmul.f32 0.015625, %v881_v24  ;;  %v1004_v62 = vmul.f32 %v5862_v60, %v5862_v60  ;;  %v884_v13 = vpop.xlane.xlu0 %883 }
 0x1ca   : > { %v1005_v45 = vmul.f32 %v5865_v11, %v5865_v11  ;;  %v943_v57 = vmul.f32 0.015625, %v884_v13 }
 0x1cb   : > { %v5876_v12 = vsub.f32 %v5691_v26, %v942_v36  ;;  %v1066_v5 = vsel %vm827_vm1, %v1004_v62, 0.0 }
 0x1cc   : > { %v887_v19 = vpop.xlane.xlu1 %886  ;;  %1067 = vadd.xlane.f32.xlu1 %v1066_v5  ;;  %v1069_v0 = vsel %vm827_vm1, %v1005_v45, 0.0  ;;  %v5881_v54 = vsub.f32 %v5700_v47, %v943_v57  ;;  %v4834_v57 = vld [vmem:[%s7760_s2 + $0x10] sm:$0xff]  }
 0x1cd   : > { %v944_v32 = vmul.f32 0.015625, %v887_v19  ;;  %1070 = vadd.xlane.f32.xlu0 %v1069_v0  ;;  %v1006_v25 = vmul.f32 %v5876_v12, %v5876_v12  ;;  %v890_v24 = vpop.xlane.xlu0 %889  ;;  %4610 = vmatprep.subr.bf16.mxu1 %v4834_v57 }
 0x1ce   : > { %v945_v36 = vmul.f32 0.015625, %v890_v24  ;;  %v1007_v13 = vmul.f32 %v5881_v54, %v5881_v54  ;;  %4611 = vmatpush3.bf16.msra.mxu1 %v4834_v57 }
 0x1cf   : > { %v5886_v6 = vsub.f32 %v5702_v50, %v944_v32  ;;  %v1072_v62 = vsel %vm827_vm1, %v1006_v25, 0.0 }
 0x1d0   : > { %v893_v45 = vpop.xlane.xlu1 %892  ;;  %1073 = vadd.xlane.f32.xlu1 %v1072_v62  ;;  %v5895_v5 = vsub.f32 %v5708_v8, %v945_v36  ;;  %v1075_v19 = vsel %vm827_vm1, %v1007_v13, 0.0  ;;  %v4835_v13 = vld [vmem:[%s7760_s2 + $0x18] sm:$0xff]  }
 0x1d1   : > { %v946_v31 = vmul.f32 0.015625, %v893_v45  ;;  %v1008_v0 = vmul.f32 %v5886_v6, %v5886_v6  ;;  %1076 = vadd.xlane.f32.xlu0 %v1075_v19  ;;  %v896_v32 = vpop.xlane.xlu0 %895  ;;  %4612 = vmatprep.subr.bf16.mxu1 %v4835_v13 }
 0x1d2   : > { %v947_v24 = vmul.f32 0.015625, %v896_v32  ;;  %v1009_v50 = vmul.f32 %v5895_v5, %v5895_v5  ;;  %4613 = vmatpush3.bf16.msra.mxu1 %v4835_v13 }
 0x1d3   : > { %v5901_v25 = vsub.f32 %v5711_v35, %v946_v31  ;;  %v1078_v62 = vsel %vm827_vm1, %v1008_v0, 0.0 }
 0x1d4   : > { %v899_v36 = vpop.xlane.xlu1 %898  ;;  %1079 = vadd.xlane.f32.xlu1 %v1078_v62  ;;  %v5910_v45 = vsub.f32 %v5721_v15, %v947_v24  ;;  %v1081_v31 = vsel %vm827_vm1, %v1009_v50, 0.0 }
 0x1d5   : > { %v948_v19 = vmul.f32 0.015625, %v899_v36  ;;  %v1010_v32 = vmul.f32 %v5901_v25, %v5901_v25  ;;  %1082 = vadd.xlane.f32.xlu0 %v1081_v31  ;;  %v902_v0 = vpop.xlane.xlu0 %901 }
 0x1d6   : > { %v949_v62 = vmul.f32 0.015625, %v902_v0  ;;  %v1011_v8 = vmul.f32 %v5910_v45, %v5910_v45 }
 0x1d7   : > { %v5916_v57 = vsub.f32 %v5724_v55, %v948_v19  ;;  %v1084_v35 = vsel %vm827_vm1, %v1010_v32, 0.0 }
 0x1d8   : > { %v905_v24 = vpop.xlane.xlu1 %904  ;;  %1085 = vadd.xlane.f32.xlu1 %v1084_v35  ;;  %v5922_v50 = vsub.f32 %v5726_v63, %v949_v62  ;;  %v1087_v31 = vsel %vm827_vm1, %v1011_v8, 0.0 }
 0x1d9   : > { %v950_v36 = vmul.f32 0.015625, %v905_v24  ;;  %v1012_v15 = vmul.f32 %v5916_v57, %v5916_v57  ;;  %1088 = vadd.xlane.f32.xlu0 %v1087_v31  ;;  %v908_v19 = vpop.xlane.xlu0 %907 }
 0x1da   : > { %v951_v32 = vmul.f32 0.015625, %v908_v19  ;;  %v1013_v35 = vmul.f32 %v5922_v50, %v5922_v50 }
 0x1db   : > { %v5928_v0 = vsub.f32 %v5731_v30, %v950_v36  ;;  %v1090_v55 = vsel %vm827_vm1, %v1012_v15, 0.0 }
 0x1dc   : > { %v911_v13 = vpop.xlane.xlu1 %910  ;;  %1091 = vadd.xlane.f32.xlu1 %v1090_v55  ;;  %v5934_v62 = vsub.f32 %v5741_v59, %v951_v32  ;;  %v1093_v24 = vsel %vm827_vm1, %v1013_v35, 0.0 }
 0x1dd   : > { %v952_v8 = vmul.f32 0.015625, %v911_v13  ;;  %v1014_v31 = vmul.f32 %v5928_v0, %v5928_v0  ;;  %1094 = vadd.xlane.f32.xlu0 %v1093_v24  ;;  %v914_v36 = vpop.xlane.xlu0 %913 }
 0x1de   : > { %v953_v15 = vmul.f32 0.015625, %v914_v36  ;;  %v1015_v55 = vmul.f32 %v5934_v62, %v5934_v62 }
 0x1df   : > { %v5940_v19 = vsub.f32 %v5744_v16, %v952_v8  ;;  %v1096_v30 = vsel %vm827_vm1, %v1014_v31, 0.0 }
 0x1e0   : > { %v917_v63 = vpop.xlane.xlu1 %916  ;;  %1097 = vadd.xlane.f32.xlu1 %v1096_v30  ;;  %v5946_v32 = vsub.f32 %v5746_v4, %v953_v15  ;;  %v1099_v13 = vsel %vm827_vm1, %v1015_v55, 0.0 }
 0x1e1   : > { %v954_v35 = vmul.f32 0.015625, %v917_v63  ;;  %v1016_v24 = vmul.f32 %v5940_v19, %v5940_v19  ;;  %1100 = vadd.xlane.f32.xlu0 %v1099_v13  ;;  %v920_v8 = vpop.xlane.xlu0 %919 }
 0x1e2   : > { %v955_v31 = vmul.f32 0.015625, %v920_v8  ;;  %v1017_v30 = vmul.f32 %v5946_v32, %v5946_v32 }
 0x1e3   : > { %v5952_v36 = vsub.f32 %v5751_v33, %v954_v35  ;;  %v1102_v16 = vsel %vm827_vm1, %v1016_v24, 0.0 }
 0x1e4   : > { %v923_v59 = vpop.xlane.xlu1 %922  ;;  %1103 = vadd.xlane.f32.xlu1 %v1102_v16  ;;  %v5958_v63 = vsub.f32 %v5760_v21, %v955_v31  ;;  %v1105_v55 = vsel %vm827_vm1, %v1017_v30, 0.0  ;;  %v4836_v30 = vld [vmem:[%s7761_s3] sm:$0xff]  }
 0x1e5   : > { %v956_v15 = vmul.f32 0.015625, %v923_v59  ;;  %v1018_v13 = vmul.f32 %v5952_v36, %v5952_v36  ;;  %1106 = vadd.xlane.f32.xlu0 %v1105_v55  ;;  %4646 = vmatprep.subr.bf16.mxu0 %v4836_v30  ;;  %v4838_v55 = vld [vmem:[%s7761_s3 + $0x10] sm:$0xff]  }
 0x1e6   : > { %v1019_v8 = vmul.f32 %v5958_v63, %v5958_v63  ;;  %4647 = vmatpush3.bf16.msra.mxu0 %v4836_v30 }
 0x1e7   : > { %v5964_v35 = vsub.f32 %v5763_v37, %v956_v15  ;;  %v1108_v24 = vsel %vm827_vm1, %v1018_v13, 0.0  ;;  %v4837_v15 = vld [vmem:[%s7761_s3 + $0x8] sm:$0xff]   ;;  %v4839_v13 = vld [vmem:[%s7761_s3 + $0x18] sm:$0xff]  }
 0x1e8   : > { %1109 = vadd.xlane.f32.xlu1 %v1108_v24  ;;  %v1111_v16 = vsel %vm827_vm1, %v1019_v8, 0.0  ;;  %4648 = vmatprep.subr.bf16.mxu0 %v4837_v15 }
 0x1e9   : > { %v1020_v59 = vmul.f32 %v5964_v35, %v5964_v35  ;;  %1112 = vadd.xlane.f32.xlu0 %v1111_v16 }
 0x1ea   : > { %4649 = vmatpush3.bf16.msra.mxu0 %v4837_v15 }
 0x1eb   : > { %v1114_v31 = vsel %vm827_vm1, %v1020_v59, 0.0  ;;  %4650 = vmatprep.subr.bf16.mxu0 %v4838_v55 }
 0x1ec   : > { %1115 = vadd.xlane.f32.xlu1 %v1114_v31 }
 0x1ee   : > { %4651 = vmatpush3.bf16.msra.mxu0 %v4838_v55 }
 0x1ef   : > { %4652 = vmatprep.subr.bf16.mxu0 %v4839_v13 }
 0x1f2   : > { %4653 = vmatpush3.bf16.msra.mxu0 %v4839_v13 }
 0x22f   : > { %v1023_v24 = vpop.xlane.xlu0 %1022 }
 0x230   : > { %v1117_v8 = vmul.f32 0.015625, %v1023_v24 }
 0x232   : > { %v1149_v16 = vadd.f32 1e-05, %v1117_v8 }
 0x233   : > { %v1029_v59 = vpop.xlane.xlu0 %1028 }
 0x234   : > { %v1119_v31 = vmul.f32 0.015625, %v1029_v59  ;;  %4924 = vrsqrt.f32 %v1149_v16 }
 0x236   : > { %v1151_v30 = vadd.f32 1e-05, %v1119_v31 }
 0x238   : > { %v1026_v37 = vpop.xlane.xlu1 %1025  ;;  %4926 = vrsqrt.f32 %v1151_v30 }
 0x239   : > { %v1118_v33 = vmul.f32 0.015625, %v1026_v37 }
 0x23b   : > { %v1150_v21 = vadd.f32 1e-05, %v1118_v33 }
 0x23c   : > { %v1032_v15 = vpop.xlane.xlu1 %1031  ;;  %v1035_v4 = vpop.xlane.xlu0 %1034 }
 0x23d   : > { %4928 = vrsqrt.f32 %v1150_v21  ;;  %v1120_v26 = vmul.f32 0.015625, %v1032_v15  ;;  %v1121_v47 = vmul.f32 0.015625, %v1035_v4 }
 0x23e   : > { %v4925_v41 = vpop.eup %4924 }
 0x23f   : > { %v1152_v27 = vadd.f32 1e-05, %v1120_v26  ;;  %v1153_v55 = vadd.f32 1e-05, %v1121_v47  ;;  %v1213_v33 = vmul.f32 %v4925_v41, %v5773_v10  ;;  %v5989_v26 = vld [vmem:[%s7763_s5 + $0x4] ss:$0 sm:$0xff] }
 0x240   : > { %v1038_v23 = vpop.xlane.xlu1 %1037  ;;  %v1041_v13 = vpop.xlane.xlu0 %1040  ;;  %v5997_v10 = vld [vmem:[%s7763_s5 + $0x5] ss:$0 sm:$0xff] }
 0x241   : > { %4930 = vrsqrt.f32 %v1152_v27  ;;  %v1122_v24 = vmul.f32 0.015625, %v1038_v23  ;;  %v1123_v8 = vmul.f32 0.015625, %v1041_v13 }
 0x242   : > { %4932 = vrsqrt.f32 %v1153_v55  ;;  %v4927_v31 = vpop.eup %4926 }
 0x243   : > { %v1154_v59 = vadd.f32 1e-05, %v1122_v24  ;;  %v1155_v16 = vadd.f32 1e-05, %v1123_v8  ;;  %v1215_v4 = vmul.f32 %v4927_v31, %v5770_v29  ;;  %v1249_v24 = vmul.f32 %v5989_v26, %v1213_v33 }
 0x244   : > { %v1044_v37 = vpop.xlane.xlu1 %1043  ;;  %v1047_v30 = vpop.xlane.xlu0 %1046 }
 0x245   : > { %4934 = vrsqrt.f32 %v1154_v59  ;;  %v1124_v21 = vmul.f32 0.015625, %v1044_v37  ;;  %v1125_v15 = vmul.f32 0.015625, %v1047_v30  ;;  %v1251_v29 = vmul.f32 %v5989_v26, %v1215_v4 }
 0x246   : > { %4936 = vrsqrt.f32 %v1155_v16 }
 0x247   : > { %v4929_v27 = vpop.eup %4928  ;;  %v1156_v23 = vadd.f32 1e-05, %v1124_v21  ;;  %v1157_v47 = vadd.f32 1e-05, %v1125_v15  ;;  %v1287_v4 = vadd.f32 %v5997_v10, %v1251_v29 }
 0x248   : > { %v1050_v55 = vpop.xlane.xlu1 %1049  ;;  %v1214_v13 = vmul.f32 %v4929_v27, %v5785_v39  ;;  %v1285_v39 = vadd.f32 %v5997_v10, %v1249_v24 }
 0x249   : > { %4938 = vrsqrt.f32 %v1156_v23  ;;  %v1126_v41 = vmul.f32 0.015625, %v1050_v55 }
 0x24a   : > { %4940 = vrsqrt.f32 %v1157_v47  ;;  %v1250_v8 = vmul.f32 %v5989_v26, %v1214_v13 }
 0x24b   : > { %v4931_v59 = vpop.eup %4930  ;;  %v1158_v16 = vadd.f32 1e-05, %v1126_v41  ;;  %v1053_v37 = vpop.xlane.xlu0 %1052 }
 0x24c   : > { %v4933_v31 = vpop.eup %4932  ;;  %v1127_v30 = vmul.f32 0.015625, %v1053_v37  ;;  %v1286_v33 = vadd.f32 %v5997_v10, %v1250_v8  ;;  %v1216_v21 = vmul.f32 %v4931_v59, %v5782_v49 }
 0x24d   : > { %4942 = vrsqrt.f32 %v1158_v16  ;;  %v1056_v15 = vpop.xlane.xlu1 %1055  ;;  %v1217_v27 = vmul.f32 %v4933_v31, %v5790_v46 }
 0x24e   : > { %v1159_v23 = vadd.f32 1e-05, %v1127_v30  ;;  %v1128_v47 = vmul.f32 0.015625, %v1056_v15  ;;  %v1317_v55 = vpack.c.bf16 %v1286_v33, %v1285_v39  ;;  %v1252_v13 = vmul.f32 %v5989_v26, %v1216_v21 }
 0x24f   : > { %v4935_v41 = vpop.eup %4934  ;;  %v1059_v38 = vpop.xlane.xlu0 %1058  ;;  %v1253_v46 = vmul.f32 %v5989_v26, %v1217_v27 }
 0x250   : > { %v4937_v37 = vpop.eup %4936  ;;  %4944 = vrsqrt.f32 %v1159_v23  ;;  %v1160_v24 = vadd.f32 1e-05, %v1128_v47  ;;  %v1129_v17 = vmul.f32 0.015625, %v1059_v38  ;;  %4614 = vmatprep.mubr.msk.bf16.mxu1 %vm827_vm1, %v1317_v55  ;;  %v1288_v49 = vadd.f32 %v5997_v10, %v1252_v13 }
 0x251   : > { %v1218_v8 = vmul.f32 %v4935_v41, %v5793_v9  ;;  %v1219_v59 = vmul.f32 %v4937_v37, %v5801_v58  ;;  %v1289_v15 = vadd.f32 %v5997_v10, %v1253_v46 }
 0x252   : > { %4946 = vrsqrt.f32 %v1160_v24  ;;  %v1161_v16 = vadd.f32 1e-05, %v1129_v17  ;;  %v1318_v31 = vpack.c.bf16 %v1288_v49, %v1287_v4 }
 0x253   : > { %v4939_v30 = vpop.eup %4938  ;;  %v1062_v39 = vpop.xlane.xlu1 %1061  ;;  %v1254_v29 = vmul.f32 %v5989_v26, %v1218_v8  ;;  %v1255_v33 = vmul.f32 %v5989_v26, %v1219_v59 }
 0x254   : > { %v4941_v38 = vpop.eup %4940  ;;  %4948 = vrsqrt.f32 %v1161_v16  ;;  %v1130_v21 = vmul.f32 0.015625, %v1062_v39  ;;  %4615 = vmatmul.mubr.msk.bf16.vlgmr.msra.gmra.mrb[0].mxu1 %vm827_vm1, %v1318_v31  ;;  %v1220_v9 = vmul.f32 %v4939_v30, %v5808_v43 }
 0x255   : > { %v1290_v58 = vadd.f32 %v5997_v10, %v1254_v29  ;;  %v1221_v17 = vmul.f32 %v4941_v38, %v5813_v18  ;;  %v1065_v23 = vpop.xlane.xlu0 %1064  ;;  %v1291_v4 = vadd.f32 %v5997_v10, %v1255_v33 }
 0x256   : > { %v1162_v27 = vadd.f32 1e-05, %v1130_v21  ;;  %v1256_v47 = vmul.f32 %v5989_v26, %v1220_v9  ;;  %v1131_v13 = vmul.f32 0.015625, %v1065_v23 }
 0x257   : > { %v4943_v55 = vpop.eup %4942  ;;  %v1319_v41 = vpack.c.bf16 %v1290_v58, %v1289_v15  ;;  %v1257_v24 = vmul.f32 %v5989_v26, %v1221_v17 }
 0x258   : > { %4950 = vrsqrt.f32 %v1162_v27  ;;  %v1292_v37 = vadd.f32 %v5997_v10, %v1256_v47  ;;  %v1222_v43 = vmul.f32 %v4943_v55, %v5822_v48  ;;  %v1163_v49 = vadd.f32 1e-05, %v1131_v13 }
 0x259   : > { %v1068_v8 = vpop.xlane.xlu1 %1067  ;;  %4618 = vmatprep.mubr.msk.bf16.mxu1 %vm827_vm1, %v1319_v41  ;;  %v1293_v48 = vadd.f32 %v5997_v10, %v1257_v24 }
 0x25a   : > { %v4945_v18 = vpop.eup %4944  ;;  %v1132_v46 = vmul.f32 0.015625, %v1068_v8  ;;  %v1071_v59 = vpop.xlane.xlu0 %1070  ;;  %v1320_v16 = vpack.c.bf16 %v1292_v37, %v1291_v4  ;;  %v1258_v31 = vmul.f32 %v5989_v26, %v1222_v43  ;;  %4952 = vrsqrt.f32 %v1163_v49 }
 0x25b   : > { %v1133_v30 = vmul.f32 0.015625, %v1071_v59  ;;  %v1223_v39 = vmul.f32 %v4945_v18, %v5829_v52 }
 0x25c   : > { %v4947_v29 = vpop.eup %4946  ;;  %v1164_v33 = vadd.f32 1e-05, %v1132_v46  ;;  %4619 = vmatmul.mubr.msk.bf16.gmra.mrb[4].mxu1 %vm827_vm1, %v1320_v16  ;;  %v1294_v38 = vadd.f32 %v5997_v10, %v1258_v31 }
 0x25d   : > { %v1165_v21 = vadd.f32 1e-05, %v1133_v30  ;;  %v1074_v9 = vpop.xlane.xlu1 %1073  ;;  %v1224_v15 = vmul.f32 %v4947_v29, %v5833_v20  ;;  %v1259_v58 = vmul.f32 %v5989_v26, %v1223_v39 }
 0x25e   : > { %v4949_v17 = vpop.eup %4948  ;;  %4954 = vrsqrt.f32 %v1164_v33  ;;  %v1134_v27 = vmul.f32 0.015625, %v1074_v9  ;;  %v1321_v23 = vpack.c.bf16 %v1294_v38, %v1293_v48  ;;  %v1077_v52 = vpop.xlane.xlu0 %1076 }
 0x25f   : > { %4956 = vrsqrt.f32 %v1165_v21  ;;  %v1260_v47 = vmul.f32 %v5989_v26, %v1224_v15  ;;  %v1225_v55 = vmul.f32 %v4949_v17, %v5838_v34  ;;  %v1135_v41 = vmul.f32 0.015625, %v1077_v52 }
 0x260   : > { %v1166_v13 = vadd.f32 1e-05, %v1134_v27  ;;  %4622 = vmatprep.mubr.msk.bf16.mxu1 %vm827_vm1, %v1321_v23  ;;  %v1295_v37 = vadd.f32 %v5997_v10, %v1259_v58 }
 0x261   : > { %v1080_v4 = vpop.xlane.xlu1 %1079  ;;  %v1296_v20 = vadd.f32 %v5997_v10, %v1260_v47  ;;  %v1167_v24 = vadd.f32 1e-05, %v1135_v41  ;;  %v1261_v59 = vmul.f32 %v5989_v26, %v1225_v55 }
 0x262   : > { %v4951_v43 = vpop.eup %4950  ;;  %4958 = vrsqrt.f32 %v1166_v13  ;;  %v1136_v49 = vmul.f32 0.015625, %v1080_v4  ;;  %v1083_v8 = vpop.xlane.xlu0 %1082 }
 0x263   : > { %v1322_v18 = vpack.c.bf16 %v1296_v20, %v1295_v37  ;;  %v1226_v46 = vmul.f32 %v4951_v43, %v5847_v2  ;;  %4960 = vrsqrt.f32 %v1167_v24  ;;  %v1137_v16 = vmul.f32 0.015625, %v1083_v8 }
 0x264   : > { %v1168_v34 = vadd.f32 1e-05, %v1136_v49  ;;  %v4953_v31 = vpop.eup %4952  ;;  %v1297_v21 = vadd.f32 %v5997_v10, %v1261_v59 }
 0x265   : > { %v1086_v30 = vpop.xlane.xlu1 %1085  ;;  %4623 = vmatmul.mubr.msk.bf16.gmra.mrb[8].mxu1 %vm827_vm1, %v1322_v18  ;;  %v1262_v39 = vmul.f32 %v5989_v26, %v1226_v46  ;;  %v1169_v29 = vadd.f32 1e-05, %v1137_v16  ;;  %v1227_v48 = vmul.f32 %v4953_v31, %v5853_v28 }
 0x266   : > { %4962 = vrsqrt.f32 %v1168_v34  ;;  %v1138_v33 = vmul.f32 0.015625, %v1086_v30  ;;  %v1089_v38 = vpop.xlane.xlu0 %1088 }
 0x267   : > { %v1298_v2 = vadd.f32 %v5997_v10, %v1262_v39  ;;  %4964 = vrsqrt.f32 %v1169_v29  ;;  %v1139_v58 = vmul.f32 0.015625, %v1089_v38  ;;  %v1263_v47 = vmul.f32 %v5989_v26, %v1227_v48 }
 0x268   : > { %v4955_v9 = vpop.eup %4954  ;;  %v1170_v15 = vadd.f32 1e-05, %v1138_v33 }
 0x269   : > { %v4957_v17 = vpop.eup %4956  ;;  %v1092_v27 = vpop.xlane.xlu1 %1091  ;;  %v1323_v23 = vpack.c.bf16 %v1298_v2, %v1297_v21  ;;  %v1228_v52 = vmul.f32 %v4955_v9, %v5862_v60  ;;  %v1171_v55 = vadd.f32 1e-05, %v1139_v58  ;;  %v1299_v49 = vadd.f32 %v5997_v10, %v1263_v47 }
 0x26a   : > { %4966 = vrsqrt.f32 %v1170_v15  ;;  %v1140_v13 = vmul.f32 0.015625, %v1092_v27  ;;  %v1095_v28 = vpop.xlane.xlu0 %1094  ;;  %v1229_v4 = vmul.f32 %v4957_v17, %v5865_v11 }
 0x26b   : > { %4626 = vmatprep.mubr.msk.bf16.mxu1 %vm827_vm1, %v1323_v23  ;;  %v1264_v41 = vmul.f32 %v5989_v26, %v1228_v52  ;;  %4968 = vrsqrt.f32 %v1171_v55  ;;  %v1141_v43 = vmul.f32 0.015625, %v1095_v28 }
 0x26c   : > { %v4959_v37 = vpop.eup %4958  ;;  %v1172_v20 = vadd.f32 1e-05, %v1140_v13  ;;  %v1265_v18 = vmul.f32 %v5989_v26, %v1229_v4 }
 0x26d   : > { %v1098_v24 = vpop.xlane.xlu1 %1097  ;;  %v1300_v60 = vadd.f32 %v5997_v10, %v1264_v41  ;;  %v1230_v8 = vmul.f32 %v4959_v37, %v5876_v12  ;;  %v4961_v46 = vpop.eup %4960  ;;  %v1173_v59 = vadd.f32 1e-05, %v1141_v43 }
 0x26e   : > { %4970 = vrsqrt.f32 %v1172_v20  ;;  %v1142_v34 = vmul.f32 0.015625, %v1098_v24  ;;  %v1101_v16 = vpop.xlane.xlu0 %1100  ;;  %v1231_v30 = vmul.f32 %v4961_v46, %v5881_v54  ;;  %v1301_v12 = vadd.f32 %v5997_v10, %v1265_v18 }
 0x26f   : > { %v1324_v31 = vpack.c.bf16 %v1300_v60, %v1299_v49  ;;  %v1266_v11 = vmul.f32 %v5989_v26, %v1230_v8  ;;  %4972 = vrsqrt.f32 %v1173_v59  ;;  %v1143_v33 = vmul.f32 0.015625, %v1101_v16 }
 0x270   : > { %v4963_v39 = vpop.eup %4962  ;;  %v1174_v29 = vadd.f32 1e-05, %v1142_v34  ;;  %v1267_v2 = vmul.f32 %v5989_v26, %v1231_v30 }
 0x271   : > { %v1104_v48 = vpop.xlane.xlu1 %1103  ;;  %4627 = vmatmul.mubr.msk.bf16.gmra.mrb[12].mxu1 %vm827_vm1, %v1324_v31  ;;  %v1302_v38 = vadd.f32 %v5997_v10, %v1266_v11  ;;  %v1232_v21 = vmul.f32 %v4963_v39, %v5886_v6  ;;  %v4965_v9 = vpop.eup %4964  ;;  %v1175_v15 = vadd.f32 1e-05, %v1143_v33 }
 0x272   : > { %4974 = vrsqrt.f32 %v1174_v29  ;;  %v1144_v58 = vmul.f32 0.015625, %v1104_v48  ;;  %v1107_v54 = vpop.xlane.xlu0 %1106  ;;  %v1233_v23 = vmul.f32 %v4965_v9, %v5895_v5  ;;  %v1303_v6 = vadd.f32 %v5997_v10, %v1267_v2 }
 0x273   : > { %v1325_v17 = vpack.c.bf16 %v1302_v38, %v1301_v12  ;;  %v1268_v27 = vmul.f32 %v5989_v26, %v1232_v21  ;;  %4976 = vrsqrt.f32 %v1175_v15  ;;  %v1145_v55 = vmul.f32 0.015625, %v1107_v54 }
 0x274   : > { %v4967_v52 = vpop.eup %4966  ;;  %v1176_v47 = vadd.f32 1e-05, %v1144_v58  ;;  %v1269_v4 = vmul.f32 %v5989_v26, %v1233_v23 }
 0x275   : > { %v1110_v13 = vpop.xlane.xlu1 %1109  ;;  %4630 = vmatprep.mubr.msk.bf16.mxu1 %vm827_vm1, %v1325_v17  ;;  %v1304_v28 = vadd.f32 %v5997_v10, %v1268_v27  ;;  %v1234_v41 = vmul.f32 %v4967_v52, %v5901_v25  ;;  %v4969_v37 = vpop.eup %4968  ;;  %v1177_v20 = vadd.f32 1e-05, %v1145_v55 }
 0x276   : > { %4978 = vrsqrt.f32 %v1176_v47  ;;  %v1146_v43 = vmul.f32 0.015625, %v1110_v13  ;;  %v1113_v5 = vpop.xlane.xlu0 %1112  ;;  %v1235_v60 = vmul.f32 %v4969_v37, %v5910_v45  ;;  %v1305_v25 = vadd.f32 %v5997_v10, %v1269_v4 }
 0x277   : > { %v1326_v24 = vpack.c.bf16 %v1304_v28, %v1303_v6  ;;  %v1270_v49 = vmul.f32 %v5989_v26, %v1234_v41  ;;  %4980 = vrsqrt.f32 %v1177_v20  ;;  %v1147_v46 = vmul.f32 0.015625, %v1113_v5 }
 0x278   : > { %v4971_v8 = vpop.eup %4970  ;;  %v1178_v18 = vadd.f32 1e-05, %v1146_v43  ;;  %v1271_v31 = vmul.f32 %v5989_v26, %v1235_v60 }
 0x279   : > { %v1116_v59 = vpop.xlane.xlu1 %1115  ;;  %4631 = vmatmul.mubr.msk.bf16.gmra.mrb[16].mxu1 %vm827_vm1, %v1326_v24  ;;  %v1306_v34 = vadd.f32 %v5997_v10, %v1270_v49  ;;  %v1236_v16 = vmul.f32 %v4971_v8, %v5916_v57  ;;  %v4973_v11 = vpop.eup %4972  ;;  %v1179_v30 = vadd.f32 1e-05, %v1147_v46 }
 0x27a   : > { %4982 = vrsqrt.f32 %v1178_v18  ;;  %v1148_v39 = vmul.f32 0.015625, %v1116_v59  ;;  %v1237_v33 = vmul.f32 %v4973_v11, %v5922_v50  ;;  %v1307_v38 = vadd.f32 %v5997_v10, %v1271_v31  ;;  %v4840_v59 = vld [vmem:[%s7761_s3 + $0x20] sm:$0xff]  }
 0x27b   : > { %v1327_v45 = vpack.c.bf16 %v1306_v34, %v1305_v25  ;;  %v1272_v29 = vmul.f32 %v5989_v26, %v1236_v16  ;;  %4984 = vrsqrt.f32 %v1179_v30  ;;  %4654 = vmatprep.subr.bf16.mxu0 %v4840_v59  ;;  %v6122_v25 = vld [vmem:[%s7763_s5 + $0x6] ss:$0 sm:$0xff] }
 0x27c   : > { %v4975_v48 = vpop.eup %4974  ;;  %v1180_v12 = vadd.f32 1e-05, %v1148_v39  ;;  %v1273_v2 = vmul.f32 %v5989_v26, %v1237_v33  ;;  %4655 = vmatpush3.bf16.msra.mxu0 %v4840_v59 }
 0x27d   : > { %4634 = vmatprep.mubr.msk.bf16.mxu1 %vm827_vm1, %v1327_v45  ;;  %v1308_v57 = vadd.f32 %v5997_v10, %v1272_v29  ;;  %v1238_v21 = vmul.f32 %v4975_v48, %v5928_v0  ;;  %v4977_v9 = vpop.eup %4976 }
 0x27e   : > { %4986 = vrsqrt.f32 %v1180_v12  ;;  %v1239_v50 = vmul.f32 %v4977_v9, %v5934_v62  ;;  %v1309_v17 = vadd.f32 %v5997_v10, %v1273_v2 }
 0x27f   : > { %v1328_v15 = vpack.c.bf16 %v1308_v57, %v1307_v38  ;;  %v1274_v58 = vmul.f32 %v5989_v26, %v1238_v21 }
 0x280   : > { %v4979_v54 = vpop.eup %4978  ;;  %v1275_v0 = vmul.f32 %v5989_v26, %v1239_v50 }
 0x281   : > { %4635 = vmatmul.mubr.msk.bf16.gmra.mrb[20].mxu1 %vm827_vm1, %v1328_v15  ;;  %v1310_v27 = vadd.f32 %v5997_v10, %v1274_v58  ;;  %v1240_v23 = vmul.f32 %v4979_v54, %v5940_v19  ;;  %v4981_v52 = vpop.eup %4980 }
 0x282   : > { %v1241_v13 = vmul.f32 %v4981_v52, %v5946_v32  ;;  %v1311_v62 = vadd.f32 %v5997_v10, %v1275_v0 }
 0x283   : > { %v1329_v47 = vpack.c.bf16 %v1310_v27, %v1309_v17  ;;  %v1276_v55 = vmul.f32 %v5989_v26, %v1240_v23 }
 0x284   : > { %v4983_v6 = vpop.eup %4982  ;;  %v1277_v4 = vmul.f32 %v5989_v26, %v1241_v13 }
 0x285   : > { %4638 = vmatprep.mubr.msk.bf16.mxu1 %vm827_vm1, %v1329_v47  ;;  %v1312_v28 = vadd.f32 %v5997_v10, %v1276_v55  ;;  %v1242_v41 = vmul.f32 %v4983_v6, %v5952_v36  ;;  %v4985_v19 = vpop.eup %4984 }
 0x286   : > { %v1243_v43 = vmul.f32 %v4985_v19, %v5958_v63  ;;  %v1313_v32 = vadd.f32 %v5997_v10, %v1277_v4 }
 0x287   : > { %v1330_v37 = vpack.c.bf16 %v1312_v28, %v1311_v62  ;;  %v1278_v20 = vmul.f32 %v5989_v26, %v1242_v41 }
 0x288   : > { %v4987_v5 = vpop.eup %4986  ;;  %v1279_v60 = vmul.f32 %v5989_v26, %v1243_v43 }
 0x289   : > { %4639 = vmatmul.mubr.msk.bf16.gmra.mrb[24].mxu1 %vm827_vm1, %v1330_v37  ;;  %v1314_v24 = vadd.f32 %v5997_v10, %v1278_v20  ;;  %v1244_v49 = vmul.f32 %v4987_v5, %v5964_v35  ;;  %v4841_v35 = vld [vmem:[%s7761_s3 + $0x28] sm:$0xff]  }
 0x28a   : > { %v1315_v18 = vadd.f32 %v5997_v10, %v1279_v60  ;;  %4656 = vmatprep.subr.bf16.mxu0 %v4841_v35 }
 0x28b   : > { %v1331_v36 = vpack.c.bf16 %v1314_v24, %v1313_v32  ;;  %v1280_v8 = vmul.f32 %v5989_v26, %v1244_v49  ;;  %v4842_v26 = vld [vmem:[%s7761_s3 + $0x30] sm:$0xff]   ;;  %4657 = vmatpush3.bf16.msra.mxu0 %v4841_v35 }
 0x28c   : > { %4658 = vmatprep.subr.bf16.mxu0 %v4842_v26 }
 0x28d   : > { %4642 = vmatprep.mubr.msk.bf16.mxu1 %vm827_vm1, %v1331_v36  ;;  %v1316_v63 = vadd.f32 %v5997_v10, %v1280_v8  ;;  %v4843_v10 = vld [vmem:[%s7761_s3 + $0x38] sm:$0xff]  }
 0x28f   : > { %v1332_v46 = vpack.c.bf16 %v1316_v63, %v1315_v18  ;;  %4659 = vmatpush3.bf16.msra.mxu0 %v4842_v26 }
 0x290   : > { %4660 = vmatprep.subr.bf16.mxu0 %v4843_v10 }
 0x291   : > { %4643 = vmatmul.mubr.msk.bf16.gmra.mrb[28].mxu1 %vm827_vm1, %v1332_v46 }
 0x293   : > { %4661 = vmatpush3.bf16.msra.mxu0 %v4843_v10 }
 0x327   : > { %v4616_v34 = vpop.f32.mrb[0].mxu1 }
 0x328   : > { %v1460_v16 = vadd.f32 %v4616_v34, %v6122_v25  ;;  %v1451_v31 = vpop.f32.mrb[1].mxu1 }
 0x329   : > { %v1452_v11 = vadd.f32 %v6122_v25, %v1451_v31  ;;  %v4617_v30 = vpop.f32.mrb[2].mxu1 }
 0x32a   : > { %v1612_v39 = vmul.f32 %v1460_v16, %v1460_v16  ;;  %v1463_v45 = vadd.f32 %v4617_v30, %v6122_v25  ;;  %v1454_v29 = vpop.f32.mrb[3].mxu1  ;;  %v6128_v54 = vmul.f32 0.5, %v1460_v16 }
 0x32b   : > { %v1610_v33 = vmul.f32 %v1452_v11, %v1452_v11  ;;  %v1455_v48 = vadd.f32 %v6122_v25, %v1454_v29  ;;  %v6132_v6 = vmul.f32 0.5, %v1452_v11 }
 0x32c   : > { %v1644_v12 = vmul.f32 %v1612_v39, %v1460_v16  ;;  %v1613_v38 = vmul.f32 %v1463_v45, %v1463_v45  ;;  %v1581_v18 = vmul.f32 0.5, %v1463_v45 }
 0x32d   : > { %v1642_v57 = vmul.f32 %v1610_v33, %v1452_v11  ;;  %v1611_v21 = vmul.f32 %v1455_v48, %v1455_v48  ;;  %v1579_v26 = vmul.f32 0.5, %v1455_v48 }
 0x32e   : > { %v1676_v2 = vmul.f32 0.044715, %v1644_v12  ;;  %v1645_v9 = vmul.f32 %v1613_v38, %v1463_v45 }
 0x32f   : > { %v1674_v15 = vmul.f32 0.044715, %v1642_v57  ;;  %v1643_v58 = vmul.f32 %v1611_v21, %v1455_v48  ;;  %v4620_v50 = vpop.f32.mrb[4].mxu1 }
 0x330   : > { %v1708_v17 = vadd.f32 %v1676_v2, %v1460_v16  ;;  %v1677_v27 = vmul.f32 0.044715, %v1645_v9  ;;  %v1476_v23 = vadd.f32 %v4620_v50, %v6122_v25  ;;  %v1467_v0 = vpop.f32.mrb[5].mxu1 }
 0x331   : > { %v1706_v52 = vadd.f32 %v1674_v15, %v1452_v11  ;;  %v1675_v47 = vmul.f32 0.044715, %v1643_v58  ;;  %v1468_v55 = vadd.f32 %v6122_v25, %v1467_v0  ;;  %v4621_v13 = vpop.f32.mrb[6].mxu1 }
 0x332   : > { %v1740_v62 = vmul.f32 0.7978846, %v1708_v17  ;;  %v1709_v28 = vadd.f32 %v1677_v27, %v1463_v45  ;;  %v1616_v41 = vmul.f32 %v1476_v23, %v1476_v23  ;;  %v1479_v4 = vadd.f32 %v4621_v13, %v6122_v25  ;;  %v1470_v19 = vpop.f32.mrb[7].mxu1 }
 0x333   : > { %v1738_v37 = vmul.f32 0.7978846, %v1706_v52  ;;  %v1707_v20 = vadd.f32 %v1675_v47, %v1455_v48  ;;  %v1614_v43 = vmul.f32 %v1468_v55, %v1468_v55  ;;  %v1471_v5 = vadd.f32 %v6122_v25, %v1470_v19 }
 0x334   : > { %4988 = vtanh.f32 %v1740_v62  ;;  %v1741_v32 = vmul.f32 0.7978846, %v1709_v28  ;;  %v1648_v24 = vmul.f32 %v1616_v41, %v1476_v23  ;;  %v1617_v49 = vmul.f32 %v1479_v4, %v1479_v4 }
 0x335   : > { %4990 = vtanh.f32 %v1738_v37  ;;  %v1739_v60 = vmul.f32 0.7978846, %v1707_v20  ;;  %v1646_v36 = vmul.f32 %v1614_v43, %v1468_v55  ;;  %v1615_v8 = vmul.f32 %v1471_v5, %v1471_v5 }
 0x336   : > { %4992 = vtanh.f32 %v1741_v32  ;;  %v1680_v63 = vmul.f32 0.044715, %v1648_v24  ;;  %v1649_v46 = vmul.f32 %v1617_v49, %v1479_v4  ;;  %v6136_v31 = vmul.f32 0.5, %v1468_v55 }
 0x337   : > { %4994 = vtanh.f32 %v1739_v60  ;;  %v1678_v59 = vmul.f32 0.044715, %v1646_v36  ;;  %v1647_v35 = vmul.f32 %v1615_v8, %v1471_v5  ;;  %v6138_v11 = vmul.f32 0.5, %v1471_v5 }
 0x338   : > { %v1712_v10 = vadd.f32 %v1680_v63, %v1476_v23  ;;  %v1681_v34 = vmul.f32 0.044715, %v1649_v46  ;;  %v4624_v16 = vpop.f32.mrb[8].mxu1  ;;  %v6141_v45 = vmul.f32 0.5, %v1476_v23  ;;  %v6144_v48 = vmul.f32 0.5, %v1479_v4 }
 0x339   : > { %v1710_v30 = vadd.f32 %v1678_v59, %v1468_v55  ;;  %v1679_v39 = vmul.f32 0.044715, %v1647_v35  ;;  %v1492_v29 = vadd.f32 %v4624_v16, %v6122_v25  ;;  %v1483_v33 = vpop.f32.mrb[9].mxu1 }
 0x33a   : > { %v1744_v12 = vmul.f32 0.7978846, %v1712_v10  ;;  %v1713_v38 = vadd.f32 %v1681_v34, %v1479_v4  ;;  %v1484_v57 = vadd.f32 %v6122_v25, %v1483_v33  ;;  %v4625_v21 = vpop.f32.mrb[10].mxu1 }
 0x33b   : > { %v1742_v2 = vmul.f32 0.7978846, %v1710_v30  ;;  %v1711_v9 = vadd.f32 %v1679_v39, %v1471_v5  ;;  %v1620_v15 = vmul.f32 %v1492_v29, %v1492_v29  ;;  %v1495_v58 = vadd.f32 %v4625_v21, %v6122_v25  ;;  %v1486_v50 = vpop.f32.mrb[11].mxu1 }
 0x33c   : > { %4996 = vtanh.f32 %v1744_v12  ;;  %v1745_v17 = vmul.f32 0.7978846, %v1713_v38  ;;  %v1618_v27 = vmul.f32 %v1484_v57, %v1484_v57  ;;  %v1487_v0 = vadd.f32 %v6122_v25, %v1486_v50 }
 0x33d   : > { %4998 = vtanh.f32 %v1742_v2  ;;  %v1743_v23 = vmul.f32 0.7978846, %v1711_v9  ;;  %v1652_v52 = vmul.f32 %v1620_v15, %v1492_v29  ;;  %v1621_v47 = vmul.f32 %v1495_v58, %v1495_v58 }
 0x33e   : > { %v4989_v55 = vpop.eup %4988  ;;  %5000 = vtanh.f32 %v1745_v17  ;;  %v1650_v13 = vmul.f32 %v1618_v27, %v1484_v57  ;;  %v1619_v62 = vmul.f32 %v1487_v0, %v1487_v0  ;;  %v6148_v28 = vmul.f32 0.5, %v1484_v57 }
 0x33f   : > { %v4991_v41 = vpop.eup %4990  ;;  %v1804_v4 = vadd.f32 1.0, %v4989_v55  ;;  %5002 = vtanh.f32 %v1743_v23  ;;  %v1684_v19 = vmul.f32 0.044715, %v1652_v52  ;;  %v1653_v37 = vmul.f32 %v1621_v47, %v1495_v58 }
 0x340   : > { %v4993_v20 = vpop.eup %4992  ;;  %v1682_v43 = vmul.f32 0.044715, %v1650_v13  ;;  %v1651_v5 = vmul.f32 %v1619_v62, %v1487_v0  ;;  %v1802_v32 = vadd.f32 1.0, %v4991_v41  ;;  %v6150_v24 = vmul.f32 0.5, %v1487_v0 }
 0x341   : > { %v4995_v49 = vpop.eup %4994  ;;  %v1836_v60 = vmul.f32 %v1804_v4, %v6128_v54  ;;  %v1805_v36 = vadd.f32 1.0, %v4993_v20  ;;  %v1716_v8 = vadd.f32 %v1684_v19, %v1492_v29  ;;  %v1685_v63 = vmul.f32 0.044715, %v1653_v37 }
 0x342   : > { %v1714_v46 = vadd.f32 %v1682_v43, %v1484_v57  ;;  %v1683_v59 = vmul.f32 0.044715, %v1651_v5  ;;  %v1803_v35 = vadd.f32 1.0, %v4995_v49  ;;  %v1834_v10 = vmul.f32 %v1802_v32, %v6132_v6 }
 0x343   : > { %v1837_v34 = vmul.f32 %v1805_v36, %v1581_v18  ;;  %v1748_v16 = vmul.f32 0.7978846, %v1716_v8  ;;  %v1717_v30 = vadd.f32 %v1685_v63, %v1495_v58  ;;  %v6154_v39 = vmul.f32 0.5, %v1492_v29 }
 0x344   : > { %v1746_v33 = vmul.f32 0.7978846, %v1714_v46  ;;  %v1715_v12 = vadd.f32 %v1683_v59, %v1487_v0  ;;  %v4628_v38 = vpop.f32.mrb[12].mxu1  ;;  %v1835_v21 = vmul.f32 %v1803_v35, %v1579_v26  ;;  %v6156_v2 = vmul.f32 0.5, %v1495_v58 }
 0x345   : > { %5004 = vtanh.f32 %v1748_v16  ;;  %v1749_v54 = vmul.f32 0.7978846, %v1717_v30  ;;  %v6159_v9 = vadd.f32 %v4628_v38, %v6122_v25  ;;  %v1499_v57 = vpop.f32.mrb[13].mxu1  ;;  %v1867_v15 = vpack.c.bf16 %v1837_v34, %v1836_v60 }
 0x346   : > { %v4997_v50 = vpop.eup %4996  ;;  %5006 = vtanh.f32 %v1746_v33  ;;  %v1747_v6 = vmul.f32 0.7978846, %v1715_v12  ;;  %v1500_v18 = vadd.f32 %v6122_v25, %v1499_v57  ;;  %v4629_v29 = vpop.f32.mrb[14].mxu1  ;;  %v1866_v17 = vpack.c.bf16 %v1835_v21, %v1834_v10 }
 0x347   : > { %v4999_v27 = vpop.eup %4998  ;;  %5008 = vtanh.f32 %v1749_v54  ;;  %v1624_v26 = vmul.f32 %v6159_v9, %v6159_v9  ;;  %v6165_v58 = vadd.f32 %v4629_v29, %v6122_v25  ;;  %v1502_v0 = vpop.f32.mrb[15].mxu1  ;;  %v1808_v23 = vadd.f32 1.0, %v4997_v50 }
 0x348   : > { %v5001_v52 = vpop.eup %5000  ;;  %5010 = vtanh.f32 %v1747_v6  ;;  %v1622_v47 = vmul.f32 %v1500_v18, %v1500_v18  ;;  %v1503_v55 = vadd.f32 %v6122_v25, %v1502_v0  ;;  %4662 = vmatprep.mubr.bf16.mxu0 %v1866_v17  ;;  %v1806_v13 = vadd.f32 1.0, %v4999_v27 }
 0x349   : > { %v5003_v62 = vpop.eup %5002  ;;  %v1656_v41 = vmul.f32 %v1624_v26, %v6159_v9  ;;  %v1625_v4 = vmul.f32 %v6165_v58, %v6165_v58  ;;  %4663 = vmatmul.mubr.bf16.vlgmr.msra.gmra.mrb[32].mxu0 %v1867_v15  ;;  %v1809_v19 = vadd.f32 1.0, %v5001_v52  ;;  %v1840_v37 = vmul.f32 %v1808_v23, %v6141_v45 }
 0x34a   : > { %v1654_v20 = vmul.f32 %v1622_v47, %v1500_v18  ;;  %v1623_v43 = vmul.f32 %v1503_v55, %v1503_v55  ;;  %v1807_v5 = vadd.f32 1.0, %v5003_v62  ;;  %v1838_v32 = vmul.f32 %v1806_v13, %v6136_v31 }
 0x34b   : > { %v1688_v49 = vmul.f32 0.044715, %v1656_v41  ;;  %v1657_v60 = vmul.f32 %v1625_v4, %v6165_v58  ;;  %v1841_v36 = vmul.f32 %v1809_v19, %v6144_v48  ;;  %v6175_v8 = vmul.f32 0.5, %v1500_v18 }
 0x34c   : > { %v1686_v63 = vmul.f32 0.044715, %v1654_v20  ;;  %v1655_v46 = vmul.f32 %v1623_v43, %v1503_v55  ;;  %v4632_v59 = vpop.f32.mrb[16].mxu1  ;;  %v1839_v35 = vmul.f32 %v1807_v5, %v6138_v11  ;;  %v6178_v10 = vmul.f32 0.5, %v1503_v55 }
 0x34d   : > { %v1720_v45 = vadd.f32 %v1688_v49, %v6159_v9  ;;  %v1689_v34 = vmul.f32 0.044715, %v1657_v60  ;;  %v6182_v16 = vadd.f32 %v4632_v59, %v6122_v25  ;;  %v1515_v31 = vpop.f32.mrb[17].mxu1  ;;  %v1869_v30 = vpack.c.bf16 %v1841_v36, %v1840_v37 }
 0x34e   : > { %v1718_v33 = vadd.f32 %v1686_v63, %v1500_v18  ;;  %v1687_v12 = vmul.f32 0.044715, %v1655_v46  ;;  %v6185_v48 = vadd.f32 %v6122_v25, %v1515_v31  ;;  %v4633_v38 = vpop.f32.mrb[18].mxu1  ;;  %v1868_v21 = vpack.c.bf16 %v1839_v35, %v1838_v32 }
 0x34f   : > { %v6187_v54 = vpop.eup %5004  ;;  %v1752_v11 = vmul.f32 0.7978846, %v1720_v45  ;;  %v1721_v57 = vadd.f32 %v1689_v34, %v6165_v58  ;;  %v1628_v15 = vmul.f32 %v6182_v16, %v6182_v16  ;;  %v6193_v50 = vadd.f32 %v4633_v38, %v6122_v25  ;;  %v1518_v6 = vpop.f32.mrb[19].mxu1 }
 0x350   : > { %v5007_v29 = vpop.eup %5006  ;;  %v1750_v18 = vmul.f32 0.7978846, %v1718_v33  ;;  %v1719_v17 = vadd.f32 %v1687_v12, %v1503_v55  ;;  %v1626_v27 = vmul.f32 %v6185_v48, %v6185_v48  ;;  %v6198_v26 = vadd.f32 %v6122_v25, %v1518_v6  ;;  %4666 = vmatprep.mubr.bf16.mxu0 %v1868_v21 }
 0x351   : > { %v6200_v0 = vpop.eup %5008  ;;  %5012 = vtanh.f32 %v1752_v11  ;;  %v1753_v23 = vmul.f32 0.7978846, %v1721_v57  ;;  %v1660_v52 = vmul.f32 %v1628_v15, %v6182_v16  ;;  %v1629_v47 = vmul.f32 %v6193_v50, %v6193_v50  ;;  %4667 = vmatmul.mubr.bf16.gmra.mrb[36].mxu0 %v1869_v30 }
 0x352   : > { %v5011_v13 = vpop.eup %5010  ;;  %5014 = vtanh.f32 %v1750_v18  ;;  %v1751_v55 = vmul.f32 0.7978846, %v1719_v17  ;;  %v1658_v62 = vmul.f32 %v1626_v27, %v6185_v48  ;;  %v1627_v41 = vmul.f32 %v6198_v26, %v6198_v26 }
 0x353   : > { %5016 = vtanh.f32 %v1753_v23  ;;  %v1692_v4 = vmul.f32 0.044715, %v1660_v52  ;;  %v1661_v19 = vmul.f32 %v1629_v47, %v6193_v50  ;;  %v1810_v37 = vadd.f32 1.0, %v5007_v29 }
 0x354   : > { %5018 = vtanh.f32 %v1751_v55  ;;  %v1690_v20 = vmul.f32 0.044715, %v1658_v62  ;;  %v1659_v43 = vmul.f32 %v1627_v41, %v6198_v26  ;;  %v4636_v5 = vpop.f32.mrb[20].mxu1  ;;  %v1811_v32 = vadd.f32 1.0, %v5011_v13 }
 0x355   : > { %v1724_v49 = vadd.f32 %v1692_v4, %v6182_v16  ;;  %v1693_v60 = vmul.f32 0.044715, %v1661_v19  ;;  %v6212_v36 = vadd.f32 %v4636_v5, %v6122_v25  ;;  %v1531_v63 = vpop.f32.mrb[21].mxu1  ;;  %v1842_v46 = vmul.f32 %v1810_v37, %v6148_v28 }
 0x356   : > { %v1722_v59 = vadd.f32 %v1690_v20, %v6185_v48  ;;  %v1691_v35 = vmul.f32 0.044715, %v1659_v43  ;;  %v6217_v45 = vadd.f32 %v6122_v25, %v1531_v63  ;;  %v4637_v34 = vpop.f32.mrb[22].mxu1  ;;  %v1843_v31 = vmul.f32 %v1811_v32, %v6150_v24 }
 0x357   : > { %v1756_v30 = vmul.f32 0.7978846, %v1724_v49  ;;  %v1725_v33 = vadd.f32 %v1693_v60, %v6193_v50  ;;  %v1632_v12 = vmul.f32 %v6212_v36, %v6212_v36  ;;  %v6224_v38 = vadd.f32 %v4637_v34, %v6122_v25  ;;  %v1534_v21 = vpop.f32.mrb[23].mxu1 }
 0x358   : > { %v1754_v28 = vmul.f32 0.7978846, %v1722_v59  ;;  %v1723_v11 = vadd.f32 %v1691_v35, %v6198_v26  ;;  %v1630_v57 = vmul.f32 %v6217_v45, %v6217_v45  ;;  %v6230_v15 = vadd.f32 %v6122_v25, %v1534_v21 }
 0x359   : > { %5020 = vtanh.f32 %v1756_v30  ;;  %v1757_v24 = vmul.f32 0.7978846, %v1725_v33  ;;  %v1664_v6 = vmul.f32 %v1632_v12, %v6212_v36  ;;  %v1633_v29 = vmul.f32 %v6224_v38, %v6224_v38 }
 0x35a   : > { %5022 = vtanh.f32 %v1754_v28  ;;  %v1755_v18 = vmul.f32 0.7978846, %v1723_v11  ;;  %v1662_v17 = vmul.f32 %v1630_v57, %v6217_v45  ;;  %v1631_v27 = vmul.f32 %v6230_v15, %v6230_v15 }
 0x35b   : > { %v6238_v23 = vpop.eup %5012  ;;  %5024 = vtanh.f32 %v1757_v24  ;;  %v1696_v52 = vmul.f32 0.044715, %v1664_v6  ;;  %v1665_v47 = vmul.f32 %v1633_v29, %v6224_v38  ;;  %v1870_v13 = vpack.c.bf16 %v1843_v31, %v1842_v46 }
 0x35c   : > { %v5015_v55 = vpop.eup %5014  ;;  %5026 = vtanh.f32 %v1755_v18  ;;  %v1694_v62 = vmul.f32 0.044715, %v1662_v17  ;;  %v1663_v41 = vmul.f32 %v1631_v27, %v6230_v15  ;;  %v4640_v4 = vpop.f32.mrb[24].mxu1  ;;  %v1812_v19 = vadd.f32 1.0, %v6187_v54 }
 0x35d   : > { %v6243_v37 = vpop.eup %5016  ;;  %v1728_v20 = vadd.f32 %v1696_v52, %v6212_v36  ;;  %v1697_v43 = vmul.f32 0.044715, %v1665_v47  ;;  %v6247_v5 = vadd.f32 %v4640_v4, %v6122_v25  ;;  %v1547_v32 = vpop.f32.mrb[25].mxu1  ;;  %4670 = vmatprep.mubr.bf16.mxu0 %v1870_v13  ;;  %v1813_v49 = vadd.f32 1.0, %v6200_v0 }
 0x35e   : > { %v5019_v60 = vpop.eup %5018  ;;  %v1726_v63 = vadd.f32 %v1694_v62, %v6217_v45  ;;  %v1695_v46 = vmul.f32 0.044715, %v1663_v41  ;;  %v6252_v59 = vadd.f32 %v6122_v25, %v1547_v32  ;;  %v4641_v54 = vpop.f32.mrb[26].mxu1  ;;  %v1844_v35 = vmul.f32 %v1812_v19, %v6154_v39 }
 0x35f   : > { %v1760_v34 = vmul.f32 0.7978846, %v1728_v20  ;;  %v1729_v31 = vadd.f32 %v1697_v43, %v6224_v38  ;;  %v1636_v30 = vmul.f32 %v6247_v5, %v6247_v5  ;;  %v6259_v33 = vadd.f32 %v4641_v54, %v6122_v25  ;;  %v1550_v0 = vpop.f32.mrb[27].mxu1 }
 0x360   : > { %v1758_v12 = vmul.f32 0.7978846, %v1726_v63  ;;  %v1727_v21 = vadd.f32 %v1695_v46, %v6230_v15  ;;  %v1634_v28 = vmul.f32 %v6252_v59, %v6252_v59  ;;  %v1845_v11 = vmul.f32 %v1813_v49, %v6156_v2 }
 0x361   : > { %5028 = vtanh.f32 %v1760_v34  ;;  %v1761_v39 = vmul.f32 0.7978846, %v1729_v31  ;;  %v1668_v57 = vmul.f32 %v1636_v30, %v6247_v5  ;;  %v1637_v24 = vmul.f32 %v6259_v33, %v6259_v33 }
 0x362   : > { %5030 = vtanh.f32 %v1758_v12  ;;  %v1759_v6 = vmul.f32 0.7978846, %v1727_v21  ;;  %v1666_v29 = vmul.f32 %v1634_v28, %v6252_v59  ;;  %v1871_v18 = vpack.c.bf16 %v1845_v11, %v1844_v35 }
 0x363   : > { %v6269_v17 = vpop.eup %5020  ;;  %5032 = vtanh.f32 %v1761_v39  ;;  %v1700_v27 = vmul.f32 0.044715, %v1668_v57  ;;  %v1669_v52 = vmul.f32 %v1637_v24, %v6259_v33  ;;  %v6273_v2 = vadd.f32 %v6122_v25, %v1550_v0 }
 0x364   : > { %v6275_v47 = vpop.eup %5022  ;;  %5034 = vtanh.f32 %v1759_v6  ;;  %v1698_v13 = vmul.f32 0.044715, %v1666_v29  ;;  %4671 = vmatmul.mubr.bf16.gmra.mrb[40].mxu0 %v1871_v18  ;;  %v4644_v62 = vpop.f32.mrb[28].mxu1  ;;  %v1814_v41 = vadd.f32 1.0, %v5015_v55  ;;  %v1815_v4 = vadd.f32 1.0, %v5019_v60 }
 0x365   : > { %v6277_v19 = vpop.eup %5024  ;;  %v1732_v20 = vadd.f32 %v1700_v27, %v6247_v5  ;;  %v1701_v43 = vmul.f32 0.044715, %v1669_v52  ;;  %v1635_v32 = vmul.f32 %v6273_v2, %v6273_v2  ;;  %v6283_v49 = vadd.f32 %v4644_v62, %v6122_v25  ;;  %v1563_v63 = vpop.f32.mrb[29].mxu1 }
 0x366   : > { %v5027_v46 = vpop.eup %5026  ;;  %v1730_v54 = vadd.f32 %v1698_v13, %v6252_v59  ;;  %v6287_v35 = vadd.f32 %v6122_v25, %v1563_v63  ;;  %v1846_v55 = vmul.f32 %v1814_v41, %v6175_v8  ;;  %v1847_v60 = vmul.f32 %v1815_v4, %v6178_v10  ;;  %v4645_v34 = vpop.f32.mrb[30].mxu1 }
 0x367   : > { %v1764_v31 = vmul.f32 0.7978846, %v1732_v20  ;;  %v1733_v30 = vadd.f32 %v1701_v43, %v6259_v33  ;;  %v1667_v0 = vmul.f32 %v1635_v32, %v6273_v2  ;;  %v1640_v12 = vmul.f32 %v6283_v49, %v6283_v49  ;;  %v1566_v21 = vpop.f32.mrb[31].mxu1 }
 0x368   : > { %v1762_v28 = vmul.f32 0.7978846, %v1730_v54  ;;  %v1638_v11 = vmul.f32 %v6287_v35, %v6287_v35  ;;  %v1872_v39 = vpack.c.bf16 %v1847_v60, %v1846_v55  ;;  %v6298_v57 = vadd.f32 %v4645_v34, %v6122_v25 }
 0x369   : > { %5036 = vtanh.f32 %v1764_v31  ;;  %v1765_v8 = vmul.f32 0.7978846, %v1733_v30  ;;  %v1699_v10 = vmul.f32 0.044715, %v1667_v0  ;;  %v1672_v24 = vmul.f32 %v1640_v12, %v6283_v49 }
 0x36a   : > { %5038 = vtanh.f32 %v1762_v28  ;;  %v1670_v6 = vmul.f32 %v1638_v11, %v6287_v35  ;;  %4674 = vmatprep.mubr.bf16.mxu0 %v1872_v39  ;;  %v1641_v29 = vmul.f32 %v6298_v57, %v6298_v57  ;;  %v1592_v18 = vmul.f32 0.5, %v6159_v9 }
 0x36b   : > { %v5029_v27 = vpop.eup %5028  ;;  %5040 = vtanh.f32 %v1765_v8  ;;  %v1731_v52 = vadd.f32 %v1699_v10, %v6273_v2  ;;  %v1704_v13 = vmul.f32 0.044715, %v1672_v24  ;;  %v1593_v62 = vmul.f32 0.5, %v6165_v58 }
 0x36c   : > { %v5031_v41 = vpop.eup %5030  ;;  %v1702_v4 = vmul.f32 0.044715, %v1670_v6  ;;  %v1673_v20 = vmul.f32 %v1641_v29, %v6298_v57  ;;  %v1816_v43 = vadd.f32 1.0, %v6238_v23  ;;  %v1817_v32 = vadd.f32 1.0, %v6243_v37 }
 0x36d   : > { %v5033_v63 = vpop.eup %5032  ;;  %v1763_v54 = vmul.f32 0.7978846, %v1731_v52  ;;  %v1736_v55 = vadd.f32 %v1704_v13, %v6283_v49  ;;  %v6312_v9 = vadd.f32 %v6122_v25, %v1566_v21  ;;  %v1594_v60 = vmul.f32 0.5, %v6185_v48 }
 0x36e   : > { %v5035_v34 = vpop.eup %5034  ;;  %v1734_v58 = vadd.f32 %v1702_v4, %v6287_v35  ;;  %v1705_v31 = vmul.f32 0.044715, %v1673_v20  ;;  %v1848_v30 = vmul.f32 %v1816_v43, %v1592_v18  ;;  %v1849_v0 = vmul.f32 %v1817_v32, %v1593_v62 }
 0x36f   : > { %5042 = vtanh.f32 %v1763_v54  ;;  %v1768_v12 = vmul.f32 0.7978846, %v1736_v55  ;;  %v1639_v23 = vmul.f32 %v6312_v9, %v6312_v9  ;;  %v1595_v37 = vmul.f32 0.5, %v6198_v26 }
 0x370   : > { %v1766_v28 = vmul.f32 0.7978846, %v1734_v58  ;;  %v1737_v11 = vadd.f32 %v1705_v31, %v6298_v57  ;;  %v1873_v25 = vpack.c.bf16 %v1849_v0, %v1848_v30  ;;  %v1818_v21 = vadd.f32 1.0, %v6275_v47 }
 0x371   : > { %5044 = vtanh.f32 %v1768_v12  ;;  %v1671_v48 = vmul.f32 %v1639_v23, %v6312_v9  ;;  %v1819_v39 = vadd.f32 1.0, %v5027_v46  ;;  %v1596_v8 = vmul.f32 0.5, %v6182_v16 }
 0x372   : > { %5046 = vtanh.f32 %v1766_v28  ;;  %v1769_v10 = vmul.f32 0.7978846, %v1737_v11  ;;  %4675 = vmatmul.mubr.bf16.gmra.mrb[44].mxu0 %v1873_v25  ;;  %v1850_v24 = vmul.f32 %v1818_v21, %v1594_v60  ;;  %v1597_v6 = vmul.f32 0.5, %v6193_v50 }
 0x373   : > { %v5037_v29 = vpop.eup %5036  ;;  %v1703_v26 = vmul.f32 0.044715, %v1671_v48  ;;  %v1851_v18 = vmul.f32 %v1819_v39, %v1595_v37  ;;  %v1820_v52 = vadd.f32 1.0, %v6269_v17  ;;  %v1821_v13 = vadd.f32 1.0, %v6277_v19 }
 0x374   : > { %v5039_v47 = vpop.eup %5038  ;;  %5048 = vtanh.f32 %v1769_v10  ;;  %v1598_v62 = vmul.f32 0.5, %v6217_v45  ;;  %v1822_v46 = vadd.f32 1.0, %v5031_v41  ;;  %v1599_v50 = vmul.f32 0.5, %v6230_v15 }
 0x375   : > { %v5041_v4 = vpop.eup %5040  ;;  %v1735_v16 = vadd.f32 %v1703_v26, %v6312_v9  ;;  %v1874_v20 = vpack.c.bf16 %v1851_v18, %v1850_v24  ;;  %v1852_v43 = vmul.f32 %v1820_v52, %v1596_v8  ;;  %v1853_v32 = vmul.f32 %v1821_v13, %v1597_v6 }
 0x376   : > { %v1823_v54 = vadd.f32 1.0, %v5035_v34  ;;  %v1600_v55 = vmul.f32 0.5, %v6212_v36  ;;  %v1601_v17 = vmul.f32 0.5, %v6224_v38  ;;  %v1824_v58 = vadd.f32 1.0, %v5029_v27 }
 0x377   : > { %v1767_v60 = vmul.f32 0.7978846, %v1735_v16  ;;  %4678 = vmatprep.mubr.bf16.mxu0 %v1874_v20  ;;  %v1875_v19 = vpack.c.bf16 %v1853_v32, %v1852_v43  ;;  %v1825_v31 = vadd.f32 1.0, %v5033_v63  ;;  %v1854_v45 = vmul.f32 %v1822_v46, %v1598_v62 }
 0x378   : > { %v1855_v41 = vmul.f32 %v1823_v54, %v1599_v50  ;;  %v1826_v30 = vadd.f32 1.0, %v5039_v47  ;;  %v1856_v12 = vmul.f32 %v1824_v58, %v1600_v55  ;;  %v1602_v37 = vmul.f32 0.5, %v6252_v59 }
 0x379   : > { %v5043_v0 = vpop.eup %5042  ;;  %5050 = vtanh.f32 %v1767_v60  ;;  %v1857_v23 = vmul.f32 %v1825_v31, %v1601_v17  ;;  %v1603_v36 = vmul.f32 0.5, %v6273_v2  ;;  %v1604_v38 = vmul.f32 0.5, %v6247_v5 }
 0x37a   : > { %4679 = vmatmul.mubr.bf16.gmra.mrb[48].mxu0 %v1875_v19  ;;  %v1876_v15 = vpack.c.bf16 %v1855_v41, %v1854_v45  ;;  %v1827_v34 = vadd.f32 1.0, %v5043_v0  ;;  %v1605_v27 = vmul.f32 0.5, %v6259_v33  ;;  %v1828_v63 = vadd.f32 1.0, %v5037_v29 }
 0x37b   : > { %v5045_v28 = vpop.eup %5044  ;;  %v1877_v11 = vpack.c.bf16 %v1857_v23, %v1856_v12  ;;  %v1829_v25 = vadd.f32 1.0, %v5041_v4  ;;  %v1858_v48 = vmul.f32 %v1826_v30, %v1602_v37  ;;  %v1608_v2 = vmul.f32 0.5, %v6283_v49  ;;  %v6342_v49 = vld [vmem:[%s7763_s5 + $0x7] ss:$0 sm:$0xff] }
 0x37c   : > { %v5047_v21 = vpop.eup %5046  ;;  %4682 = vmatprep.mubr.bf16.mxu0 %v1876_v15  ;;  %v1859_v39 = vmul.f32 %v1827_v34, %v1603_v36  ;;  %v1860_v8 = vmul.f32 %v1828_v63, %v1604_v38  ;;  %v1832_v59 = vadd.f32 1.0, %v5045_v28  ;;  %v1609_v5 = vmul.f32 0.5, %v6298_v57 }
 0x37d   : > { %v1861_v10 = vmul.f32 %v1829_v25, %v1605_v27  ;;  %v1830_v33 = vadd.f32 1.0, %v5047_v21  ;;  %v1606_v62 = vmul.f32 0.5, %v6287_v35  ;;  %v1607_v46 = vmul.f32 0.5, %v6312_v9 }
 0x37e   : > { %v5049_v24 = vpop.eup %5048  ;;  %v1878_v6 = vpack.c.bf16 %v1859_v39, %v1858_v48  ;;  %v1864_v52 = vmul.f32 %v1832_v59, %v1608_v2 }
 0x37f   : > { %v1879_v26 = vpack.c.bf16 %v1861_v10, %v1860_v8  ;;  %v1833_v18 = vadd.f32 1.0, %v5049_v24  ;;  %v1862_v16 = vmul.f32 %v1830_v33, %v1606_v62  ;;  %v7823_v33 = vld [vmem:[#allocation2_spill] sm:$0xff] }
 0x381   : > { %v1865_v13 = vmul.f32 %v1833_v18, %v1609_v5 }
 0x382   : > { %4683 = vmatmul.mubr.bf16.gmra.mrb[52].mxu0 %v1877_v11 }
 0x383   : > { %v5051_v29 = vpop.eup %5050  ;;  %4686 = vmatprep.mubr.bf16.mxu0 %v1878_v6  ;;  %v1881_v47 = vpack.c.bf16 %v1865_v13, %v1864_v52 }
 0x384   : > { %v1831_v4 = vadd.f32 1.0, %v5051_v29 }
 0x386   : > { %v1863_v20 = vmul.f32 %v1831_v4, %v1607_v46  ;;  %v7824_v46 = vld [vmem:[#allocation4_spill] sm:$0xff] }
 0x388   : > { %v1880_v43 = vpack.c.bf16 %v1863_v20, %v1862_v16  ;;  %v7825_v16 = vld [vmem:[#allocation3_spill] sm:$0xff] }
 0x38a   : > { %4687 = vmatmul.mubr.bf16.gmra.mrb[56].mxu0 %v1879_v26 }
 0x38b   : > { %4690 = vmatprep.mubr.bf16.mxu0 %v1880_v43 }
 0x392   : > { %4691 = vmatmul.mubr.bf16.gmra.mrb[60].mxu0 %v1881_v47 }
 0x41c   : > { %v4664_v57 = vpop.f32.mrb[32].mxu0 }
 0x41d   : > { %v1984_v32 = vpop.f32.mrb[33].mxu0  ;;  %v1993_v50 = vadd.f32 %v4664_v57, %v6342_v49  ;;  %v7827_v57 = vld [vmem:[#allocation5_spill] sm:$0xff] }
 0x41e   : > { %v1985_v35 = vadd.f32 %v6342_v49, %v1984_v32  ;;  %v4665_v54 = vpop.f32.mrb[34].mxu0 }
 0x41f   : > { %v1987_v9 = vpop.f32.mrb[35].mxu0  ;;  %v1996_v17 = vadd.f32 %v4665_v54, %v6342_v49  ;;  %v6352_v19 = vadd.f32 %v1993_v50, %v5432_v22 }
 0x420   : > { %v6347_v55 = vadd.f32 %v1985_v35, %v5461_v53  ;;  %v1988_v60 = vadd.f32 %v6342_v49, %v1987_v9 }
 0x421   : > { %v6360_v45 = vadd.f32 %v1996_v17, %v5479_v7 }
 0x422   : > { %v6355_v58 = vadd.f32 %v1988_v60, %v5507_v40  ;;  %v2147_v31 = vsel %vm827_vm1, %v6347_v55, 0.0  ;;  %v2153_v40 = vsel %vm827_vm1, %v6352_v19, 0.0 }
 0x423   : > { %2148 = vadd.xlane.f32.xlu0 %v2147_v31  ;;  %v2156_v36 = vsel %vm827_vm1, %v6360_v45, 0.0 }
 0x424   : > { %v4668_v41 = vpop.f32.mrb[36].mxu0  ;;  %v2150_v53 = vsel %vm827_vm1, %v6355_v58, 0.0 }
 0x425   : > { %2151 = vadd.xlane.f32.xlu1 %v2150_v53  ;;  %v2000_v30 = vpop.f32.mrb[37].mxu0  ;;  %v2009_v0 = vadd.f32 %v4668_v41, %v6342_v49  ;;  %v7829_v53 = vld [vmem:[#allocation6_spill] sm:$0xff] }
 0x426   : > { %v2001_v22 = vadd.f32 %v6342_v49, %v2000_v30  ;;  %v4669_v12 = vpop.f32.mrb[38].mxu0 }
 0x427   : > { %2154 = vadd.xlane.f32.xlu0 %v2153_v40  ;;  %v2003_v23 = vpop.f32.mrb[39].mxu0  ;;  %v2012_v7 = vadd.f32 %v4669_v12, %v6342_v49  ;;  %v6376_v34 = vadd.f32 %v2009_v0, %v5558_v42  ;;  %v7831_v40 = vld [vmem:[#allocation8_spill] sm:$0xff] }
 0x428   : > { %v6369_v37 = vadd.f32 %v2001_v22, %v5518_v51  ;;  %v2004_v15 = vadd.f32 %v6342_v49, %v2003_v23 }
 0x429   : > { %2157 = vadd.xlane.f32.xlu1 %v2156_v36  ;;  %v6384_v51 = vadd.f32 %v2012_v7, %v5566_v44  ;;  %v2165_v27 = vsel %vm827_vm1, %v6376_v34, 0.0  ;;  %v7833_v7 = vld [vmem:[#allocation7_spill] sm:$0xff] }
 0x42a   : > { %v6379_v38 = vadd.f32 %v2004_v15, %v5527_v1  ;;  %v2159_v28 = vsel %vm827_vm1, %v6369_v37, 0.0 }
 0x42b   : > { %2160 = vadd.xlane.f32.xlu0 %v2159_v28  ;;  %v2168_v42 = vsel %vm827_vm1, %v6384_v51, 0.0  ;;  %v7835_v28 = vld [vmem:[#allocation9_spill] sm:$0xff] }
 0x42c   : > { %v2162_v11 = vsel %vm827_vm1, %v6379_v38, 0.0 }
 0x42d   : > { %2163 = vadd.xlane.f32.xlu1 %v2162_v11 }
 0x42f   : > { %2166 = vadd.xlane.f32.xlu0 %v2165_v27 }
 0x431   : > { %2169 = vadd.xlane.f32.xlu1 %v2168_v42 }
 0x437   : > { %v4672_v1 = vpop.f32.mrb[40].mxu0 }
 0x438   : > { %v2016_v63 = vpop.f32.mrb[41].mxu0  ;;  %v2025_v25 = vadd.f32 %v4672_v1, %v6342_v49 }
 0x439   : > { %v2017_v21 = vadd.f32 %v6342_v49, %v2016_v63  ;;  %v4673_v44 = vpop.f32.mrb[42].mxu0 }
 0x43a   : > { %v2019_v48 = vpop.f32.mrb[43].mxu0  ;;  %v2028_v8 = vadd.f32 %v4673_v44, %v6342_v49  ;;  %v6400_v59 = vadd.f32 %v2025_v25, %v5613_v3 }
 0x43b   : > { %v6395_v39 = vadd.f32 %v2017_v21, %v5573_v61  ;;  %v2020_v10 = vadd.f32 %v6342_v49, %v2019_v48 }
 0x43c   : > { %v6408_v26 = vadd.f32 %v2028_v8, %v5621_v56  ;;  %v2177_v2 = vsel %vm827_vm1, %v6400_v59, 0.0  ;;  %v7837_v8 = vld [vmem:[#allocation10_spill] sm:$0xff] }
 0x43d   : > { %v6403_v24 = vadd.f32 %v2020_v10, %v5596_v14  ;;  %v2171_v6 = vsel %vm827_vm1, %v6395_v39, 0.0 }
 0x43e   : > { %2172 = vadd.xlane.f32.xlu0 %v2171_v6  ;;  %v2180_v3 = vsel %vm827_vm1, %v6408_v26, 0.0 }
 0x43f   : > { %v2174_v61 = vsel %vm827_vm1, %v6403_v24, 0.0 }
 0x440   : > { %2175 = vadd.xlane.f32.xlu1 %v2174_v61 }
 0x442   : > { %2178 = vadd.xlane.f32.xlu0 %v2177_v2 }
 0x444   : > { %2181 = vadd.xlane.f32.xlu1 %v2180_v3  ;;  %v7839_v3 = vld [vmem:[#allocation12_spill] sm:$0xff] }
 0x445   : > { %v4676_v14 = vpop.f32.mrb[44].mxu0 }
 0x446   : > { %v2032_v5 = vpop.f32.mrb[45].mxu0  ;;  %v2041_v18 = vadd.f32 %v4676_v14, %v6342_v49 }
 0x447   : > { %v2033_v52 = vadd.f32 %v6342_v49, %v2032_v5  ;;  %v4677_v56 = vpop.f32.mrb[46].mxu0  ;;  %v7841_v5 = vld [vmem:[#allocation11_spill] sm:$0xff] }
 0x448   : > { %v2035_v13 = vpop.f32.mrb[47].mxu0  ;;  %v2044_v47 = vadd.f32 %v4677_v56, %v6342_v49  ;;  %v6424_v4 = vadd.f32 %v2041_v18, %v7824_v46  ;;  %v7843_v56 = vld [vmem:[#allocation13_spill] sm:$0xff] }
 0x449   : > { %v6419_v29 = vadd.f32 %v2033_v52, %v7823_v33  ;;  %v2036_v62 = vadd.f32 %v6342_v49, %v2035_v13 }
 0x44a   : > { %v6432_v32 = vadd.f32 %v2044_v47, %v7827_v57  ;;  %v2189_v31 = vsel %vm827_vm1, %v6424_v4, 0.0 }
 0x44b   : > { %v6427_v20 = vadd.f32 %v2036_v62, %v7825_v16  ;;  %v2183_v43 = vsel %vm827_vm1, %v6419_v29, 0.0 }
 0x44c   : > { %2184 = vadd.xlane.f32.xlu0 %v2183_v43  ;;  %7828 = vst [vmem:[#allocation4_spill] sm:$0xff] %v6432_v32  ;;  %v2192_v12 = vsel %vm827_vm1, %v6432_v32, 0.0 }
 0x44d   : > { %7826 = vst [vmem:[#allocation2_spill] sm:$0xff] %v6427_v20  ;;  %v4680_v50 = vpop.f32.mrb[48].mxu0  ;;  %v2186_v35 = vsel %vm827_vm1, %v6427_v20, 0.0 }
 0x44e   : > { %2187 = vadd.xlane.f32.xlu1 %v2186_v35  ;;  %v2048_v54 = vpop.f32.mrb[49].mxu0  ;;  %v2057_v9 = vadd.f32 %v4680_v50, %v6342_v49  ;;  %v7845_v35 = vld [vmem:[#allocation14_spill] sm:$0xff] }
 0x44f   : > { %v2049_v17 = vadd.f32 %v6342_v49, %v2048_v54  ;;  %v4681_v60 = vpop.f32.mrb[50].mxu0 }
 0x450   : > { %2190 = vadd.xlane.f32.xlu0 %v2189_v31  ;;  %v2051_v41 = vpop.f32.mrb[51].mxu0  ;;  %v2060_v0 = vadd.f32 %v4681_v60, %v6342_v49  ;;  %v6448_v23 = vadd.f32 %v2057_v9, %v7831_v40  ;;  %v7847_v31 = vld [vmem:[#allocation16_spill] sm:$0xff] }
 0x451   : > { %v6441_v30 = vadd.f32 %v2049_v17, %v7829_v53  ;;  %v2052_v22 = vadd.f32 %v6342_v49, %v2051_v41  ;;  %v7849_v53 = vld [vmem:[#allocation15_spill] sm:$0xff] }
 0x452   : > { %2193 = vadd.xlane.f32.xlu1 %v2192_v12  ;;  %7832 = vst [vmem:[#allocation5_spill] sm:$0xff] %v6448_v23  ;;  %v6456_v11 = vadd.f32 %v2060_v0, %v7835_v28  ;;  %v2201_v44 = vsel %vm827_vm1, %v6448_v23, 0.0  ;;  %v7851_v12 = vld [vmem:[#allocation17_spill] sm:$0xff] }
 0x453   : > { %7830 = vst [vmem:[#allocation3_spill] sm:$0xff] %v6441_v30  ;;  %v6451_v15 = vadd.f32 %v2052_v22, %v7833_v7  ;;  %v2195_v36 = vsel %vm827_vm1, %v6441_v30, 0.0 }
 0x454   : > { %2196 = vadd.xlane.f32.xlu0 %v2195_v36  ;;  %7836 = vst [vmem:[#allocation8_spill] sm:$0xff] %v6456_v11  ;;  %v2204_v2 = vsel %vm827_vm1, %v6456_v11, 0.0 }
 0x455   : > { %7834 = vst [vmem:[#allocation6_spill] sm:$0xff] %v6451_v15  ;;  %v4684_v27 = vpop.f32.mrb[52].mxu0  ;;  %v2198_v42 = vsel %vm827_vm1, %v6451_v15, 0.0 }
 0x456   : > { %2199 = vadd.xlane.f32.xlu1 %v2198_v42  ;;  %v2064_v1 = vpop.f32.mrb[53].mxu0  ;;  %v2073_v63 = vadd.f32 %v4684_v27, %v6342_v49 }
 0x457   : > { %v2065_v25 = vadd.f32 %v6342_v49, %v2064_v1  ;;  %v4685_v21 = vpop.f32.mrb[54].mxu0 }
 0x458   : > { %2202 = vadd.xlane.f32.xlu0 %v2201_v44  ;;  %v2067_v48 = vpop.f32.mrb[55].mxu0  ;;  %v2076_v6 = vadd.f32 %v4685_v21, %v6342_v49  ;;  %v6472_v14 = vadd.f32 %v2073_v63, %v7839_v3  ;;  %v7853_v21 = vld [vmem:[#allocation18_spill] sm:$0xff]  ;;  %v7857_v3 = vld [vmem:[#allocation19_spill] sm:$0xff] }
 0x459   : > { %v6465_v10 = vadd.f32 %v2065_v25, %v7837_v8  ;;  %v2068_v61 = vadd.f32 %v6342_v49, %v2067_v48 }
 0x45a   : > { %2205 = vadd.xlane.f32.xlu1 %v2204_v2  ;;  %7840 = vst [vmem:[#allocation9_spill] sm:$0xff] %v6472_v14  ;;  %v6480_v13 = vadd.f32 %v2076_v6, %v7843_v56  ;;  %v2213_v57 = vsel %vm827_vm1, %v6472_v14, 0.0  ;;  %v7859_v56 = vld [vmem:[#allocation21_spill] sm:$0xff] }
 0x45b   : > { %7838 = vst [vmem:[#allocation7_spill] sm:$0xff] %v6465_v10  ;;  %v6475_v18 = vadd.f32 %v2068_v61, %v7841_v5  ;;  %v2207_v52 = vsel %vm827_vm1, %v6465_v10, 0.0  ;;  %v7855_v61 = vld [vmem:[#allocation20_spill] sm:$0xff] }
 0x45c   : > { %2208 = vadd.xlane.f32.xlu0 %v2207_v52  ;;  %7844 = vst [vmem:[#allocation12_spill] sm:$0xff] %v6480_v13  ;;  %v2216_v60 = vsel %vm827_vm1, %v6480_v13, 0.0 }
 0x45d   : > { %7842 = vst [vmem:[#allocation10_spill] sm:$0xff] %v6475_v18  ;;  %v4688_v33 = vpop.f32.mrb[56].mxu0  ;;  %v2210_v47 = vsel %vm827_vm1, %v6475_v18, 0.0 }
 0x45e   : > { %2211 = vadd.xlane.f32.xlu1 %v2210_v47  ;;  %v2080_v62 = vpop.f32.mrb[57].mxu0  ;;  %v2089_v46 = vadd.f32 %v4688_v33, %v6342_v49 }
 0x45f   : > { %v2081_v16 = vadd.f32 %v6342_v49, %v2080_v62  ;;  %v4689_v43 = vpop.f32.mrb[58].mxu0 }
 0x460   : > { %2214 = vadd.xlane.f32.xlu0 %v2213_v57  ;;  %v2083_v50 = vpop.f32.mrb[59].mxu0  ;;  %v2092_v9 = vadd.f32 %v4689_v43, %v6342_v49  ;;  %v6496_v41 = vadd.f32 %v2089_v46, %v7847_v31  ;;  %v4844_v46 = vld [vmem:[%s7760_s2 + $0x20] sm:$0xff]   ;;  %v4846_v43 = vld [vmem:[%s7760_s2 + $0x30] sm:$0xff]  }
 0x461   : > { %v6489_v54 = vadd.f32 %v2081_v16, %v7845_v35  ;;  %v2084_v17 = vadd.f32 %v6342_v49, %v2083_v50  ;;  %v4845_v16 = vld [vmem:[%s7760_s2 + $0x28] sm:$0xff]   ;;  %4694 = vmatprep.subr.bf16.mxu1 %v4844_v46 }
 0x462   : > { %2217 = vadd.xlane.f32.xlu1 %v2216_v60  ;;  %7848 = vst [vmem:[#allocation13_spill] sm:$0xff] %v6496_v41  ;;  %v6504_v40 = vadd.f32 %v2092_v9, %v7851_v12  ;;  %v2225_v63 = vsel %vm827_vm1, %v6496_v41, 0.0  ;;  %4695 = vmatpush3.bf16.msra.mxu1 %v4844_v46 }
 0x463   : > { %7846 = vst [vmem:[#allocation11_spill] sm:$0xff] %v6489_v54  ;;  %v6499_v0 = vadd.f32 %v2084_v17, %v7849_v53  ;;  %v2219_v22 = vsel %vm827_vm1, %v6489_v54, 0.0  ;;  %4696 = vmatprep.subr.bf16.mxu1 %v4845_v16 }
 0x464   : > { %2220 = vadd.xlane.f32.xlu0 %v2219_v22  ;;  %7852 = vst [vmem:[#allocation16_spill] sm:$0xff] %v6504_v40  ;;  %v2228_v6 = vsel %vm827_vm1, %v6504_v40, 0.0 }
 0x465   : > { %7850 = vst [vmem:[#allocation14_spill] sm:$0xff] %v6499_v0  ;;  %v4692_v7 = vpop.f32.mrb[60].mxu0  ;;  %v2222_v36 = vsel %vm827_vm1, %v6499_v0, 0.0 }
 0x466   : > { %2223 = vadd.xlane.f32.xlu1 %v2222_v36  ;;  %v2096_v28 = vpop.f32.mrb[61].mxu0  ;;  %v2105_v27 = vadd.f32 %v4692_v7, %v6342_v49  ;;  %4697 = vmatpush3.bf16.msra.mxu1 %v4845_v16 }
 0x467   : > { %v2097_v42 = vadd.f32 %v6342_v49, %v2096_v28  ;;  %v4693_v1 = vpop.f32.mrb[62].mxu0  ;;  %4698 = vmatprep.subr.bf16.mxu1 %v4846_v43 }
 0x468   : > { %2226 = vadd.xlane.f32.xlu0 %v2225_v63  ;;  %v2099_v25 = vpop.f32.mrb[63].mxu0  ;;  %v2108_v48 = vadd.f32 %v4693_v1, %v6342_v49  ;;  %v6520_v2 = vadd.f32 %v2105_v27, %v7855_v61 }
 0x469   : > { %v6513_v44 = vadd.f32 %v2097_v42, %v7853_v21  ;;  %v2100_v8 = vadd.f32 %v6342_v49, %v2099_v25 }
 0x46a   : > { %2229 = vadd.xlane.f32.xlu1 %v2228_v6  ;;  %7856 = vst [vmem:[#allocation17_spill] sm:$0xff] %v6520_v2  ;;  %v6528_v33 = vadd.f32 %v2108_v48, %v7859_v56  ;;  %v2237_v47 = vsel %vm827_vm1, %v6520_v2, 0.0  ;;  %4699 = vmatpush3.bf16.msra.mxu1 %v4846_v43 }
 0x46b   : > { %7854 = vst [vmem:[#allocation15_spill] sm:$0xff] %v6513_v44  ;;  %v6523_v5 = vadd.f32 %v2100_v8, %v7857_v3  ;;  %v2231_v52 = vsel %vm827_vm1, %v6513_v44, 0.0 }
 0x46c   : > { %2232 = vadd.xlane.f32.xlu0 %v2231_v52  ;;  %7860 = vst [vmem:[#allocation20_spill] sm:$0xff] %v6528_v33  ;;  %v2240_v62 = vsel %vm827_vm1, %v6528_v33, 0.0 }
 0x46d   : > { %7858 = vst [vmem:[#allocation18_spill] sm:$0xff] %v6523_v5  ;;  %v2234_v49 = vsel %vm827_vm1, %v6523_v5, 0.0 }
 0x46e   : > { %2235 = vadd.xlane.f32.xlu1 %v2234_v49 }
 0x470   : > { %2238 = vadd.xlane.f32.xlu0 %v2237_v47 }
 0x472   : > { %2241 = vadd.xlane.f32.xlu1 %v2240_v62 }
 0x4b0   : > { %v2149_v57 = vpop.xlane.xlu0 %2148 }
 0x4b1   : > { %v2243_v50 = vmul.f32 0.015625, %v2149_v57 }
 0x4b2   : > { %v2152_v35 = vpop.xlane.xlu1 %2151 }
 0x4b3   : > { %v6546_v9 = vsub.f32 %v6347_v55, %v2243_v50  ;;  %v2244_v17 = vmul.f32 0.015625, %v2152_v35 }
 0x4b4   : > { %v2155_v60 = vpop.xlane.xlu0 %2154 }
 0x4b5   : > { %v6549_v31 = vsub.f32 %v6355_v58, %v2244_v17  ;;  %v2245_v53 = vmul.f32 0.015625, %v2155_v60  ;;  %v2307_v22 = vmul.f32 %v6546_v9, %v6546_v9 }
 0x4b6   : > { %v2158_v12 = vpop.xlane.xlu1 %2157 }
 0x4b7   : > { %v6554_v7 = vsub.f32 %v6352_v19, %v2245_v53  ;;  %v2246_v36 = vmul.f32 0.015625, %v2158_v12  ;;  %v2339_v28 = vsel %vm827_vm1, %v2307_v22, 0.0  ;;  %v2308_v27 = vmul.f32 %v6549_v31, %v6549_v31 }
 0x4b8   : > { %2340 = vadd.xlane.f32.xlu0 %v2339_v28  ;;  %v2161_v42 = vpop.xlane.xlu0 %2160 }
 0x4b9   : > { %v6560_v1 = vsub.f32 %v6360_v45, %v2246_v36  ;;  %v2247_v63 = vmul.f32 0.015625, %v2161_v42  ;;  %v2342_v25 = vsel %vm827_vm1, %v2308_v27, 0.0  ;;  %v2309_v21 = vmul.f32 %v6554_v7, %v6554_v7 }
 0x4ba   : > { %v2164_v48 = vpop.xlane.xlu1 %2163  ;;  %2343 = vadd.xlane.f32.xlu1 %v2342_v25 }
 0x4bb   : > { %v6566_v8 = vsub.f32 %v6369_v37, %v2247_v63  ;;  %v2248_v6 = vmul.f32 0.015625, %v2164_v48  ;;  %v2345_v61 = vsel %vm827_vm1, %v2309_v21, 0.0  ;;  %v2310_v3 = vmul.f32 %v6560_v1, %v6560_v1 }
 0x4bc   : > { %2346 = vadd.xlane.f32.xlu0 %v2345_v61  ;;  %v2167_v52 = vpop.xlane.xlu0 %2166 }
 0x4bd   : > { %v6572_v56 = vsub.f32 %v6379_v38, %v2248_v6  ;;  %v2249_v49 = vmul.f32 0.015625, %v2167_v52  ;;  %v2348_v47 = vsel %vm827_vm1, %v2310_v3, 0.0  ;;  %v2311_v62 = vmul.f32 %v6566_v8, %v6566_v8 }
 0x4be   : > { %v2170_v46 = vpop.xlane.xlu1 %2169  ;;  %2349 = vadd.xlane.f32.xlu1 %v2348_v47 }
 0x4bf   : > { %v6578_v16 = vsub.f32 %v6376_v34, %v2249_v49  ;;  %v2250_v43 = vmul.f32 0.015625, %v2170_v46  ;;  %v2351_v57 = vsel %vm827_vm1, %v2311_v62, 0.0  ;;  %v2312_v50 = vmul.f32 %v6572_v56, %v6572_v56 }
 0x4c0   : > { %2352 = vadd.xlane.f32.xlu0 %v2351_v57 }
 0x4c1   : > { %v6584_v35 = vsub.f32 %v6384_v51, %v2250_v43  ;;  %v2354_v17 = vsel %vm827_vm1, %v2312_v50, 0.0  ;;  %v2313_v60 = vmul.f32 %v6578_v16, %v6578_v16 }
 0x4c2   : > { %2355 = vadd.xlane.f32.xlu1 %v2354_v17 }
 0x4c3   : > { %v2357_v53 = vsel %vm827_vm1, %v2313_v60, 0.0  ;;  %v2314_v22 = vmul.f32 %v6584_v35, %v6584_v35 }
 0x4c4   : > { %2358 = vadd.xlane.f32.xlu0 %v2357_v53 }
 0x4c5   : > { %v2360_v12 = vsel %vm827_vm1, %v2314_v22, 0.0 }
 0x4c6   : > { %2361 = vadd.xlane.f32.xlu1 %v2360_v12 }
 0x4cb   : > { %v2173_v36 = vpop.xlane.xlu0 %2172 }
 0x4cc   : > { %v2251_v28 = vmul.f32 0.015625, %v2173_v36 }
 0x4cd   : > { %v2176_v27 = vpop.xlane.xlu1 %2175 }
 0x4ce   : > { %v6594_v42 = vsub.f32 %v6395_v39, %v2251_v28  ;;  %v2252_v63 = vmul.f32 0.015625, %v2176_v27 }
 0x4cf   : > { %v2179_v25 = vpop.xlane.xlu0 %2178 }
 0x4d0   : > { %v6597_v21 = vsub.f32 %v6403_v24, %v2252_v63  ;;  %v2253_v48 = vmul.f32 0.015625, %v2179_v25  ;;  %v2315_v6 = vmul.f32 %v6594_v42, %v6594_v42 }
 0x4d1   : > { %v2182_v61 = vpop.xlane.xlu1 %2181 }
 0x4d2   : > { %v6602_v3 = vsub.f32 %v6400_v59, %v2253_v48  ;;  %v2254_v52 = vmul.f32 0.015625, %v2182_v61  ;;  %v2363_v49 = vsel %vm827_vm1, %v2315_v6, 0.0  ;;  %v2316_v47 = vmul.f32 %v6597_v21, %v6597_v21 }
 0x4d3   : > { %2364 = vadd.xlane.f32.xlu0 %v2363_v49 }
 0x4d4   : > { %v6608_v62 = vsub.f32 %v6408_v26, %v2254_v52  ;;  %v2366_v46 = vsel %vm827_vm1, %v2316_v47, 0.0  ;;  %v2317_v43 = vmul.f32 %v6602_v3, %v6602_v3 }
 0x4d5   : > { %2367 = vadd.xlane.f32.xlu1 %v2366_v46  ;;  %v4847_v46 = vld [vmem:[%s7760_s2 + $0x38] sm:$0xff]  }
 0x4d6   : > { %v2369_v57 = vsel %vm827_vm1, %v2317_v43, 0.0  ;;  %v2318_v50 = vmul.f32 %v6608_v62, %v6608_v62  ;;  %4700 = vmatprep.subr.bf16.mxu1 %v4847_v46 }
 0x4d7   : > { %2370 = vadd.xlane.f32.xlu0 %v2369_v57  ;;  %4701 = vmatpush3.bf16.msra.mxu1 %v4847_v46 }
 0x4d8   : > { %v2372_v17 = vsel %vm827_vm1, %v2318_v50, 0.0 }
 0x4d9   : > { %v2185_v60 = vpop.xlane.xlu0 %2184  ;;  %2373 = vadd.xlane.f32.xlu1 %v2372_v17 }
 0x4da   : > { %v2255_v53 = vmul.f32 0.015625, %v2185_v60 }
 0x4db   : > { %v2188_v22 = vpop.xlane.xlu1 %2187 }
 0x4dc   : > { %v6618_v12 = vsub.f32 %v6419_v29, %v2255_v53  ;;  %v2256_v36 = vmul.f32 0.015625, %v2188_v22 }
 0x4dd   : > { %v2191_v28 = vpop.xlane.xlu0 %2190 }
 0x4de   : > { %v6621_v27 = vsub.f32 %v6427_v20, %v2256_v36  ;;  %v2257_v63 = vmul.f32 0.015625, %v2191_v28  ;;  %v2319_v25 = vmul.f32 %v6618_v12, %v6618_v12 }
 0x4df   : > { %v2194_v48 = vpop.xlane.xlu1 %2193 }
 0x4e0   : > { %v6626_v6 = vsub.f32 %v6424_v4, %v2257_v63  ;;  %v2258_v61 = vmul.f32 0.015625, %v2194_v48  ;;  %v2375_v52 = vsel %vm827_vm1, %v2319_v25, 0.0  ;;  %v2320_v49 = vmul.f32 %v6621_v27, %v6621_v27 }
 0x4e1   : > { %2376 = vadd.xlane.f32.xlu0 %v2375_v52  ;;  %v2197_v47 = vpop.xlane.xlu0 %2196 }
 0x4e2   : > { %v6635_v43 = vsub.f32 %v6432_v32, %v2258_v61  ;;  %v2259_v57 = vmul.f32 0.015625, %v2197_v47  ;;  %v2378_v50 = vsel %vm827_vm1, %v2320_v49, 0.0  ;;  %v2321_v17 = vmul.f32 %v6626_v6, %v6626_v6 }
 0x4e3   : > { %v2200_v60 = vpop.xlane.xlu1 %2199  ;;  %2379 = vadd.xlane.f32.xlu1 %v2378_v50 }
 0x4e4   : > { %v6641_v53 = vsub.f32 %v6441_v30, %v2259_v57  ;;  %v2260_v22 = vmul.f32 0.015625, %v2200_v60  ;;  %v2381_v36 = vsel %vm827_vm1, %v2321_v17, 0.0  ;;  %v2322_v28 = vmul.f32 %v6635_v43, %v6635_v43 }
 0x4e5   : > { %2382 = vadd.xlane.f32.xlu0 %v2381_v36  ;;  %v2203_v63 = vpop.xlane.xlu0 %2202 }
 0x4e6   : > { %v6647_v25 = vsub.f32 %v6451_v15, %v2260_v22  ;;  %v2261_v48 = vmul.f32 0.015625, %v2203_v63  ;;  %v2384_v61 = vsel %vm827_vm1, %v2322_v28, 0.0  ;;  %v2323_v52 = vmul.f32 %v6641_v53, %v6641_v53 }
 0x4e7   : > { %v2206_v49 = vpop.xlane.xlu1 %2205  ;;  %2385 = vadd.xlane.f32.xlu1 %v2384_v61 }
 0x4e8   : > { %v6653_v47 = vsub.f32 %v6448_v23, %v2261_v48  ;;  %v2262_v57 = vmul.f32 0.015625, %v2206_v49  ;;  %v2387_v50 = vsel %vm827_vm1, %v2323_v52, 0.0  ;;  %v2324_v46 = vmul.f32 %v6647_v25, %v6647_v25 }
 0x4e9   : > { %2388 = vadd.xlane.f32.xlu0 %v2387_v50  ;;  %v2209_v17 = vpop.xlane.xlu0 %2208 }
 0x4ea   : > { %v6659_v60 = vsub.f32 %v6456_v11, %v2262_v57  ;;  %v2263_v22 = vmul.f32 0.015625, %v2209_v17  ;;  %v2390_v36 = vsel %vm827_vm1, %v2324_v46, 0.0  ;;  %v2325_v28 = vmul.f32 %v6653_v47, %v6653_v47 }
 0x4eb   : > { %v2212_v63 = vpop.xlane.xlu1 %2211  ;;  %2391 = vadd.xlane.f32.xlu1 %v2390_v36 }
 0x4ec   : > { %v6665_v48 = vsub.f32 %v6465_v10, %v2263_v22  ;;  %v2264_v61 = vmul.f32 0.015625, %v2212_v63  ;;  %v2393_v52 = vsel %vm827_vm1, %v2325_v28, 0.0  ;;  %v2326_v49 = vmul.f32 %v6659_v60, %v6659_v60 }
 0x4ed   : > { %2394 = vadd.xlane.f32.xlu0 %v2393_v52  ;;  %v2215_v57 = vpop.xlane.xlu0 %2214 }
 0x4ee   : > { %v6671_v50 = vsub.f32 %v6475_v18, %v2264_v61  ;;  %v2265_v46 = vmul.f32 0.015625, %v2215_v57  ;;  %v2396_v17 = vsel %vm827_vm1, %v2326_v49, 0.0  ;;  %v2327_v36 = vmul.f32 %v6665_v48, %v6665_v48 }
 0x4ef   : > { %v2218_v11 = vpop.xlane.xlu1 %2217  ;;  %2397 = vadd.xlane.f32.xlu1 %v2396_v17 }
 0x4f0   : > { %v6677_v22 = vsub.f32 %v6472_v14, %v2265_v46  ;;  %v2266_v28 = vmul.f32 0.015625, %v2218_v11  ;;  %v2399_v63 = vsel %vm827_vm1, %v2327_v36, 0.0  ;;  %v2328_v52 = vmul.f32 %v6671_v50, %v6671_v50 }
 0x4f1   : > { %2400 = vadd.xlane.f32.xlu0 %v2399_v63  ;;  %v2221_v61 = vpop.xlane.xlu0 %2220 }
 0x4f2   : > { %v6683_v57 = vsub.f32 %v6480_v13, %v2266_v28  ;;  %v2267_v49 = vmul.f32 0.015625, %v2221_v61  ;;  %v2402_v18 = vsel %vm827_vm1, %v2328_v52, 0.0  ;;  %v2329_v17 = vmul.f32 %v6677_v22, %v6677_v22 }
 0x4f3   : > { %v2224_v10 = vpop.xlane.xlu1 %2223  ;;  %2403 = vadd.xlane.f32.xlu1 %v2402_v18 }
 0x4f4   : > { %v6689_v11 = vsub.f32 %v6489_v54, %v2267_v49  ;;  %v2268_v46 = vmul.f32 0.015625, %v2224_v10  ;;  %v2405_v36 = vsel %vm827_vm1, %v2329_v17, 0.0  ;;  %v2330_v63 = vmul.f32 %v6683_v57, %v6683_v57 }
 0x4f5   : > { %2406 = vadd.xlane.f32.xlu0 %v2405_v36  ;;  %v2227_v28 = vpop.xlane.xlu0 %2226 }
 0x4f6   : > { %v6695_v61 = vsub.f32 %v6499_v0, %v2268_v46  ;;  %v2269_v52 = vmul.f32 0.015625, %v2227_v28  ;;  %v2408_v13 = vsel %vm827_vm1, %v2330_v63, 0.0  ;;  %v2331_v18 = vmul.f32 %v6689_v11, %v6689_v11 }
 0x4f7   : > { %v2230_v14 = vpop.xlane.xlu1 %2229  ;;  %2409 = vadd.xlane.f32.xlu1 %v2408_v13 }
 0x4f8   : > { %v6701_v10 = vsub.f32 %v6496_v41, %v2269_v52  ;;  %v2270_v49 = vmul.f32 0.015625, %v2230_v14  ;;  %v2411_v17 = vsel %vm827_vm1, %v2331_v18, 0.0  ;;  %v2332_v36 = vmul.f32 %v6695_v61, %v6695_v61 }
 0x4f9   : > { %2412 = vadd.xlane.f32.xlu0 %v2411_v17  ;;  %v2233_v46 = vpop.xlane.xlu0 %2232 }
 0x4fa   : > { %v6707_v28 = vsub.f32 %v6504_v40, %v2270_v49  ;;  %v2271_v63 = vmul.f32 0.015625, %v2233_v46  ;;  %v2414_v0 = vsel %vm827_vm1, %v2332_v36, 0.0  ;;  %v2333_v13 = vmul.f32 %v6701_v10, %v6701_v10 }
 0x4fb   : > { %2415 = vadd.xlane.f32.xlu1 %v2414_v0  ;;  %v2236_v52 = vpop.xlane.xlu1 %2235 }
 0x4fc   : > { %v6713_v14 = vsub.f32 %v6513_v44, %v2271_v63  ;;  %v2272_v18 = vmul.f32 0.015625, %v2236_v52  ;;  %v2417_v41 = vsel %vm827_vm1, %v2333_v13, 0.0  ;;  %v2334_v17 = vmul.f32 %v6707_v28, %v6707_v28 }
 0x4fd   : > { %2418 = vadd.xlane.f32.xlu0 %v2417_v41  ;;  %v2239_v49 = vpop.xlane.xlu0 %2238 }
 0x4fe   : > { %v6719_v46 = vsub.f32 %v6523_v5, %v2272_v18  ;;  %v2273_v36 = vmul.f32 0.015625, %v2239_v49  ;;  %v2420_v40 = vsel %vm827_vm1, %v2334_v17, 0.0  ;;  %v2335_v0 = vmul.f32 %v6713_v14, %v6713_v14 }
 0x4ff   : > { %2421 = vadd.xlane.f32.xlu1 %v2420_v40  ;;  %v2242_v63 = vpop.xlane.xlu1 %2241 }
 0x500   : > { %v6725_v52 = vsub.f32 %v6520_v2, %v2273_v36  ;;  %v2274_v13 = vmul.f32 0.015625, %v2242_v63  ;;  %v2423_v44 = vsel %vm827_vm1, %v2335_v0, 0.0  ;;  %v2336_v41 = vmul.f32 %v6719_v46, %v6719_v46  ;;  %v4849_v63 = vld [vmem:[%s7761_s3 + $0x48] sm:$0xff]  }
 0x501   : > { %2424 = vadd.xlane.f32.xlu0 %v2423_v44  ;;  %v4848_v44 = vld [vmem:[%s7761_s3 + $0x40] sm:$0xff]  }
 0x502   : > { %v6731_v18 = vsub.f32 %v6528_v33, %v2274_v13  ;;  %v2426_v17 = vsel %vm827_vm1, %v2336_v41, 0.0  ;;  %v2337_v49 = vmul.f32 %v6725_v52, %v6725_v52  ;;  %4734 = vmatprep.subr.bf16.mxu0 %v4848_v44  ;;  %v4850_v13 = vld [vmem:[%s7761_s3 + $0x50] sm:$0xff]   ;;  %v4851_v41 = vld [vmem:[%s7761_s3 + $0x58] sm:$0xff]  }
 0x503   : > { %2427 = vadd.xlane.f32.xlu1 %v2426_v17  ;;  %4735 = vmatpush3.bf16.msra.mxu0 %v4848_v44 }
 0x504   : > { %v2429_v40 = vsel %vm827_vm1, %v2337_v49, 0.0  ;;  %v2338_v36 = vmul.f32 %v6731_v18, %v6731_v18  ;;  %4736 = vmatprep.subr.bf16.mxu0 %v4849_v63 }
 0x505   : > { %2430 = vadd.xlane.f32.xlu0 %v2429_v40 }
 0x506   : > { %v2432_v0 = vsel %vm827_vm1, %v2338_v36, 0.0 }
 0x507   : > { %2433 = vadd.xlane.f32.xlu1 %v2432_v0  ;;  %4737 = vmatpush3.bf16.msra.mxu0 %v4849_v63 }
 0x508   : > { %4738 = vmatprep.subr.bf16.mxu0 %v4850_v13 }
 0x50b   : > { %4739 = vmatpush3.bf16.msra.mxu0 %v4850_v13 }
 0x50c   : > { %4740 = vmatprep.subr.bf16.mxu0 %v4851_v41 }
 0x50f   : > { %4741 = vmatpush3.bf16.msra.mxu0 %v4851_v41 }
 0x545   : > { %v2341_v17 = vpop.xlane.xlu0 %2340 }
 0x546   : > { %v2435_v49 = vmul.f32 0.015625, %v2341_v17 }
 0x547   : > { %v2344_v40 = vpop.xlane.xlu1 %2343 }
 0x548   : > { %v2467_v36 = vadd.f32 1e-05, %v2435_v49  ;;  %v2436_v0 = vmul.f32 0.015625, %v2344_v40 }
 0x549   : > { %v2347_v44 = vpop.xlane.xlu0 %2346 }
 0x54a   : > { %5052 = vrsqrt.f32 %v2467_v36  ;;  %v2468_v33 = vadd.f32 1e-05, %v2436_v0  ;;  %v2437_v5 = vmul.f32 0.015625, %v2347_v44  ;;  %v6763_v44 = vld [vmem:[%s7763_s5 + $0x9] ss:$0 sm:$0xff] }
 0x54b   : > { %v2350_v2 = vpop.xlane.xlu1 %2349 }
 0x54c   : > { %5054 = vrsqrt.f32 %v2468_v33  ;;  %v2469_v63 = vadd.f32 1e-05, %v2437_v5  ;;  %v2438_v54 = vmul.f32 0.015625, %v2350_v2  ;;  %v6755_v33 = vld [vmem:[%s7763_s5 + $0x8] ss:$0 sm:$0xff] }
 0x54d   : > { %v2353_v15 = vpop.xlane.xlu0 %2352 }
 0x54e   : > { %5056 = vrsqrt.f32 %v2469_v63  ;;  %v2470_v23 = vadd.f32 1e-05, %v2438_v54  ;;  %v2439_v30 = vmul.f32 0.015625, %v2353_v15 }
 0x54f   : > { %v2356_v13 = vpop.xlane.xlu1 %2355 }
 0x550   : > { %5058 = vrsqrt.f32 %v2470_v23  ;;  %v2471_v41 = vadd.f32 1e-05, %v2439_v30  ;;  %v2440_v32 = vmul.f32 0.015625, %v2356_v13 }
 0x551   : > { %v2359_v17 = vpop.xlane.xlu0 %2358 }
 0x552   : > { %5060 = vrsqrt.f32 %v2471_v41  ;;  %v2472_v49 = vadd.f32 1e-05, %v2440_v32  ;;  %v2441_v40 = vmul.f32 0.015625, %v2359_v17 }
 0x553   : > { %v2362_v20 = vpop.xlane.xlu1 %2361 }
 0x554   : > { %v5053_v36 = vpop.eup %5052  ;;  %5062 = vrsqrt.f32 %v2472_v49  ;;  %v2473_v2 = vadd.f32 1e-05, %v2441_v40  ;;  %v2442_v5 = vmul.f32 0.015625, %v2362_v20 }
 0x555   : > { %v2531_v15 = vmul.f32 %v5053_v36, %v6546_v9 }
 0x556   : > { %v5055_v54 = vpop.eup %5054  ;;  %5064 = vrsqrt.f32 %v2473_v2  ;;  %v2474_v30 = vadd.f32 1e-05, %v2442_v5 }
 0x557   : > { %v2532_v23 = vmul.f32 %v5055_v54, %v6549_v31  ;;  %v2567_v32 = vmul.f32 %v6755_v33, %v2531_v15 }
 0x558   : > { %v5057_v0 = vpop.eup %5056  ;;  %5066 = vrsqrt.f32 %v2474_v30 }
 0x559   : > { %v2533_v63 = vmul.f32 %v5057_v0, %v6554_v7  ;;  %v2568_v20 = vmul.f32 %v6755_v33, %v2532_v23  ;;  %v2603_v31 = vadd.f32 %v6763_v44, %v2567_v32 }
 0x55a   : > { %v5059_v13 = vpop.eup %5058 }
 0x55b   : > { %v2569_v9 = vmul.f32 %v6755_v33, %v2533_v63  ;;  %v2534_v41 = vmul.f32 %v5059_v13, %v6560_v1  ;;  %v2604_v17 = vadd.f32 %v6763_v44, %v2568_v20 }
 0x55c   : > { %v5061_v49 = vpop.eup %5060 }
 0x55d   : > { %v2570_v40 = vmul.f32 %v6755_v33, %v2534_v41  ;;  %v2535_v36 = vmul.f32 %v5061_v49, %v6566_v8  ;;  %v2635_v2 = vpack.c.bf16 %v2604_v17, %v2603_v31  ;;  %v2605_v7 = vadd.f32 %v6763_v44, %v2569_v9 }
 0x55e   : > { %v5063_v5 = vpop.eup %5062 }
 0x55f   : > { %v2606_v15 = vadd.f32 %v6763_v44, %v2570_v40  ;;  %v2536_v54 = vmul.f32 %v5063_v5, %v6572_v56  ;;  %4702 = vmatprep.mubr.msk.bf16.mxu1 %vm827_vm1, %v2635_v2  ;;  %v2571_v1 = vmul.f32 %v6755_v33, %v2535_v36 }
 0x560   : > { %v5065_v30 = vpop.eup %5064  ;;  %v2365_v23 = vpop.xlane.xlu0 %2364 }
 0x561   : > { %v2537_v32 = vmul.f32 %v5065_v30, %v6578_v16  ;;  %v2443_v0 = vmul.f32 0.015625, %v2365_v23  ;;  %v2636_v63 = vpack.c.bf16 %v2606_v15, %v2605_v7  ;;  %v2572_v8 = vmul.f32 %v6755_v33, %v2536_v54 }
 0x562   : > { %v5067_v20 = vpop.eup %5066  ;;  %v2368_v13 = vpop.xlane.xlu1 %2367  ;;  %v2607_v9 = vadd.f32 %v6763_v44, %v2571_v1 }
 0x563   : > { %v2538_v41 = vmul.f32 %v5067_v20, %v6584_v35  ;;  %v2475_v31 = vadd.f32 1e-05, %v2443_v0  ;;  %v2444_v56 = vmul.f32 0.015625, %v2368_v13  ;;  %4703 = vmatmul.mubr.msk.bf16.vlgmr.msra.gmra.mrb[32].mxu1 %vm827_vm1, %v2636_v63  ;;  %v2608_v17 = vadd.f32 %v6763_v44, %v2572_v8 }
 0x564   : > { %v2371_v49 = vpop.xlane.xlu0 %2370  ;;  %v2573_v40 = vmul.f32 %v6755_v33, %v2537_v32 }
 0x565   : > { %5068 = vrsqrt.f32 %v2475_v31  ;;  %v2476_v16 = vadd.f32 1e-05, %v2444_v56  ;;  %v2445_v36 = vmul.f32 0.015625, %v2371_v49  ;;  %v2637_v2 = vpack.c.bf16 %v2608_v17, %v2607_v9 }
 0x566   : > { %v2374_v5 = vpop.xlane.xlu1 %2373  ;;  %v2574_v7 = vmul.f32 %v6755_v33, %v2538_v41  ;;  %v2609_v35 = vadd.f32 %v6763_v44, %v2573_v40 }
 0x567   : > { %5070 = vrsqrt.f32 %v2476_v16  ;;  %v2477_v15 = vadd.f32 1e-05, %v2445_v36  ;;  %v2446_v54 = vmul.f32 0.015625, %v2374_v5  ;;  %4706 = vmatprep.mubr.msk.bf16.mxu1 %vm827_vm1, %v2637_v2 }
 0x568   : > { %v2610_v1 = vadd.f32 %v6763_v44, %v2574_v7 }
 0x569   : > { %5072 = vrsqrt.f32 %v2477_v15  ;;  %v2478_v30 = vadd.f32 1e-05, %v2446_v54 }
 0x56a   : > { %v2638_v23 = vpack.c.bf16 %v2610_v1, %v2609_v35 }
 0x56b   : > { %5074 = vrsqrt.f32 %v2478_v30 }
 0x56c   : > { %4707 = vmatmul.mubr.msk.bf16.gmra.mrb[36].mxu1 %vm827_vm1, %v2638_v23 }
 0x56e   : > { %v2377_v32 = vpop.xlane.xlu0 %2376 }
 0x56f   : > { %v5069_v0 = vpop.eup %5068  ;;  %v2447_v63 = vmul.f32 0.015625, %v2377_v32 }
 0x570   : > { %v2539_v8 = vmul.f32 %v5069_v0, %v6594_v42  ;;  %v2380_v20 = vpop.xlane.xlu1 %2379 }
 0x571   : > { %v5071_v13 = vpop.eup %5070  ;;  %v2479_v9 = vadd.f32 1e-05, %v2447_v63  ;;  %v2448_v41 = vmul.f32 0.015625, %v2380_v20 }
 0x572   : > { %v2540_v31 = vmul.f32 %v5071_v13, %v6597_v21  ;;  %v2383_v56 = vpop.xlane.xlu0 %2382  ;;  %v2575_v17 = vmul.f32 %v6755_v33, %v2539_v8 }
 0x573   : > { %v5073_v49 = vpop.eup %5072  ;;  %5076 = vrsqrt.f32 %v2479_v9  ;;  %v2480_v40 = vadd.f32 1e-05, %v2448_v41  ;;  %v2449_v16 = vmul.f32 0.015625, %v2383_v56 }
 0x574   : > { %v2541_v36 = vmul.f32 %v5073_v49, %v6602_v3  ;;  %v2386_v2 = vpop.xlane.xlu1 %2385  ;;  %v2576_v5 = vmul.f32 %v6755_v33, %v2540_v31  ;;  %v2611_v21 = vadd.f32 %v6763_v44, %v2575_v17 }
 0x575   : > { %v5075_v7 = vpop.eup %5074  ;;  %5078 = vrsqrt.f32 %v2480_v40  ;;  %v2481_v42 = vadd.f32 1e-05, %v2449_v16  ;;  %v2450_v15 = vmul.f32 0.015625, %v2386_v2 }
 0x576   : > { %v2542_v54 = vmul.f32 %v5075_v7, %v6608_v62  ;;  %v2389_v35 = vpop.xlane.xlu0 %2388  ;;  %v2612_v1 = vadd.f32 %v6763_v44, %v2576_v5  ;;  %v2577_v30 = vmul.f32 %v6755_v33, %v2541_v36 }
 0x577   : > { %5080 = vrsqrt.f32 %v2481_v42  ;;  %v2482_v23 = vadd.f32 1e-05, %v2450_v15  ;;  %v2451_v32 = vmul.f32 0.015625, %v2389_v35 }
 0x578   : > { %v2392_v3 = vpop.xlane.xlu1 %2391  ;;  %v2639_v0 = vpack.c.bf16 %v2612_v1, %v2611_v21  ;;  %v2578_v63 = vmul.f32 %v6755_v33, %v2542_v54  ;;  %v2613_v62 = vadd.f32 %v6763_v44, %v2577_v30 }
 0x579   : > { %5082 = vrsqrt.f32 %v2482_v23  ;;  %v2483_v8 = vadd.f32 1e-05, %v2451_v32  ;;  %v2452_v20 = vmul.f32 0.015625, %v2392_v3 }
 0x57a   : > { %v2395_v13 = vpop.xlane.xlu0 %2394  ;;  %4710 = vmatprep.mubr.msk.bf16.mxu1 %vm827_vm1, %v2639_v0  ;;  %v2614_v9 = vadd.f32 %v6763_v44, %v2578_v63 }
 0x57b   : > { %5084 = vrsqrt.f32 %v2483_v8  ;;  %v2484_v41 = vadd.f32 1e-05, %v2452_v20  ;;  %v2453_v31 = vmul.f32 0.015625, %v2395_v13 }
 0x57c   : > { %v2398_v56 = vpop.xlane.xlu1 %2397  ;;  %v2640_v17 = vpack.c.bf16 %v2614_v9, %v2613_v62 }
 0x57d   : > { %v5077_v49 = vpop.eup %5076  ;;  %5086 = vrsqrt.f32 %v2484_v41  ;;  %v2485_v40 = vadd.f32 1e-05, %v2453_v31  ;;  %v2454_v16 = vmul.f32 0.015625, %v2398_v56 }
 0x57e   : > { %v2543_v36 = vmul.f32 %v5077_v49, %v6618_v12  ;;  %v2401_v2 = vpop.xlane.xlu0 %2400  ;;  %4711 = vmatmul.mubr.msk.bf16.gmra.mrb[40].mxu1 %vm827_vm1, %v2640_v17 }
 0x57f   : > { %v5079_v5 = vpop.eup %5078  ;;  %5088 = vrsqrt.f32 %v2485_v40  ;;  %v2486_v7 = vadd.f32 1e-05, %v2454_v16  ;;  %v2455_v42 = vmul.f32 0.015625, %v2401_v2 }
 0x580   : > { %v2544_v15 = vmul.f32 %v5079_v5, %v6621_v27  ;;  %v2404_v54 = vpop.xlane.xlu1 %2403  ;;  %v2579_v35 = vmul.f32 %v6755_v33, %v2543_v36 }
 0x581   : > { %v5081_v21 = vpop.eup %5080  ;;  %5090 = vrsqrt.f32 %v2486_v7  ;;  %v2487_v1 = vadd.f32 1e-05, %v2455_v42  ;;  %v2456_v30 = vmul.f32 0.015625, %v2404_v54 }
 0x582   : > { %v2545_v23 = vmul.f32 %v5081_v21, %v6626_v6  ;;  %v2407_v32 = vpop.xlane.xlu0 %2406  ;;  %v2580_v12 = vmul.f32 %v6755_v33, %v2544_v15  ;;  %v2615_v27 = vadd.f32 %v6763_v44, %v2579_v35 }
 0x583   : > { %v5083_v3 = vpop.eup %5082  ;;  %5092 = vrsqrt.f32 %v2487_v1  ;;  %v2488_v0 = vadd.f32 1e-05, %v2456_v30  ;;  %v2457_v63 = vmul.f32 0.015625, %v2407_v32 }
 0x584   : > { %v2546_v8 = vmul.f32 %v5083_v3, %v6635_v43  ;;  %v2410_v20 = vpop.xlane.xlu1 %2409  ;;  %v2616_v13 = vadd.f32 %v6763_v44, %v2580_v12  ;;  %v2581_v62 = vmul.f32 %v6755_v33, %v2545_v23 }
 0x585   : > { %v5085_v9 = vpop.eup %5084  ;;  %5094 = vrsqrt.f32 %v2488_v0  ;;  %v2489_v41 = vadd.f32 1e-05, %v2457_v63  ;;  %v2458_v6 = vmul.f32 0.015625, %v2410_v20 }
 0x586   : > { %v2547_v31 = vmul.f32 %v5085_v9, %v6641_v53  ;;  %v2413_v56 = vpop.xlane.xlu0 %2412  ;;  %v2641_v17 = vpack.c.bf16 %v2616_v13, %v2615_v27  ;;  %v2582_v49 = vmul.f32 %v6755_v33, %v2546_v8  ;;  %v2617_v5 = vadd.f32 %v6763_v44, %v2581_v62 }
 0x587   : > { %v5087_v40 = vpop.eup %5086  ;;  %5096 = vrsqrt.f32 %v2489_v41  ;;  %v2490_v43 = vadd.f32 1e-05, %v2458_v6  ;;  %v2459_v16 = vmul.f32 0.015625, %v2413_v56 }
 0x588   : > { %v2548_v36 = vmul.f32 %v5087_v40, %v6647_v25  ;;  %v2416_v2 = vpop.xlane.xlu1 %2415  ;;  %4714 = vmatprep.mubr.msk.bf16.mxu1 %vm827_vm1, %v2641_v17  ;;  %v2618_v7 = vadd.f32 %v6763_v44, %v2582_v49  ;;  %v2583_v42 = vmul.f32 %v6755_v33, %v2547_v31 }
 0x589   : > { %v5089_v53 = vpop.eup %5088  ;;  %5098 = vrsqrt.f32 %v2490_v43  ;;  %v2491_v15 = vadd.f32 1e-05, %v2459_v16  ;;  %v2460_v54 = vmul.f32 0.015625, %v2416_v2 }
 0x58a   : > { %v2549_v35 = vmul.f32 %v5089_v53, %v6653_v47  ;;  %v2419_v21 = vpop.xlane.xlu0 %2418  ;;  %v2642_v1 = vpack.c.bf16 %v2618_v7, %v2617_v5  ;;  %v2584_v30 = vmul.f32 %v6755_v33, %v2548_v36  ;;  %v2619_v0 = vadd.f32 %v6763_v44, %v2583_v42 }
 0x58b   : > { %v5091_v25 = vpop.eup %5090  ;;  %5100 = vrsqrt.f32 %v2491_v15  ;;  %v2492_v23 = vadd.f32 1e-05, %v2460_v54  ;;  %v2461_v32 = vmul.f32 0.015625, %v2419_v21 }
 0x58c   : > { %v2550_v12 = vmul.f32 %v5091_v25, %v6659_v60  ;;  %v2422_v3 = vpop.xlane.xlu1 %2421  ;;  %4715 = vmatmul.mubr.msk.bf16.gmra.mrb[44].mxu1 %vm827_vm1, %v2642_v1  ;;  %v2620_v63 = vadd.f32 %v6763_v44, %v2584_v30  ;;  %v2585_v8 = vmul.f32 %v6755_v33, %v2549_v35 }
 0x58d   : > { %v5093_v47 = vpop.eup %5092  ;;  %5102 = vrsqrt.f32 %v2492_v23  ;;  %v2493_v20 = vadd.f32 1e-05, %v2461_v32  ;;  %v2462_v27 = vmul.f32 0.015625, %v2422_v3 }
 0x58e   : > { %v2551_v13 = vmul.f32 %v5093_v47, %v6665_v48  ;;  %v2425_v62 = vpop.xlane.xlu0 %2424  ;;  %v2643_v9 = vpack.c.bf16 %v2620_v63, %v2619_v0  ;;  %v2586_v41 = vmul.f32 %v6755_v33, %v2550_v12  ;;  %v2621_v49 = vadd.f32 %v6763_v44, %v2585_v8 }
 0x58f   : > { %v5095_v60 = vpop.eup %5094  ;;  %5104 = vrsqrt.f32 %v2493_v20  ;;  %v2494_v6 = vadd.f32 1e-05, %v2462_v27  ;;  %v2463_v31 = vmul.f32 0.015625, %v2425_v62 }
 0x590   : > { %v2552_v56 = vmul.f32 %v5095_v60, %v6671_v50  ;;  %v2428_v17 = vpop.xlane.xlu1 %2427  ;;  %4718 = vmatprep.mubr.msk.bf16.mxu1 %vm827_vm1, %v2643_v9  ;;  %v2622_v40 = vadd.f32 %v6763_v44, %v2586_v41  ;;  %v2587_v43 = vmul.f32 %v6755_v33, %v2551_v13 }
 0x591   : > { %v5097_v48 = vpop.eup %5096  ;;  %5106 = vrsqrt.f32 %v2494_v6  ;;  %v2495_v16 = vadd.f32 1e-05, %v2463_v31  ;;  %v2464_v36 = vmul.f32 0.015625, %v2428_v17 }
 0x592   : > { %v2553_v2 = vmul.f32 %v5097_v48, %v6677_v22  ;;  %v2431_v5 = vpop.xlane.xlu0 %2430  ;;  %v2644_v7 = vpack.c.bf16 %v2622_v40, %v2621_v49  ;;  %v2588_v42 = vmul.f32 %v6755_v33, %v2552_v56  ;;  %v2623_v21 = vadd.f32 %v6763_v44, %v2587_v43 }
 0x593   : > { %v5099_v50 = vpop.eup %5098  ;;  %5108 = vrsqrt.f32 %v2495_v16  ;;  %v2496_v53 = vadd.f32 1e-05, %v2464_v36  ;;  %v2465_v15 = vmul.f32 0.015625, %v2431_v5 }
 0x594   : > { %v2554_v54 = vmul.f32 %v5099_v50, %v6683_v57  ;;  %v2434_v35 = vpop.xlane.xlu1 %2433  ;;  %4719 = vmatmul.mubr.msk.bf16.gmra.mrb[48].mxu1 %vm827_vm1, %v2644_v7  ;;  %v2624_v1 = vadd.f32 %v6763_v44, %v2588_v42  ;;  %v2589_v30 = vmul.f32 %v6755_v33, %v2553_v2 }
 0x595   : > { %v5101_v22 = vpop.eup %5100  ;;  %5110 = vrsqrt.f32 %v2496_v53  ;;  %v2497_v25 = vadd.f32 1e-05, %v2465_v15  ;;  %v2466_v23 = vmul.f32 0.015625, %v2434_v35 }
 0x596   : > { %v2555_v32 = vmul.f32 %v5101_v22, %v6689_v11  ;;  %v2645_v12 = vpack.c.bf16 %v2624_v1, %v2623_v21  ;;  %v2590_v3 = vmul.f32 %v6755_v33, %v2554_v54  ;;  %v2625_v8 = vadd.f32 %v6763_v44, %v2589_v30  ;;  %v4853_v21 = vld [vmem:[%s7761_s3 + $0x68] sm:$0xff]  }
 0x597   : > { %v5103_v0 = vpop.eup %5102  ;;  %5112 = vrsqrt.f32 %v2497_v25  ;;  %v2498_v57 = vadd.f32 1e-05, %v2466_v23  ;;  %v6889_v1 = vld [vmem:[%s7763_s5 + $0xa] ss:$0 sm:$0xff] }
 0x598   : > { %v2556_v63 = vmul.f32 %v5103_v0, %v6695_v61  ;;  %4722 = vmatprep.mubr.msk.bf16.mxu1 %vm827_vm1, %v2645_v12  ;;  %v2626_v47 = vadd.f32 %v6763_v44, %v2590_v3  ;;  %v2591_v20 = vmul.f32 %v6755_v33, %v2555_v32 }
 0x599   : > { %v5105_v27 = vpop.eup %5104  ;;  %5114 = vrsqrt.f32 %v2498_v57 }
 0x59a   : > { %v2557_v11 = vmul.f32 %v5105_v27, %v6701_v10  ;;  %v2646_v13 = vpack.c.bf16 %v2626_v47, %v2625_v8  ;;  %v2592_v62 = vmul.f32 %v6755_v33, %v2556_v63  ;;  %v2627_v61 = vadd.f32 %v6763_v44, %v2591_v20 }
 0x59b   : > { %v5107_v9 = vpop.eup %5106 }
 0x59c   : > { %v2558_v41 = vmul.f32 %v5107_v9, %v6707_v28  ;;  %4723 = vmatmul.mubr.msk.bf16.gmra.mrb[52].mxu1 %vm827_vm1, %v2646_v13  ;;  %v2628_v60 = vadd.f32 %v6763_v44, %v2592_v62  ;;  %v2593_v6 = vmul.f32 %v6755_v33, %v2557_v11 }
 0x59d   : > { %v5109_v31 = vpop.eup %5108 }
 0x59e   : > { %v2559_v56 = vmul.f32 %v5109_v31, %v6713_v14  ;;  %v2647_v17 = vpack.c.bf16 %v2628_v60, %v2627_v61  ;;  %v2594_v10 = vmul.f32 %v6755_v33, %v2558_v41  ;;  %v2629_v28 = vadd.f32 %v6763_v44, %v2593_v6 }
 0x59f   : > { %v5111_v49 = vpop.eup %5110 }
 0x5a0   : > { %v2560_v40 = vmul.f32 %v5111_v49, %v6719_v46  ;;  %4726 = vmatprep.mubr.msk.bf16.mxu1 %vm827_vm1, %v2647_v17  ;;  %v2630_v43 = vadd.f32 %v6763_v44, %v2594_v10  ;;  %v2595_v48 = vmul.f32 %v6755_v33, %v2559_v56 }
 0x5a1   : > { %v5113_v16 = vpop.eup %5112 }
 0x5a2   : > { %v2561_v36 = vmul.f32 %v5113_v16, %v6725_v52  ;;  %v2648_v2 = vpack.c.bf16 %v2630_v43, %v2629_v28  ;;  %v2596_v14 = vmul.f32 %v6755_v33, %v2560_v40  ;;  %v2631_v46 = vadd.f32 %v6763_v44, %v2595_v48 }
 0x5a3   : > { %v5115_v5 = vpop.eup %5114 }
 0x5a4   : > { %v2562_v7 = vmul.f32 %v5115_v5, %v6731_v18  ;;  %4727 = vmatmul.mubr.msk.bf16.gmra.mrb[56].mxu1 %vm827_vm1, %v2648_v2  ;;  %v2632_v42 = vadd.f32 %v6763_v44, %v2596_v14  ;;  %v2597_v50 = vmul.f32 %v6755_v33, %v2561_v36  ;;  %v4852_v18 = vld [vmem:[%s7761_s3 + $0x60] sm:$0xff]  }
 0x5a5   : > { %4742 = vmatprep.subr.bf16.mxu0 %v4852_v18 }
 0x5a6   : > { %v2649_v53 = vpack.c.bf16 %v2632_v42, %v2631_v46  ;;  %v2598_v15 = vmul.f32 %v6755_v33, %v2562_v7  ;;  %v2633_v52 = vadd.f32 %v6763_v44, %v2597_v50  ;;  %4743 = vmatpush3.bf16.msra.mxu0 %v4852_v18  ;;  %v4854_v33 = vld [vmem:[%s7761_s3 + $0x70] sm:$0xff]  }
 0x5a7   : > { %4744 = vmatprep.subr.bf16.mxu0 %v4853_v21 }
 0x5a8   : > { %4730 = vmatprep.mubr.msk.bf16.mxu1 %vm827_vm1, %v2649_v53  ;;  %v2634_v54 = vadd.f32 %v6763_v44, %v2598_v15  ;;  %v4855_v44 = vld [vmem:[%s7761_s3 + $0x78] sm:$0xff]  }
 0x5aa   : > { %v2650_v35 = vpack.c.bf16 %v2634_v54, %v2633_v52  ;;  %4745 = vmatpush3.bf16.msra.mxu0 %v4853_v21 }
 0x5ab   : > { %4746 = vmatprep.subr.bf16.mxu0 %v4854_v33 }
 0x5ac   : > { %4731 = vmatmul.mubr.msk.bf16.gmra.mrb[60].mxu1 %vm827_vm1, %v2650_v35 }
 0x5ae   : > { %4747 = vmatpush3.bf16.msra.mxu0 %v4854_v33 }
 0x5af   : > { %4748 = vmatprep.subr.bf16.mxu0 %v4855_v44 }
 0x5b2   : > { %4749 = vmatpush3.bf16.msra.mxu0 %v4855_v44 }
 0x636   : > { %v4704_v30 = vpop.f32.mrb[32].mxu1 }
 0x637   : > { %v6892_v22 = vadd.f32 %v4704_v30, %v6889_v1  ;;  %v2770_v25 = vpop.f32.mrb[33].mxu1 }
 0x638   : > { %v6895_v23 = vadd.f32 %v6889_v1, %v2770_v25  ;;  %v4705_v32 = vpop.f32.mrb[34].mxu1 }
 0x639   : > { %v2931_v12 = vmul.f32 %v6892_v22, %v6892_v22  ;;  %v6900_v3 = vadd.f32 %v4705_v32, %v6889_v1  ;;  %v2773_v0 = vpop.f32.mrb[35].mxu1 }
 0x63a   : > { %v2929_v57 = vmul.f32 %v6895_v23, %v6895_v23  ;;  %v6905_v63 = vadd.f32 %v6889_v1, %v2773_v0 }
 0x63b   : > { %v2963_v8 = vmul.f32 %v2931_v12, %v6892_v22  ;;  %v2932_v47 = vmul.f32 %v6900_v3, %v6900_v3 }
 0x63c   : > { %v2961_v20 = vmul.f32 %v2929_v57, %v6895_v23  ;;  %v2930_v27 = vmul.f32 %v6905_v63, %v6905_v63 }
 0x63d   : > { %v2995_v11 = vmul.f32 0.044715, %v2963_v8  ;;  %v2964_v13 = vmul.f32 %v2932_v47, %v6900_v3 }
 0x63e   : > { %v2993_v62 = vmul.f32 0.044715, %v2961_v20  ;;  %v2962_v9 = vmul.f32 %v2930_v27, %v6905_v63 }
 0x63f   : > { %v3027_v41 = vadd.f32 %v2995_v11, %v6892_v22  ;;  %v2996_v61 = vmul.f32 0.044715, %v2964_v13  ;;  %v4708_v60 = vpop.f32.mrb[36].mxu1 }
 0x640   : > { %v3025_v6 = vadd.f32 %v2993_v62, %v6895_v23  ;;  %v2994_v31 = vmul.f32 0.044715, %v2962_v9  ;;  %v6918_v56 = vadd.f32 %v4708_v60, %v6889_v1  ;;  %v2786_v17 = vpop.f32.mrb[37].mxu1  ;;  %v2899_v9 = vmul.f32 0.5, %v6892_v22 }
 0x641   : > { %v3059_v10 = vmul.f32 0.7978846, %v3027_v41  ;;  %v3028_v49 = vadd.f32 %v2996_v61, %v6900_v3  ;;  %v6922_v40 = vadd.f32 %v6889_v1, %v2786_v17  ;;  %v4709_v28 = vpop.f32.mrb[38].mxu1  ;;  %v2900_v41 = vmul.f32 0.5, %v6900_v3 }
 0x642   : > { %v3057_v43 = vmul.f32 0.7978846, %v3025_v6  ;;  %v3026_v48 = vadd.f32 %v2994_v31, %v6905_v63  ;;  %v2935_v16 = vmul.f32 %v6918_v56, %v6918_v56  ;;  %v6928_v36 = vadd.f32 %v4709_v28, %v6889_v1  ;;  %v2789_v2 = vpop.f32.mrb[39].mxu1 }
 0x643   : > { %5116 = vtanh.f32 %v3059_v10  ;;  %v3060_v14 = vmul.f32 0.7978846, %v3028_v49  ;;  %v2933_v5 = vmul.f32 %v6922_v40, %v6922_v40  ;;  %v6933_v7 = vadd.f32 %v6889_v1, %v2789_v2 }
 0x644   : > { %5118 = vtanh.f32 %v3057_v43  ;;  %v3058_v46 = vmul.f32 0.7978846, %v3026_v48  ;;  %v2967_v42 = vmul.f32 %v2935_v16, %v6918_v56  ;;  %v2936_v50 = vmul.f32 %v6928_v36, %v6928_v36 }
 0x645   : > { %5120 = vtanh.f32 %v3060_v14  ;;  %v2965_v53 = vmul.f32 %v2933_v5, %v6922_v40  ;;  %v2934_v15 = vmul.f32 %v6933_v7, %v6933_v7  ;;  %v2897_v6 = vmul.f32 0.5, %v6895_v23 }
 0x646   : > { %5122 = vtanh.f32 %v3058_v46  ;;  %v2999_v52 = vmul.f32 0.044715, %v2967_v42  ;;  %v2968_v54 = vmul.f32 %v2936_v50, %v6928_v36  ;;  %v2898_v31 = vmul.f32 0.5, %v6905_v63 }
 0x647   : > { %v2997_v35 = vmul.f32 0.044715, %v2965_v53  ;;  %v2966_v18 = vmul.f32 %v2934_v15, %v6933_v7 }
 0x648   : > { %v3031_v21 = vadd.f32 %v2999_v52, %v6918_v56  ;;  %v3000_v33 = vmul.f32 0.044715, %v2968_v54 }
 0x649   : > { %v3029_v44 = vadd.f32 %v2997_v35, %v6922_v40  ;;  %v2998_v30 = vmul.f32 0.044715, %v2966_v18  ;;  %v2901_v18 = vmul.f32 0.5, %v6922_v40  ;;  %v2902_v40 = vmul.f32 0.5, %v6933_v7 }
 0x64a   : > { %v3063_v25 = vmul.f32 0.7978846, %v3031_v21  ;;  %v3032_v32 = vadd.f32 %v3000_v33, %v6928_v36 }
 0x64b   : > { %v3061_v12 = vmul.f32 0.7978846, %v3029_v44  ;;  %v3030_v0 = vadd.f32 %v2998_v30, %v6933_v7 }
 0x64c   : > { %5124 = vtanh.f32 %v3063_v25  ;;  %v3064_v57 = vmul.f32 0.7978846, %v3032_v32  ;;  %v2903_v32 = vmul.f32 0.5, %v6918_v56 }
 0x64d   : > { %v5117_v8 = vpop.eup %5116  ;;  %5126 = vtanh.f32 %v3061_v12  ;;  %v3062_v47 = vmul.f32 0.7978846, %v3030_v0 }
 0x64e   : > { %v5119_v20 = vpop.eup %5118  ;;  %v3123_v27 = vadd.f32 1.0, %v5117_v8  ;;  %5128 = vtanh.f32 %v3064_v57  ;;  %v2904_v8 = vmul.f32 0.5, %v6928_v36 }
 0x64f   : > { %v5121_v11 = vpop.eup %5120  ;;  %5130 = vtanh.f32 %v3062_v47  ;;  %v3121_v13 = vadd.f32 1.0, %v5119_v20 }
 0x650   : > { %v5123_v62 = vpop.eup %5122  ;;  %v3124_v61 = vadd.f32 1.0, %v5121_v11  ;;  %v3155_v10 = vmul.f32 %v3123_v27, %v2899_v9 }
 0x651   : > { %v4712_v60 = vpop.f32.mrb[40].mxu1  ;;  %v3122_v17 = vadd.f32 1.0, %v5123_v62  ;;  %v3153_v22 = vmul.f32 %v3121_v13, %v2897_v6 }
 0x652   : > { %v3156_v49 = vmul.f32 %v3124_v61, %v2900_v41  ;;  %v6952_v28 = vadd.f32 %v4712_v60, %v6889_v1  ;;  %v2802_v43 = vpop.f32.mrb[41].mxu1 }
 0x653   : > { %v6955_v48 = vadd.f32 %v6889_v1, %v2802_v43  ;;  %v4713_v16 = vpop.f32.mrb[42].mxu1  ;;  %v3154_v2 = vmul.f32 %v3122_v17, %v2898_v31 }
 0x654   : > { %v2939_v3 = vmul.f32 %v6952_v28, %v6952_v28  ;;  %v6960_v23 = vadd.f32 %v4713_v16, %v6889_v1  ;;  %v2805_v63 = vpop.f32.mrb[43].mxu1  ;;  %v3186_v14 = vpack.c.bf16 %v3156_v49, %v3155_v10 }
 0x655   : > { %v2937_v5 = vmul.f32 %v6955_v48, %v6955_v48  ;;  %v6965_v46 = vadd.f32 %v6889_v1, %v2805_v63  ;;  %v3185_v42 = vpack.c.bf16 %v3154_v2, %v3153_v22 }
 0x656   : > { %v5125_v50 = vpop.eup %5124  ;;  %v2971_v53 = vmul.f32 %v2939_v3, %v6952_v28  ;;  %v2940_v15 = vmul.f32 %v6960_v23, %v6960_v23 }
 0x657   : > { %v5127_v52 = vpop.eup %5126  ;;  %v2969_v54 = vmul.f32 %v2937_v5, %v6955_v48  ;;  %v2938_v35 = vmul.f32 %v6965_v46, %v6965_v46  ;;  %4750 = vmatprep.mubr.bf16.mxu0 %v3185_v42  ;;  %v3127_v21 = vadd.f32 1.0, %v5125_v50 }
 0x658   : > { %v5129_v33 = vpop.eup %5128  ;;  %v3003_v44 = vmul.f32 0.044715, %v2971_v53  ;;  %v2972_v30 = vmul.f32 %v2940_v15, %v6960_v23  ;;  %4751 = vmatmul.mubr.bf16.vlgmr.msra.gmra.mrb[64].mxu0 %v3186_v14  ;;  %v3125_v25 = vadd.f32 1.0, %v5127_v52  ;;  %v6990_v52 = vmul.f32 0.5, %v6952_v28 }
 0x659   : > { %v5131_v12 = vpop.eup %5130  ;;  %v3001_v0 = vmul.f32 0.044715, %v2969_v54  ;;  %v2970_v57 = vmul.f32 %v2938_v35, %v6965_v46  ;;  %v3128_v47 = vadd.f32 1.0, %v5129_v33  ;;  %v3159_v9 = vmul.f32 %v3127_v21, %v2903_v32 }
 0x65a   : > { %v3035_v20 = vadd.f32 %v3003_v44, %v6952_v28  ;;  %v3004_v27 = vmul.f32 0.044715, %v2972_v30  ;;  %v3126_v11 = vadd.f32 1.0, %v5131_v12  ;;  %v3157_v56 = vmul.f32 %v3125_v25, %v2901_v18 }
 0x65b   : > { %v3033_v13 = vadd.f32 %v3001_v0, %v6955_v48  ;;  %v3002_v62 = vmul.f32 0.044715, %v2970_v57  ;;  %v3160_v41 = vmul.f32 %v3128_v47, %v2904_v8  ;;  %v2905_v18 = vmul.f32 0.5, %v6955_v48 }
 0x65c   : > { %v3067_v61 = vmul.f32 0.7978846, %v3035_v20  ;;  %v3158_v60 = vmul.f32 %v3126_v11, %v2902_v40  ;;  %v3036_v36 = vadd.f32 %v3004_v27, %v6960_v23  ;;  %v6996_v21 = vmul.f32 0.5, %v6960_v23 }
 0x65d   : > { %v3065_v6 = vmul.f32 0.7978846, %v3033_v13  ;;  %v3034_v31 = vadd.f32 %v3002_v62, %v6965_v46  ;;  %v3188_v17 = vpack.c.bf16 %v3160_v41, %v3159_v9  ;;  %v2906_v30 = vmul.f32 0.5, %v6965_v46 }
 0x65e   : > { %5132 = vtanh.f32 %v3067_v61  ;;  %v3187_v10 = vpack.c.bf16 %v3158_v60, %v3157_v56  ;;  %v3068_v3 = vmul.f32 0.7978846, %v3036_v36 }
 0x65f   : > { %v3066_v49 = vmul.f32 0.7978846, %v3034_v31  ;;  %v4716_v43 = vpop.f32.mrb[44].mxu1  ;;  %5134 = vtanh.f32 %v3065_v6 }
 0x660   : > { %v2827_v7 = vadd.f32 %v4716_v43, %v6889_v1  ;;  %v2818_v16 = vpop.f32.mrb[45].mxu1  ;;  %4754 = vmatprep.mubr.bf16.mxu0 %v3187_v10 }
 0x661   : > { %v2819_v22 = vadd.f32 %v6889_v1, %v2818_v16  ;;  %v4717_v2 = vpop.f32.mrb[46].mxu1  ;;  %4755 = vmatmul.mubr.bf16.gmra.mrb[68].mxu0 %v3188_v17  ;;  %5136 = vtanh.f32 %v3066_v49 }
 0x662   : > { %v2943_v63 = vmul.f32 %v2827_v7, %v2827_v7  ;;  %v2830_v14 = vadd.f32 %v4717_v2, %v6889_v1  ;;  %v2821_v5 = vpop.f32.mrb[47].mxu1  ;;  %5138 = vtanh.f32 %v3068_v3  ;;  %v7002_v0 = vmul.f32 0.5, %v2827_v7 }
 0x663   : > { %v2941_v42 = vmul.f32 %v2819_v22, %v2819_v22  ;;  %v6987_v50 = vadd.f32 %v6889_v1, %v2821_v5  ;;  %v7000_v28 = vmul.f32 0.5, %v2819_v22 }
 0x664   : > { %v2975_v53 = vmul.f32 %v2943_v63, %v2827_v7  ;;  %v2944_v15 = vmul.f32 %v2830_v14, %v2830_v14  ;;  %v7007_v20 = vmul.f32 0.5, %v2830_v14 }
 0x665   : > { %v2973_v54 = vmul.f32 %v2941_v42, %v2819_v22  ;;  %v2942_v35 = vmul.f32 %v6987_v50, %v6987_v50 }
 0x666   : > { %v3007_v33 = vmul.f32 0.044715, %v2975_v53  ;;  %v2976_v44 = vmul.f32 %v2944_v15, %v2830_v14 }
 0x667   : > { %v3005_v25 = vmul.f32 0.044715, %v2973_v54  ;;  %v2974_v32 = vmul.f32 %v2942_v35, %v6987_v50  ;;  %v4720_v12 = vpop.f32.mrb[48].mxu1 }
 0x668   : > { %v5133_v57 = vpop.eup %5132  ;;  %v3039_v8 = vadd.f32 %v3007_v33, %v2827_v7  ;;  %v3008_v47 = vmul.f32 0.044715, %v2976_v44  ;;  %v7005_v48 = vadd.f32 %v4720_v12, %v6889_v1  ;;  %v2834_v23 = vpop.f32.mrb[49].mxu1 }
 0x669   : > { %v3037_v27 = vadd.f32 %v3005_v25, %v2819_v22  ;;  %v3006_v40 = vmul.f32 0.044715, %v2974_v32  ;;  %v7010_v46 = vadd.f32 %v6889_v1, %v2834_v23  ;;  %v4721_v11 = vpop.f32.mrb[50].mxu1  ;;  %v7012_v13 = vadd.f32 1.0, %v5133_v57  ;;  %v5135_v60 = vpop.eup %5134 }
 0x66a   : > { %v3071_v62 = vmul.f32 0.7978846, %v3039_v8  ;;  %v3040_v9 = vadd.f32 %v3008_v47, %v2830_v14  ;;  %v2947_v41 = vmul.f32 %v7005_v48, %v7005_v48  ;;  %v7017_v61 = vadd.f32 %v4721_v11, %v6889_v1  ;;  %v2837_v56 = vpop.f32.mrb[51].mxu1 }
 0x66b   : > { %v3069_v6 = vmul.f32 0.7978846, %v3037_v27  ;;  %v3038_v31 = vadd.f32 %v3006_v40, %v6987_v50  ;;  %v2945_v17 = vmul.f32 %v7010_v46, %v7010_v46  ;;  %v7023_v36 = vadd.f32 %v6889_v1, %v2837_v56  ;;  %v5137_v10 = vpop.eup %5136 }
 0x66c   : > { %5140 = vtanh.f32 %v3071_v62  ;;  %v3072_v49 = vmul.f32 0.7978846, %v3040_v9  ;;  %v2979_v43 = vmul.f32 %v2947_v41, %v7005_v48  ;;  %v2948_v7 = vmul.f32 %v7017_v61, %v7017_v61  ;;  %v5139_v54 = vpop.eup %5138 }
 0x66d   : > { %5142 = vtanh.f32 %v3069_v6  ;;  %v3070_v16 = vmul.f32 0.7978846, %v3038_v31  ;;  %v2977_v22 = vmul.f32 %v2945_v17, %v7010_v46  ;;  %v2946_v2 = vmul.f32 %v7023_v36, %v7023_v36 }
 0x66e   : > { %5144 = vtanh.f32 %v3072_v49  ;;  %v3011_v3 = vmul.f32 0.044715, %v2979_v43  ;;  %v2980_v63 = vmul.f32 %v2948_v7, %v7017_v61  ;;  %v3129_v14 = vadd.f32 1.0, %v5135_v60 }
 0x66f   : > { %5146 = vtanh.f32 %v3070_v16  ;;  %v3009_v5 = vmul.f32 0.044715, %v2977_v22  ;;  %v2978_v42 = vmul.f32 %v2946_v2, %v7023_v36  ;;  %v4724_v53 = vpop.f32.mrb[52].mxu1  ;;  %v3130_v15 = vadd.f32 1.0, %v5137_v10 }
 0x670   : > { %v3043_v35 = vadd.f32 %v3011_v3, %v7005_v48  ;;  %v3012_v33 = vmul.f32 0.044715, %v2980_v63  ;;  %v7035_v44 = vadd.f32 %v4724_v53, %v6889_v1  ;;  %v2850_v25 = vpop.f32.mrb[53].mxu1  ;;  %v3161_v32 = vmul.f32 %v3129_v14, %v2905_v18 }
 0x671   : > { %v3041_v12 = vadd.f32 %v3009_v5, %v7010_v46  ;;  %v3010_v57 = vmul.f32 0.044715, %v2978_v42  ;;  %v7039_v8 = vadd.f32 %v6889_v1, %v2850_v25  ;;  %v4725_v47 = vpop.f32.mrb[54].mxu1  ;;  %v3162_v23 = vmul.f32 %v3130_v15, %v2906_v30 }
 0x672   : > { %v3075_v27 = vmul.f32 0.7978846, %v3043_v35  ;;  %v3044_v40 = vadd.f32 %v3012_v33, %v7017_v61  ;;  %v2951_v11 = vmul.f32 %v7035_v44, %v7035_v44  ;;  %v7045_v62 = vadd.f32 %v4725_v47, %v6889_v1  ;;  %v2853_v9 = vpop.f32.mrb[55].mxu1 }
 0x673   : > { %v3073_v41 = vmul.f32 0.7978846, %v3041_v12  ;;  %v3042_v18 = vadd.f32 %v3010_v57, %v7023_v36  ;;  %v2949_v56 = vmul.f32 %v7039_v8, %v7039_v8  ;;  %v7051_v60 = vadd.f32 %v6889_v1, %v2853_v9 }
 0x674   : > { %5148 = vtanh.f32 %v3075_v27  ;;  %v3076_v30 = vmul.f32 0.7978846, %v3044_v40  ;;  %v2983_v6 = vmul.f32 %v2951_v11, %v7035_v44  ;;  %v2952_v31 = vmul.f32 %v7045_v62, %v7045_v62 }
 0x675   : > { %5150 = vtanh.f32 %v3073_v41  ;;  %v3074_v17 = vmul.f32 0.7978846, %v3042_v18  ;;  %v2981_v10 = vmul.f32 %v2949_v56, %v7039_v8  ;;  %v2950_v49 = vmul.f32 %v7051_v60, %v7051_v60 }
 0x676   : > { %v7059_v43 = vpop.eup %5140  ;;  %5152 = vtanh.f32 %v3076_v30  ;;  %v3015_v7 = vmul.f32 0.044715, %v2983_v6  ;;  %v2984_v16 = vmul.f32 %v2952_v31, %v7045_v62  ;;  %v3189_v22 = vpack.c.bf16 %v3162_v23, %v3161_v32 }
 0x677   : > { %v5143_v2 = vpop.eup %5142  ;;  %5154 = vtanh.f32 %v3074_v17  ;;  %v3013_v3 = vmul.f32 0.044715, %v2981_v10  ;;  %v2982_v63 = vmul.f32 %v2950_v49, %v7051_v60  ;;  %v4728_v14 = vpop.f32.mrb[56].mxu1  ;;  %v3132_v5 = vadd.f32 1.0, %v5139_v54 }
 0x678   : > { %v7063_v42 = vpop.eup %5144  ;;  %v3047_v53 = vadd.f32 %v3015_v7, %v7035_v44  ;;  %v3016_v15 = vmul.f32 0.044715, %v2984_v16  ;;  %v7067_v35 = vadd.f32 %v4728_v14, %v6889_v1  ;;  %v2866_v33 = vpop.f32.mrb[57].mxu1  ;;  %4758 = vmatprep.mubr.bf16.mxu0 %v3189_v22  ;;  %v3163_v25 = vmul.f32 %v7012_v13, %v6990_v52 }
 0x679   : > { %v5147_v32 = vpop.eup %5146  ;;  %v3045_v12 = vadd.f32 %v3013_v3, %v7039_v8  ;;  %v3014_v57 = vmul.f32 0.044715, %v2982_v63  ;;  %v7073_v47 = vadd.f32 %v6889_v1, %v2866_v33  ;;  %v4729_v54 = vpop.f32.mrb[58].mxu1  ;;  %v3164_v23 = vmul.f32 %v3132_v5, %v6996_v21 }
 0x67a   : > { %v3079_v27 = vmul.f32 0.7978846, %v3047_v53  ;;  %v3048_v40 = vadd.f32 %v3016_v15, %v7045_v62  ;;  %v2955_v11 = vmul.f32 %v7067_v35, %v7067_v35  ;;  %v7080_v9 = vadd.f32 %v4729_v54, %v6889_v1  ;;  %v2869_v52 = vpop.f32.mrb[59].mxu1 }
 0x67b   : > { %v3077_v13 = vmul.f32 0.7978846, %v3045_v12  ;;  %v3046_v41 = vadd.f32 %v3014_v57, %v7051_v60  ;;  %v2953_v18 = vmul.f32 %v7073_v47, %v7073_v47  ;;  %v3190_v56 = vpack.c.bf16 %v3164_v23, %v3163_v25 }
 0x67c   : > { %5156 = vtanh.f32 %v3079_v27  ;;  %v2987_v21 = vmul.f32 %v2955_v11, %v7067_v35  ;;  %v2956_v30 = vmul.f32 %v7080_v9, %v7080_v9  ;;  %v2910_v6 = vmul.f32 0.5, %v6987_v50 }
 0x67d   : > { %v3080_v31 = vmul.f32 0.7978846, %v3048_v40  ;;  %v3078_v17 = vmul.f32 0.7978846, %v3046_v41  ;;  %v2985_v10 = vmul.f32 %v2953_v18, %v7073_v47  ;;  %4759 = vmatmul.mubr.bf16.gmra.mrb[72].mxu0 %v3190_v56  ;;  %v7091_v49 = vadd.f32 %v6889_v1, %v2869_v52 }
 0x67e   : > { %v7093_v7 = vpop.eup %5148  ;;  %5158 = vtanh.f32 %v3077_v13  ;;  %v3019_v16 = vmul.f32 0.044715, %v2987_v21  ;;  %v2988_v22 = vmul.f32 %v2956_v30, %v7080_v9  ;;  %v3133_v3 = vadd.f32 1.0, %v5143_v2 }
 0x67f   : > { %v5151_v63 = vpop.eup %5150  ;;  %5160 = vtanh.f32 %v3078_v17  ;;  %v3017_v14 = vmul.f32 0.044715, %v2985_v10  ;;  %v2954_v50 = vmul.f32 %v7091_v49, %v7091_v49  ;;  %v4732_v5 = vpop.f32.mrb[60].mxu1  ;;  %v3134_v53 = vadd.f32 1.0, %v5147_v32 }
 0x680   : > { %v7098_v15 = vpop.eup %5152  ;;  %v3051_v33 = vadd.f32 %v3019_v16, %v7067_v35  ;;  %v3020_v25 = vmul.f32 0.044715, %v2988_v22  ;;  %v7102_v12 = vadd.f32 %v4732_v5, %v6889_v1  ;;  %v2882_v57 = vpop.f32.mrb[61].mxu1  ;;  %v3165_v54 = vmul.f32 %v3133_v3, %v7000_v28 }
 0x681   : > { %v5155_v2 = vpop.eup %5154  ;;  %v3049_v23 = vadd.f32 %v3017_v14, %v7073_v47  ;;  %v2986_v27 = vmul.f32 %v2954_v50, %v7091_v49  ;;  %v7108_v40 = vadd.f32 %v6889_v1, %v2882_v57  ;;  %v3166_v32 = vmul.f32 %v3134_v53, %v2910_v6  ;;  %v4733_v11 = vpop.f32.mrb[62].mxu1 }
 0x682   : > { %v3083_v52 = vmul.f32 0.7978846, %v3051_v33  ;;  %v3052_v13 = vadd.f32 %v3020_v25, %v7080_v9  ;;  %v2959_v41 = vmul.f32 %v7102_v12, %v7102_v12  ;;  %v7114_v18 = vadd.f32 %v4733_v11, %v6889_v1  ;;  %v2885_v28 = vpop.f32.mrb[63].mxu1 }
 0x683   : > { %v3081_v56 = vmul.f32 0.7978846, %v3049_v23  ;;  %v3018_v21 = vmul.f32 0.044715, %v2986_v27  ;;  %v2957_v30 = vmul.f32 %v7108_v40, %v7108_v40  ;;  %v3191_v17 = vpack.c.bf16 %v3166_v32, %v3165_v54 }
 0x684   : > { %5162 = vtanh.f32 %v3080_v31  ;;  %v3084_v10 = vmul.f32 0.7978846, %v3052_v13  ;;  %v2991_v6 = vmul.f32 %v2959_v41, %v7102_v12  ;;  %v2960_v16 = vmul.f32 %v7114_v18, %v7114_v18 }
 0x685   : > { %5164 = vtanh.f32 %v3083_v52  ;;  %v3050_v22 = vadd.f32 %v3018_v21, %v7091_v49  ;;  %v2989_v3 = vmul.f32 %v2957_v30, %v7108_v40  ;;  %4762 = vmatprep.mubr.bf16.mxu0 %v3191_v17  ;;  %v3135_v14 = vadd.f32 1.0, %v7059_v43 }
 0x686   : > { %v5157_v50 = vpop.eup %5156  ;;  %5166 = vtanh.f32 %v3081_v56  ;;  %v3023_v5 = vmul.f32 0.044715, %v2991_v6  ;;  %v2992_v53 = vmul.f32 %v2960_v16, %v7114_v18  ;;  %v3136_v31 = vadd.f32 1.0, %v7063_v42 }
 0x687   : > { %5168 = vtanh.f32 %v3084_v10  ;;  %v3082_v33 = vmul.f32 0.7978846, %v3050_v22  ;;  %v3021_v25 = vmul.f32 0.044715, %v2989_v3  ;;  %v7127_v57 = vadd.f32 %v6889_v1, %v2885_v28 }
 0x688   : > { %v5159_v54 = vpop.eup %5158  ;;  %v3055_v23 = vadd.f32 %v3023_v5, %v7102_v12  ;;  %v3024_v27 = vmul.f32 0.044715, %v2992_v53  ;;  %v3167_v32 = vmul.f32 %v3135_v14, %v7002_v0  ;;  %v3168_v43 = vmul.f32 %v3136_v31, %v7007_v20 }
 0x689   : > { %v5161_v11 = vpop.eup %5160  ;;  %5170 = vtanh.f32 %v3082_v33  ;;  %v3053_v52 = vadd.f32 %v3021_v25, %v7108_v40  ;;  %v2958_v42 = vmul.f32 %v7127_v57, %v7127_v57  ;;  %v2913_v13 = vmul.f32 0.5, %v7010_v46 }
 0x68a   : > { %v3087_v41 = vmul.f32 0.7978846, %v3055_v23  ;;  %v3056_v1 = vadd.f32 %v3024_v27, %v7114_v18  ;;  %v3192_v28 = vpack.c.bf16 %v3168_v43, %v3167_v32  ;;  %v3137_v56 = vadd.f32 1.0, %v5151_v63 }
 0x68b   : > { %v3085_v21 = vmul.f32 0.7978846, %v3053_v52  ;;  %v2990_v30 = vmul.f32 %v2958_v42, %v7127_v57  ;;  %v2914_v0 = vmul.f32 0.5, %v7023_v36  ;;  %v3138_v20 = vadd.f32 1.0, %v5155_v2 }
 0x68c   : > { %5172 = vtanh.f32 %v3087_v41  ;;  %v3088_v17 = vmul.f32 0.7978846, %v3056_v1  ;;  %4763 = vmatmul.mubr.bf16.gmra.mrb[76].mxu0 %v3192_v28  ;;  %v3169_v10 = vmul.f32 %v3137_v56, %v2913_v13  ;;  %v2915_v6 = vmul.f32 0.5, %v7005_v48 }
 0x68d   : > { %5174 = vtanh.f32 %v3085_v21  ;;  %v3022_v16 = vmul.f32 0.044715, %v2990_v30  ;;  %v3170_v46 = vmul.f32 %v3138_v20, %v2914_v0  ;;  %v3139_v22 = vadd.f32 1.0, %v7093_v7 }
 0x68e   : > { %v5163_v3 = vpop.eup %5162  ;;  %5176 = vtanh.f32 %v3088_v17  ;;  %v2916_v63 = vmul.f32 0.5, %v7017_v61  ;;  %v3140_v14 = vadd.f32 1.0, %v7098_v15  ;;  %v2917_v36 = vmul.f32 0.5, %v7039_v8 }
 0x68f   : > { %v5165_v2 = vpop.eup %5164  ;;  %v3054_v5 = vadd.f32 %v3022_v16, %v7127_v57  ;;  %v3193_v53 = vpack.c.bf16 %v3170_v46, %v3169_v10  ;;  %v2918_v31 = vmul.f32 0.5, %v7051_v60  ;;  %v3141_v48 = vadd.f32 1.0, %v5159_v54 }
 0x690   : > { %v5167_v33 = vpop.eup %5166  ;;  %v3171_v25 = vmul.f32 %v3139_v22, %v2915_v6  ;;  %v3172_v23 = vmul.f32 %v3140_v14, %v2916_v63  ;;  %v3142_v27 = vadd.f32 1.0, %v5161_v11  ;;  %v2919_v7 = vmul.f32 0.5, %v7035_v44 }
 0x691   : > { %v5169_v32 = vpop.eup %5168  ;;  %v3086_v43 = vmul.f32 0.7978846, %v3054_v5  ;;  %4766 = vmatprep.mubr.bf16.mxu0 %v3193_v53  ;;  %v2920_v61 = vmul.f32 0.5, %v7045_v62  ;;  %v3143_v15 = vadd.f32 1.0, %v5157_v50  ;;  %v3144_v8 = vadd.f32 1.0, %v5163_v3 }
 0x692   : > { %v3194_v52 = vpack.c.bf16 %v3172_v23, %v3171_v25  ;;  %v3173_v42 = vmul.f32 %v3141_v48, %v2917_v36  ;;  %v3174_v13 = vmul.f32 %v3142_v27, %v2918_v31  ;;  %v2921_v41 = vmul.f32 0.5, %v7073_v47 }
 0x693   : > { %v5171_v60 = vpop.eup %5170  ;;  %5178 = vtanh.f32 %v3086_v43  ;;  %v3175_v54 = vmul.f32 %v3143_v15, %v2919_v7  ;;  %v3176_v1 = vmul.f32 %v3144_v8, %v2920_v61  ;;  %v3145_v28 = vadd.f32 1.0, %v5167_v33 }
 0x694   : > { %4767 = vmatmul.mubr.bf16.gmra.mrb[80].mxu0 %v3194_v52  ;;  %v3195_v11 = vpack.c.bf16 %v3174_v13, %v3173_v42  ;;  %v2922_v44 = vmul.f32 0.5, %v7091_v49  ;;  %v3146_v56 = vadd.f32 1.0, %v5171_v60  ;;  %v2923_v21 = vmul.f32 0.5, %v7067_v35 }
 0x695   : > { %v3196_v62 = vpack.c.bf16 %v3176_v1, %v3175_v54  ;;  %v2924_v50 = vmul.f32 0.5, %v7080_v9  ;;  %v3147_v30 = vadd.f32 1.0, %v5165_v2  ;;  %v3148_v0 = vadd.f32 1.0, %v5169_v32 }
 0x696   : > { %v5173_v20 = vpop.eup %5172  ;;  %4770 = vmatprep.mubr.bf16.mxu0 %v3195_v11  ;;  %v3177_v47 = vmul.f32 %v3145_v28, %v2921_v41  ;;  %v3178_v17 = vmul.f32 %v3146_v56, %v2922_v44  ;;  %v2927_v49 = vmul.f32 0.5, %v7102_v12  ;;  %v2928_v35 = vmul.f32 0.5, %v7114_v18  ;;  %v7159_v12 = vld [vmem:[%s7763_s5 + $0xb] ss:$0 sm:$0xff] }
 0x697   : > { %v5175_v10 = vpop.eup %5174  ;;  %v3179_v6 = vmul.f32 %v3147_v30, %v2923_v21  ;;  %v3180_v16 = vmul.f32 %v3148_v0, %v2924_v50  ;;  %v3151_v46 = vadd.f32 1.0, %v5173_v20  ;;  %v2925_v31 = vmul.f32 0.5, %v7108_v40 }
 0x698   : > { %v5177_v22 = vpop.eup %5176  ;;  %v3197_v3 = vpack.c.bf16 %v3178_v17, %v3177_v47  ;;  %v3149_v2 = vadd.f32 1.0, %v5175_v10  ;;  %v2926_v48 = vmul.f32 0.5, %v7127_v57 }
 0x699   : > { %v3198_v63 = vpack.c.bf16 %v3180_v16, %v3179_v6  ;;  %v3152_v14 = vadd.f32 1.0, %v5177_v22  ;;  %v3183_v36 = vmul.f32 %v3151_v46, %v2927_v49 }
 0x69a   : > { %v3181_v25 = vmul.f32 %v3149_v2, %v2925_v31 }
 0x69b   : > { %v3184_v9 = vmul.f32 %v3152_v14, %v2928_v35 }
 0x69c   : > { %4771 = vmatmul.mubr.bf16.gmra.mrb[84].mxu0 %v3196_v62 }
 0x69d   : > { %v5179_v5 = vpop.eup %5178  ;;  %4774 = vmatprep.mubr.bf16.mxu0 %v3197_v3  ;;  %v3200_v53 = vpack.c.bf16 %v3184_v9, %v3183_v36 }
 0x69e   : > { %v3150_v33 = vadd.f32 1.0, %v5179_v5 }
 0x6a0   : > { %v3182_v23 = vmul.f32 %v3150_v33, %v2926_v48 }
 0x6a2   : > { %v3199_v27 = vpack.c.bf16 %v3182_v23, %v3181_v25  ;;  %v7861_v25 = vld [vmem:[#allocation2_spill] sm:$0xff] }
 0x6a4   : > { %4775 = vmatmul.mubr.bf16.gmra.mrb[88].mxu0 %v3198_v63 }
 0x6a5   : > { %4778 = vmatprep.mubr.bf16.mxu0 %v3199_v27 }
 0x6ac   : > { %4779 = vmatmul.mubr.bf16.gmra.mrb[92].mxu0 %v3200_v53 }
 0x72b   : > { %v4752_v18 = vpop.f32.mrb[64].mxu0 }
 0x72c   : > { %v3304_v7 = vpop.f32.mrb[65].mxu0  ;;  %v3313_v32 = vadd.f32 %v4752_v18, %v7159_v12  ;;  %v7862_v18 = vld [vmem:[#allocation4_spill] sm:$0xff] }
 0x72d   : > { %v3305_v40 = vadd.f32 %v7159_v12, %v3304_v7  ;;  %v4753_v43 = vpop.f32.mrb[66].mxu0 }
 0x72e   : > { %v3307_v57 = vpop.f32.mrb[67].mxu0  ;;  %v3316_v15 = vadd.f32 %v4753_v43, %v7159_v12  ;;  %v7169_v52 = vadd.f32 %v3313_v32, %v6352_v19 }
 0x72f   : > { %v7164_v61 = vadd.f32 %v3305_v40, %v6347_v55  ;;  %v3308_v8 = vadd.f32 %v7159_v12, %v3307_v57 }
 0x730   : > { %v7177_v41 = vadd.f32 %v3316_v15, %v6360_v45  ;;  %v3472_v19 = vsel %vm827_vm1, %v7169_v52, 0.0 }
 0x731   : > { %v7172_v42 = vadd.f32 %v3308_v8, %v6355_v58  ;;  %v3466_v13 = vsel %vm827_vm1, %v7164_v61, 0.0 }
 0x732   : > { %3467 = vadd.xlane.f32.xlu0 %v3466_v13  ;;  %v3475_v45 = vsel %vm827_vm1, %v7177_v41, 0.0  ;;  %v7863_v13 = vld [vmem:[#allocation3_spill] sm:$0xff] }
 0x733   : > { %v3469_v55 = vsel %vm827_vm1, %v7172_v42, 0.0 }
 0x734   : > { %v4756_v60 = vpop.f32.mrb[68].mxu0  ;;  %3470 = vadd.xlane.f32.xlu1 %v3469_v55 }
 0x735   : > { %v3320_v54 = vpop.f32.mrb[69].mxu0  ;;  %v3329_v1 = vadd.f32 %v4756_v60, %v7159_v12 }
 0x736   : > { %v3321_v58 = vadd.f32 %v7159_v12, %v3320_v54  ;;  %v4757_v28 = vpop.f32.mrb[70].mxu0  ;;  %3473 = vadd.xlane.f32.xlu0 %v3472_v19 }
 0x737   : > { %v3323_v11 = vpop.f32.mrb[71].mxu0  ;;  %v3332_v56 = vadd.f32 %v4757_v28, %v7159_v12  ;;  %v7193_v62 = vadd.f32 %v3329_v1, %v6376_v34  ;;  %v7864_v1 = vld [vmem:[#allocation5_spill] sm:$0xff]  ;;  %v7865_v28 = vld [vmem:[#allocation6_spill] sm:$0xff] }
 0x738   : > { %v7188_v44 = vadd.f32 %v3321_v58, %v6369_v37  ;;  %v3324_v21 = vadd.f32 %v7159_v12, %v3323_v11  ;;  %3476 = vadd.xlane.f32.xlu1 %v3475_v45 }
 0x739   : > { %v7201_v0 = vadd.f32 %v3332_v56, %v6384_v51  ;;  %v3484_v20 = vsel %vm827_vm1, %v7193_v62, 0.0  ;;  %v7866_v56 = vld [vmem:[#allocation8_spill] sm:$0xff] }
 0x73a   : > { %v7196_v50 = vadd.f32 %v3324_v21, %v6379_v38  ;;  %v3478_v30 = vsel %vm827_vm1, %v7188_v44, 0.0 }
 0x73b   : > { %3479 = vadd.xlane.f32.xlu0 %v3478_v30  ;;  %v3487_v34 = vsel %vm827_vm1, %v7201_v0, 0.0 }
 0x73c   : > { %v3481_v37 = vsel %vm827_vm1, %v7196_v50, 0.0 }
 0x73d   : > { %3482 = vadd.xlane.f32.xlu1 %v3481_v37 }
 0x73f   : > { %3485 = vadd.xlane.f32.xlu0 %v3484_v20 }
 0x741   : > { %3488 = vadd.xlane.f32.xlu1 %v3487_v34 }
 0x750   : > { %v4760_v38 = vpop.f32.mrb[72].mxu0 }
 0x751   : > { %v3336_v47 = vpop.f32.mrb[73].mxu0  ;;  %v3345_v17 = vadd.f32 %v4760_v38, %v7159_v12 }
 0x752   : > { %v3337_v10 = vadd.f32 %v7159_v12, %v3336_v47  ;;  %v4761_v51 = vpop.f32.mrb[74].mxu0 }
 0x753   : > { %v3339_v6 = vpop.f32.mrb[75].mxu0  ;;  %v3348_v46 = vadd.f32 %v4761_v51, %v7159_v12  ;;  %v7217_v3 = vadd.f32 %v3345_v17, %v6400_v59  ;;  %v7867_v51 = vld [vmem:[#allocation7_spill] sm:$0xff] }
 0x754   : > { %v7212_v16 = vadd.f32 %v3337_v10, %v6395_v39  ;;  %v3340_v22 = vadd.f32 %v7159_v12, %v3339_v6 }
 0x755   : > { %v7225_v35 = vadd.f32 %v3348_v46, %v6408_v26  ;;  %v3496_v14 = vsel %vm827_vm1, %v7217_v3, 0.0 }
 0x756   : > { %v7220_v63 = vadd.f32 %v3340_v22, %v6403_v24  ;;  %v3490_v49 = vsel %vm827_vm1, %v7212_v16, 0.0 }
 0x757   : > { %3491 = vadd.xlane.f32.xlu0 %v3490_v49  ;;  %v3499_v59 = vsel %vm827_vm1, %v7225_v35, 0.0 }
 0x758   : > { %v3493_v39 = vsel %vm827_vm1, %v7220_v63, 0.0 }
 0x759   : > { %3494 = vadd.xlane.f32.xlu1 %v3493_v39  ;;  %v7868_v39 = vld [vmem:[#allocation9_spill] sm:$0xff] }
 0x75b   : > { %3497 = vadd.xlane.f32.xlu0 %v3496_v14 }
 0x75d   : > { %3500 = vadd.xlane.f32.xlu1 %v3499_v59  ;;  %v7869_v59 = vld [vmem:[#allocation10_spill] sm:$0xff] }
 0x75f   : > { %v4764_v24 = vpop.f32.mrb[76].mxu0 }
 0x760   : > { %v3352_v36 = vpop.f32.mrb[77].mxu0  ;;  %v3361_v9 = vadd.f32 %v4764_v24, %v7159_v12 }
 0x761   : > { %v3353_v2 = vadd.f32 %v7159_v12, %v3352_v36  ;;  %v4765_v26 = vpop.f32.mrb[78].mxu0 }
 0x762   : > { %v3355_v5 = vpop.f32.mrb[79].mxu0  ;;  %v3364_v31 = vadd.f32 %v4765_v26, %v7159_v12  ;;  %v7241_v33 = vadd.f32 %v3361_v9, %v6424_v4  ;;  %v7870_v9 = vld [vmem:[#allocation12_spill] sm:$0xff] }
 0x763   : > { %v7236_v53 = vadd.f32 %v3353_v2, %v6419_v29  ;;  %v3356_v48 = vadd.f32 %v7159_v12, %v3355_v5 }
 0x764   : > { %v7249_v7 = vadd.f32 %v3364_v31, %v7862_v18  ;;  %v3508_v15 = vsel %vm827_vm1, %v7241_v33, 0.0 }
 0x765   : > { %v7244_v23 = vadd.f32 %v3356_v48, %v7861_v25  ;;  %v3502_v27 = vsel %vm827_vm1, %v7236_v53, 0.0 }
 0x766   : > { %3503 = vadd.xlane.f32.xlu0 %v3502_v27  ;;  %v3511_v19 = vsel %vm827_vm1, %v7249_v7, 0.0 }
 0x767   : > { %v4768_v32 = vpop.f32.mrb[80].mxu0  ;;  %v3505_v29 = vsel %vm827_vm1, %v7244_v23, 0.0 }
 0x768   : > { %3506 = vadd.xlane.f32.xlu1 %v3505_v29  ;;  %v3368_v40 = vpop.f32.mrb[81].mxu0  ;;  %v3377_v43 = vadd.f32 %v4768_v32, %v7159_v12  ;;  %v7871_v29 = vld [vmem:[#allocation11_spill] sm:$0xff] }
 0x769   : > { %v3369_v4 = vadd.f32 %v7159_v12, %v3368_v40  ;;  %v4769_v57 = vpop.f32.mrb[82].mxu0 }
 0x76a   : > { %3509 = vadd.xlane.f32.xlu0 %v3508_v15  ;;  %v3371_v8 = vpop.f32.mrb[83].mxu0  ;;  %v3380_v60 = vadd.f32 %v4769_v57, %v7159_v12  ;;  %v7265_v58 = vadd.f32 %v3377_v43, %v7864_v1  ;;  %v7872_v15 = vld [vmem:[#allocation13_spill] sm:$0xff] }
 0x76b   : > { %v7258_v55 = vadd.f32 %v3369_v4, %v7863_v13  ;;  %v3372_v54 = vadd.f32 %v7159_v12, %v3371_v8  ;;  %v7873_v13 = vld [vmem:[#allocation14_spill] sm:$0xff] }
 0x76c   : > { %3512 = vadd.xlane.f32.xlu1 %v3511_v19  ;;  %v7273_v21 = vadd.f32 %v3380_v60, %v7866_v56  ;;  %v3520_v17 = vsel %vm827_vm1, %v7265_v58, 0.0  ;;  %v7874_v19 = vld [vmem:[#allocation16_spill] sm:$0xff] }
 0x76d   : > { %v7268_v11 = vadd.f32 %v3372_v54, %v7865_v28  ;;  %v3514_v45 = vsel %vm827_vm1, %v7258_v55, 0.0 }
 0x76e   : > { %3515 = vadd.xlane.f32.xlu0 %v3514_v45  ;;  %v3523_v49 = vsel %vm827_vm1, %v7273_v21, 0.0 }
 0x76f   : > { %v4772_v30 = vpop.f32.mrb[84].mxu0  ;;  %v3517_v37 = vsel %vm827_vm1, %v7268_v11, 0.0 }
 0x770   : > { %3518 = vadd.xlane.f32.xlu1 %v3517_v37  ;;  %v3384_v20 = vpop.f32.mrb[85].mxu0  ;;  %v3393_v34 = vadd.f32 %v4772_v30, %v7159_v12 }
 0x771   : > { %v3385_v38 = vadd.f32 %v7159_v12, %v3384_v20  ;;  %v4773_v47 = vpop.f32.mrb[86].mxu0 }
 0x772   : > { %3521 = vadd.xlane.f32.xlu0 %v3520_v17  ;;  %v3387_v10 = vpop.f32.mrb[87].mxu0  ;;  %v3396_v46 = vadd.f32 %v4773_v47, %v7159_v12  ;;  %v7289_v14 = vadd.f32 %v3393_v34, %v7868_v39  ;;  %v7875_v47 = vld [vmem:[#allocation15_spill] sm:$0xff]  ;;  %v7877_v39 = vld [vmem:[#allocation18_spill] sm:$0xff] }
 0x773   : > { %v7282_v6 = vadd.f32 %v3385_v38, %v7867_v51  ;;  %v3388_v22 = vadd.f32 %v7159_v12, %v3387_v10 }
 0x774   : > { %3524 = vadd.xlane.f32.xlu1 %v3523_v49  ;;  %v7297_v2 = vadd.f32 %v3396_v46, %v7870_v9  ;;  %v3532_v18 = vsel %vm827_vm1, %v7289_v14, 0.0  ;;  %v7878_v9 = vld [vmem:[#allocation20_spill] sm:$0xff] }
 0x775   : > { %v7292_v24 = vadd.f32 %v3388_v22, %v7869_v59  ;;  %v3526_v36 = vsel %vm827_vm1, %v7282_v6, 0.0  ;;  %v7876_v22 = vld [vmem:[#allocation17_spill] sm:$0xff] }
 0x776   : > { %3527 = vadd.xlane.f32.xlu0 %v3526_v36  ;;  %v3535_v57 = vsel %vm827_vm1, %v7297_v2, 0.0 }
 0x777   : > { %v4776_v26 = vpop.f32.mrb[88].mxu0  ;;  %v3529_v5 = vsel %vm827_vm1, %v7292_v24, 0.0 }
 0x778   : > { %3530 = vadd.xlane.f32.xlu1 %v3529_v5  ;;  %v3400_v31 = vpop.f32.mrb[89].mxu0  ;;  %v3409_v48 = vadd.f32 %v4776_v26, %v7159_v12 }
 0x779   : > { %v3401_v25 = vadd.f32 %v7159_v12, %v3400_v31  ;;  %v4777_v27 = vpop.f32.mrb[90].mxu0 }
 0x77a   : > { %3533 = vadd.xlane.f32.xlu0 %v3532_v18  ;;  %v3403_v32 = vpop.f32.mrb[91].mxu0  ;;  %v3412_v43 = vadd.f32 %v4777_v27, %v7159_v12  ;;  %v7313_v8 = vadd.f32 %v3409_v48, %v7872_v15  ;;  %v4856_v48 = vld [vmem:[%s7762_s4] sm:$0xff]   ;;  %v4858_v27 = vld [vmem:[%s7762_s4 + $0x10] sm:$0xff]  }
 0x77b   : > { %v7306_v40 = vadd.f32 %v3401_v25, %v7871_v29  ;;  %v3404_v4 = vadd.f32 %v7159_v12, %v3403_v32  ;;  %v4857_v25 = vld [vmem:[%s7762_s4 + $0x8] sm:$0xff]   ;;  %4782 = vmatprep.subr.bf16.mxu1 %v4856_v48 }
 0x77c   : > { %3536 = vadd.xlane.f32.xlu1 %v3535_v57  ;;  %v7321_v1 = vadd.f32 %v3412_v43, %v7874_v19  ;;  %v3544_v34 = vsel %vm827_vm1, %v7313_v8, 0.0  ;;  %4783 = vmatpush3.bf16.msra.mxu1 %v4856_v48 }
 0x77d   : > { %v7316_v60 = vadd.f32 %v3404_v4, %v7873_v13  ;;  %v3538_v54 = vsel %vm827_vm1, %v7306_v40, 0.0  ;;  %4784 = vmatprep.subr.bf16.mxu1 %v4857_v25 }
 0x77e   : > { %3539 = vadd.xlane.f32.xlu0 %v3538_v54  ;;  %v3547_v46 = vsel %vm827_vm1, %v7321_v1, 0.0 }
 0x77f   : > { %v4780_v28 = vpop.f32.mrb[92].mxu0  ;;  %v3541_v45 = vsel %vm827_vm1, %v7316_v60, 0.0 }
 0x780   : > { %3542 = vadd.xlane.f32.xlu1 %v3541_v45  ;;  %v3416_v56 = vpop.f32.mrb[93].mxu0  ;;  %v3425_v30 = vadd.f32 %v4780_v28, %v7159_v12  ;;  %4785 = vmatpush3.bf16.msra.mxu1 %v4857_v25 }
 0x781   : > { %v3417_v37 = vadd.f32 %v7159_v12, %v3416_v56  ;;  %v4781_v20 = vpop.f32.mrb[94].mxu0  ;;  %4786 = vmatprep.subr.bf16.mxu1 %v4858_v27 }
 0x782   : > { %3545 = vadd.xlane.f32.xlu0 %v3544_v34  ;;  %v3419_v38 = vpop.f32.mrb[95].mxu0  ;;  %v3428_v10 = vadd.f32 %v4781_v20, %v7159_v12  ;;  %v7337_v49 = vadd.f32 %v3425_v30, %v7876_v22 }
 0x783   : > { %v7330_v17 = vadd.f32 %v3417_v37, %v7875_v47  ;;  %v3420_v51 = vadd.f32 %v7159_v12, %v3419_v38 }
 0x784   : > { %3548 = vadd.xlane.f32.xlu1 %v3547_v46  ;;  %v7345_v26 = vadd.f32 %v3428_v10, %v7878_v9  ;;  %v3556_v5 = vsel %vm827_vm1, %v7337_v49, 0.0  ;;  %4787 = vmatpush3.bf16.msra.mxu1 %v4858_v27 }
 0x785   : > { %v7340_v59 = vadd.f32 %v3420_v51, %v7877_v39  ;;  %v3550_v36 = vsel %vm827_vm1, %v7330_v17, 0.0 }
 0x786   : > { %3551 = vadd.xlane.f32.xlu0 %v3550_v36  ;;  %v3559_v31 = vsel %vm827_vm1, %v7345_v26, 0.0 }
 0x787   : > { %v3553_v12 = vsel %vm827_vm1, %v7340_v59, 0.0 }
 0x788   : > { %3554 = vadd.xlane.f32.xlu1 %v3553_v12 }
 0x78a   : > { %3557 = vadd.xlane.f32.xlu0 %v3556_v5 }
 0x78c   : > { %3560 = vadd.xlane.f32.xlu1 %v3559_v31 }
 0x7bf   : > { %v3468_v18 = vpop.xlane.xlu0 %3467 }
 0x7c0   : > { %v3562_v32 = vmul.f32 0.015625, %v3468_v18 }
 0x7c1   : > { %v3471_v29 = vpop.xlane.xlu1 %3470 }
 0x7c2   : > { %v7363_v43 = vsub.f32 %v7164_v61, %v3562_v32  ;;  %v3563_v4 = vmul.f32 0.015625, %v3471_v29 }
 0x7c3   : > { %v3474_v57 = vpop.xlane.xlu0 %3473 }
 0x7c4   : > { %v7366_v15 = vsub.f32 %v7172_v42, %v3563_v4  ;;  %v3564_v13 = vmul.f32 0.015625, %v3474_v57  ;;  %v3626_v54 = vmul.f32 %v7363_v43, %v7363_v43 }
 0x7c5   : > { %v3477_v19 = vpop.xlane.xlu1 %3476 }
 0x7c6   : > { %v7371_v28 = vsub.f32 %v7169_v52, %v3564_v13  ;;  %v3565_v45 = vmul.f32 0.015625, %v3477_v19  ;;  %v3658_v56 = vsel %vm827_vm1, %v3626_v54, 0.0  ;;  %v3627_v61 = vmul.f32 %v7366_v15, %v7366_v15 }
 0x7c7   : > { %3659 = vadd.xlane.f32.xlu0 %v3658_v56 }
 0x7c8   : > { %v7377_v30 = vsub.f32 %v7177_v41, %v3565_v45  ;;  %v3480_v42 = vpop.xlane.xlu0 %3479  ;;  %v3661_v37 = vsel %vm827_vm1, %v3627_v61, 0.0  ;;  %v3628_v20 = vmul.f32 %v7371_v28, %v7371_v28 }
 0x7c9   : > { %v3566_v34 = vmul.f32 0.015625, %v3480_v42  ;;  %3662 = vadd.xlane.f32.xlu1 %v3661_v37 }
 0x7ca   : > { %v3483_v52 = vpop.xlane.xlu1 %3482  ;;  %v3664_v38 = vsel %vm827_vm1, %v3628_v20, 0.0  ;;  %v3629_v47 = vmul.f32 %v7377_v30, %v7377_v30 }
 0x7cb   : > { %v7386_v10 = vsub.f32 %v7188_v44, %v3566_v34  ;;  %v3567_v51 = vmul.f32 0.015625, %v3483_v52  ;;  %3665 = vadd.xlane.f32.xlu0 %v3664_v38 }
 0x7cc   : > { %v3486_v41 = vpop.xlane.xlu0 %3485  ;;  %v3667_v46 = vsel %vm827_vm1, %v3629_v47, 0.0  ;;  %v4859_v47 = vld [vmem:[%s7762_s4 + $0x18] sm:$0xff]  }
 0x7cd   : > { %v7390_v22 = vsub.f32 %v7196_v50, %v3567_v51  ;;  %v3568_v39 = vmul.f32 0.015625, %v3486_v41  ;;  %3668 = vadd.xlane.f32.xlu1 %v3667_v46  ;;  %v3630_v36 = vmul.f32 %v7386_v10, %v7386_v10  ;;  %4788 = vmatprep.subr.bf16.mxu1 %v4859_v47 }
 0x7ce   : > { %v3489_v9 = vpop.xlane.xlu1 %3488  ;;  %4789 = vmatpush3.bf16.msra.mxu1 %v4859_v47 }
 0x7cf   : > { %v7395_v12 = vsub.f32 %v7193_v62, %v3568_v39  ;;  %v3569_v5 = vmul.f32 0.015625, %v3489_v9  ;;  %v3670_v44 = vsel %vm827_vm1, %v3630_v36, 0.0  ;;  %v3631_v31 = vmul.f32 %v7390_v22, %v7390_v22 }
 0x7d0   : > { %3671 = vadd.xlane.f32.xlu0 %v3670_v44 }
 0x7d1   : > { %v7401_v48 = vsub.f32 %v7201_v0, %v3569_v5  ;;  %v3673_v50 = vsel %vm827_vm1, %v3631_v31, 0.0  ;;  %v3632_v25 = vmul.f32 %v7395_v12, %v7395_v12 }
 0x7d2   : > { %3674 = vadd.xlane.f32.xlu1 %v3673_v50 }
 0x7d3   : > { %v3676_v27 = vsel %vm827_vm1, %v3632_v25, 0.0  ;;  %v3633_v62 = vmul.f32 %v7401_v48, %v7401_v48 }
 0x7d4   : > { %3677 = vadd.xlane.f32.xlu0 %v3676_v27 }
 0x7d5   : > { %v3679_v18 = vsel %vm827_vm1, %v3633_v62, 0.0 }
 0x7d6   : > { %3680 = vadd.xlane.f32.xlu1 %v3679_v18 }
 0x7e4   : > { %v3492_v32 = vpop.xlane.xlu0 %3491 }
 0x7e5   : > { %v3570_v29 = vmul.f32 0.015625, %v3492_v32 }
 0x7e6   : > { %v3495_v4 = vpop.xlane.xlu1 %3494 }
 0x7e7   : > { %v7411_v0 = vsub.f32 %v7212_v16, %v3570_v29  ;;  %v3571_v57 = vmul.f32 0.015625, %v3495_v4 }
 0x7e8   : > { %v3498_v13 = vpop.xlane.xlu0 %3497 }
 0x7e9   : > { %v7414_v54 = vsub.f32 %v7220_v63, %v3571_v57  ;;  %v3572_v19 = vmul.f32 0.015625, %v3498_v13  ;;  %v3634_v45 = vmul.f32 %v7411_v0, %v7411_v0 }
 0x7ea   : > { %v3501_v56 = vpop.xlane.xlu1 %3500 }
 0x7eb   : > { %v7419_v61 = vsub.f32 %v7217_v3, %v3572_v19  ;;  %v3573_v42 = vmul.f32 0.015625, %v3501_v56  ;;  %v3682_v37 = vsel %vm827_vm1, %v3634_v45, 0.0  ;;  %v3635_v16 = vmul.f32 %v7414_v54, %v7414_v54 }
 0x7ec   : > { %3683 = vadd.xlane.f32.xlu0 %v3682_v37 }
 0x7ed   : > { %v7425_v20 = vsub.f32 %v7225_v35, %v3573_v42  ;;  %v3685_v63 = vsel %vm827_vm1, %v3635_v16, 0.0  ;;  %v3636_v34 = vmul.f32 %v7419_v61, %v7419_v61 }
 0x7ee   : > { %3686 = vadd.xlane.f32.xlu1 %v3685_v63 }
 0x7ef   : > { %v3688_v52 = vsel %vm827_vm1, %v3636_v34, 0.0  ;;  %v3637_v3 = vmul.f32 %v7425_v20, %v7425_v20 }
 0x7f0   : > { %3689 = vadd.xlane.f32.xlu0 %v3688_v52 }
 0x7f1   : > { %v3691_v38 = vsel %vm827_vm1, %v3637_v3, 0.0 }
 0x7f2   : > { %3692 = vadd.xlane.f32.xlu1 %v3691_v38 }
 0x7f3   : > { %v3504_v35 = vpop.xlane.xlu0 %3503 }
 0x7f4   : > { %v3574_v51 = vmul.f32 0.015625, %v3504_v35 }
 0x7f5   : > { %v3507_v41 = vpop.xlane.xlu1 %3506 }
 0x7f6   : > { %v7438_v46 = vsub.f32 %v7236_v53, %v3574_v51  ;;  %v3575_v39 = vmul.f32 0.015625, %v3507_v41 }
 0x7f7   : > { %v3510_v36 = vpop.xlane.xlu0 %3509 }
 0x7f8   : > { %v7441_v9 = vsub.f32 %v7244_v23, %v3575_v39  ;;  %v3576_v5 = vmul.f32 0.015625, %v3510_v36  ;;  %v3638_v44 = vmul.f32 %v7438_v46, %v7438_v46 }
 0x7f9   : > { %v3513_v31 = vpop.xlane.xlu1 %3512 }
 0x7fa   : > { %v7446_v50 = vsub.f32 %v7241_v33, %v3576_v5  ;;  %v3577_v25 = vmul.f32 0.015625, %v3513_v31  ;;  %v3694_v27 = vsel %vm827_vm1, %v3638_v44, 0.0  ;;  %v3639_v53 = vmul.f32 %v7441_v9, %v7441_v9 }
 0x7fb   : > { %3695 = vadd.xlane.f32.xlu0 %v3694_v27  ;;  %v3516_v62 = vpop.xlane.xlu0 %3515 }
 0x7fc   : > { %v7452_v18 = vsub.f32 %v7249_v7, %v3577_v25  ;;  %v3578_v23 = vmul.f32 0.015625, %v3516_v62  ;;  %v3697_v32 = vsel %vm827_vm1, %v3639_v53, 0.0  ;;  %v3640_v29 = vmul.f32 %v7446_v50, %v7446_v50 }
 0x7fd   : > { %v3519_v4 = vpop.xlane.xlu1 %3518  ;;  %3698 = vadd.xlane.f32.xlu1 %v3697_v32 }
 0x7fe   : > { %v7458_v33 = vsub.f32 %v7258_v55, %v3578_v23  ;;  %v3579_v57 = vmul.f32 0.015625, %v3519_v4  ;;  %v3700_v13 = vsel %vm827_vm1, %v3640_v29, 0.0  ;;  %v3641_v19 = vmul.f32 %v7452_v18, %v7452_v18 }
 0x7ff   : > { %3701 = vadd.xlane.f32.xlu0 %v3700_v13  ;;  %v3522_v7 = vpop.xlane.xlu0 %3521 }
 0x800   : > { %v7464_v45 = vsub.f32 %v7268_v11, %v3579_v57  ;;  %v3580_v56 = vmul.f32 0.015625, %v3522_v7  ;;  %v3703_v42 = vsel %vm827_vm1, %v3641_v19, 0.0  ;;  %v3642_v37 = vmul.f32 %v7458_v33, %v7458_v33 }
 0x801   : > { %v3525_v16 = vpop.xlane.xlu1 %3524  ;;  %3704 = vadd.xlane.f32.xlu1 %v3703_v42 }
 0x802   : > { %v7470_v55 = vsub.f32 %v7265_v58, %v3580_v56  ;;  %v3581_v63 = vmul.f32 0.015625, %v3525_v16  ;;  %v3706_v34 = vsel %vm827_vm1, %v3642_v37, 0.0  ;;  %v3643_v52 = vmul.f32 %v7464_v45, %v7464_v45 }
 0x803   : > { %3707 = vadd.xlane.f32.xlu0 %v3706_v34  ;;  %v3528_v11 = vpop.xlane.xlu0 %3527 }
 0x804   : > { %v7476_v3 = vsub.f32 %v7273_v21, %v3581_v63  ;;  %v3582_v38 = vmul.f32 0.015625, %v3528_v11  ;;  %v3709_v47 = vsel %vm827_vm1, %v3643_v52, 0.0  ;;  %v3644_v35 = vmul.f32 %v7470_v55, %v7470_v55 }
 0x805   : > { %v3531_v51 = vpop.xlane.xlu1 %3530  ;;  %3710 = vadd.xlane.f32.xlu1 %v3709_v47 }
 0x806   : > { %v7482_v58 = vsub.f32 %v7282_v6, %v3582_v38  ;;  %v3583_v41 = vmul.f32 0.015625, %v3531_v51  ;;  %v3712_v39 = vsel %vm827_vm1, %v3644_v35, 0.0  ;;  %v3645_v36 = vmul.f32 %v7476_v3, %v7476_v3 }
 0x807   : > { %3713 = vadd.xlane.f32.xlu0 %v3712_v39  ;;  %v3534_v21 = vpop.xlane.xlu0 %3533 }
 0x808   : > { %v7488_v5 = vsub.f32 %v7292_v24, %v3583_v41  ;;  %v3584_v44 = vmul.f32 0.015625, %v3534_v21  ;;  %v3715_v31 = vsel %vm827_vm1, %v3645_v36, 0.0  ;;  %v3646_v25 = vmul.f32 %v7482_v58, %v7482_v58 }
 0x809   : > { %v3537_v27 = vpop.xlane.xlu1 %3536  ;;  %3716 = vadd.xlane.f32.xlu1 %v3715_v31 }
 0x80a   : > { %v7494_v6 = vsub.f32 %v7289_v14, %v3584_v44  ;;  %v3585_v53 = vmul.f32 0.015625, %v3537_v27  ;;  %v3718_v62 = vsel %vm827_vm1, %v3646_v25, 0.0  ;;  %v3647_v23 = vmul.f32 %v7488_v5, %v7488_v5 }
 0x80b   : > { %3719 = vadd.xlane.f32.xlu0 %v3718_v62  ;;  %v3540_v24 = vpop.xlane.xlu0 %3539 }
 0x80c   : > { %v7500_v32 = vsub.f32 %v7297_v2, %v3585_v53  ;;  %v3586_v29 = vmul.f32 0.015625, %v3540_v24  ;;  %v3721_v4 = vsel %vm827_vm1, %v3647_v23, 0.0  ;;  %v3648_v57 = vmul.f32 %v7494_v6, %v7494_v6 }
 0x80d   : > { %v3543_v13 = vpop.xlane.xlu1 %3542  ;;  %3722 = vadd.xlane.f32.xlu1 %v3721_v4 }
 0x80e   : > { %v7506_v14 = vsub.f32 %v7306_v40, %v3586_v29  ;;  %v3587_v19 = vmul.f32 0.015625, %v3543_v13  ;;  %v3724_v7 = vsel %vm827_vm1, %v3648_v57, 0.0  ;;  %v3649_v56 = vmul.f32 %v7500_v32, %v7500_v32 }
 0x80f   : > { %3725 = vadd.xlane.f32.xlu0 %v3724_v7  ;;  %v3546_v2 = vpop.xlane.xlu0 %3545 }
 0x810   : > { %v7512_v42 = vsub.f32 %v7316_v60, %v3587_v19  ;;  %v3588_v37 = vmul.f32 0.015625, %v3546_v2  ;;  %v3727_v16 = vsel %vm827_vm1, %v3649_v56, 0.0  ;;  %v3650_v63 = vmul.f32 %v7506_v14, %v7506_v14 }
 0x811   : > { %v3549_v34 = vpop.xlane.xlu1 %3548  ;;  %3728 = vadd.xlane.f32.xlu1 %v3727_v16 }
 0x812   : > { %v7518_v40 = vsub.f32 %v7313_v8, %v3588_v37  ;;  %v3589_v52 = vmul.f32 0.015625, %v3549_v34  ;;  %v3730_v11 = vsel %vm827_vm1, %v3650_v63, 0.0  ;;  %v3651_v38 = vmul.f32 %v7512_v42, %v7512_v42 }
 0x813   : > { %3731 = vadd.xlane.f32.xlu0 %v3730_v11  ;;  %v3552_v60 = vpop.xlane.xlu0 %3551 }
 0x814   : > { %v7524_v47 = vsub.f32 %v7321_v1, %v3589_v52  ;;  %v3590_v35 = vmul.f32 0.015625, %v3552_v60  ;;  %v3733_v51 = vsel %vm827_vm1, %v3651_v38, 0.0  ;;  %v3652_v41 = vmul.f32 %v7518_v40, %v7518_v40 }
 0x815   : > { %3734 = vadd.xlane.f32.xlu1 %v3733_v51  ;;  %v3555_v8 = vpop.xlane.xlu1 %3554 }
 0x816   : > { %v7530_v39 = vsub.f32 %v7330_v17, %v3590_v35  ;;  %v3591_v36 = vmul.f32 0.015625, %v3555_v8  ;;  %v3736_v21 = vsel %vm827_vm1, %v3652_v41, 0.0  ;;  %v3653_v44 = vmul.f32 %v7524_v47, %v7524_v47 }
 0x817   : > { %3737 = vadd.xlane.f32.xlu0 %v3736_v21  ;;  %v3558_v1 = vpop.xlane.xlu0 %3557 }
 0x818   : > { %v7536_v31 = vsub.f32 %v7340_v59, %v3591_v36  ;;  %v3592_v25 = vmul.f32 0.015625, %v3558_v1  ;;  %v3739_v27 = vsel %vm827_vm1, %v3653_v44, 0.0  ;;  %v3654_v53 = vmul.f32 %v7530_v39, %v7530_v39 }
 0x819   : > { %3740 = vadd.xlane.f32.xlu1 %v3739_v27  ;;  %v3561_v17 = vpop.xlane.xlu1 %3560  ;;  %v7560_v27 = vld [vmem:[%s7763_s5 + $0x1] ss:$0 sm:$0xff] }
 0x81a   : > { %v7542_v62 = vsub.f32 %v7337_v49, %v3592_v25  ;;  %v3593_v23 = vmul.f32 0.015625, %v3561_v17  ;;  %v3742_v24 = vsel %vm827_vm1, %v3654_v53, 0.0  ;;  %v3655_v29 = vmul.f32 %v7536_v31, %v7536_v31 }
 0x81b   : > { %3743 = vadd.xlane.f32.xlu0 %v3742_v24 }
 0x81c   : > { %v7548_v59 = vsub.f32 %v7345_v26, %v3593_v23  ;;  %v3745_v4 = vsel %vm827_vm1, %v3655_v29, 0.0  ;;  %v3656_v57 = vmul.f32 %v7542_v62, %v7542_v62 }
 0x81d   : > { %3746 = vadd.xlane.f32.xlu1 %v3745_v4 }
 0x81e   : > { %v3748_v13 = vsel %vm827_vm1, %v3656_v57, 0.0  ;;  %v3657_v49 = vmul.f32 %v7548_v59, %v7548_v59 }
 0x81f   : > { %3749 = vadd.xlane.f32.xlu0 %v3748_v13 }
 0x820   : > { %v3751_v19 = vsel %vm827_vm1, %v3657_v49, 0.0 }
 0x821   : > { %3752 = vadd.xlane.f32.xlu1 %v3751_v19  ;;  %v7568_v19 = vld [vmem:[%s7763_s5 + $0x2] ss:$0 sm:$0xff] }
 0x854   : > { %v3660_v7 = vpop.xlane.xlu0 %3659 }
 0x855   : > { %v3754_v56 = vmul.f32 0.015625, %v3660_v7 }
 0x856   : > { %v3663_v2 = vpop.xlane.xlu1 %3662 }
 0x857   : > { %v3786_v26 = vadd.f32 1e-05, %v3754_v56  ;;  %v3755_v37 = vmul.f32 0.015625, %v3663_v2 }
 0x858   : > { %v3666_v16 = vpop.xlane.xlu0 %3665 }
 0x859   : > { %5180 = vrsqrt.f32 %v3786_v26  ;;  %v3787_v63 = vadd.f32 1e-05, %v3755_v37  ;;  %v3756_v34 = vmul.f32 0.015625, %v3666_v16 }
 0x85a   : > { %v3669_v52 = vpop.xlane.xlu1 %3668 }
 0x85b   : > { %5182 = vrsqrt.f32 %v3787_v63  ;;  %v3788_v11 = vadd.f32 1e-05, %v3756_v34  ;;  %v3757_v38 = vmul.f32 0.015625, %v3669_v52 }
 0x85d   : > { %5184 = vrsqrt.f32 %v3788_v11  ;;  %v3789_v60 = vadd.f32 1e-05, %v3757_v38  ;;  %v3672_v35 = vpop.xlane.xlu0 %3671 }
 0x85e   : > { %v3758_v51 = vmul.f32 0.015625, %v3672_v35 }
 0x85f   : > { %5186 = vrsqrt.f32 %v3789_v60  ;;  %v3675_v41 = vpop.xlane.xlu1 %3674 }
 0x860   : > { %v3790_v8 = vadd.f32 1e-05, %v3758_v51  ;;  %v3759_v36 = vmul.f32 0.015625, %v3675_v41 }
 0x861   : > { %v3678_v21 = vpop.xlane.xlu0 %3677 }
 0x862   : > { %5188 = vrsqrt.f32 %v3790_v8  ;;  %v3791_v44 = vadd.f32 1e-05, %v3759_v36  ;;  %v3760_v1 = vmul.f32 0.015625, %v3678_v21 }
 0x863   : > { %v5181_v25 = vpop.eup %5180  ;;  %v3681_v53 = vpop.xlane.xlu1 %3680 }
 0x864   : > { %v3850_v17 = vmul.f32 %v5181_v25, %v7363_v43  ;;  %5190 = vrsqrt.f32 %v3791_v44  ;;  %v3792_v23 = vadd.f32 1e-05, %v3760_v1  ;;  %v3761_v24 = vmul.f32 0.015625, %v3681_v53 }
 0x865   : > { %v5183_v29 = vpop.eup %5182 }
 0x866   : > { %v3851_v4 = vmul.f32 %v5183_v29, %v7366_v15  ;;  %5192 = vrsqrt.f32 %v3792_v23  ;;  %v3793_v57 = vadd.f32 1e-05, %v3761_v24  ;;  %v3886_v13 = vmul.f32 %v7560_v27, %v3850_v17 }
 0x867   : > { %v5185_v49 = vpop.eup %5184 }
 0x868   : > { %v3852_v7 = vmul.f32 %v5185_v49, %v7371_v28  ;;  %5194 = vrsqrt.f32 %v3793_v57  ;;  %v3887_v43 = vmul.f32 %v7560_v27, %v3851_v4  ;;  %v3922_v26 = vadd.f32 %v7568_v19, %v3886_v13 }
 0x869   : > { %v5187_v56 = vpop.eup %5186 }
 0x86a   : > { %v3888_v2 = vmul.f32 %v7560_v27, %v3852_v7  ;;  %v3853_v15 = vmul.f32 %v5187_v56, %v7377_v30  ;;  %v3923_v37 = vadd.f32 %v7568_v19, %v3887_v43 }
 0x86c   : > { %v5189_v16 = vpop.eup %5188  ;;  %v3889_v63 = vmul.f32 %v7560_v27, %v3853_v15  ;;  %v3954_v34 = vpack.c.bf16 %v3923_v37, %v3922_v26  ;;  %v3924_v28 = vadd.f32 %v7568_v19, %v3888_v2 }
 0x86d   : > { %v3854_v52 = vmul.f32 %v5189_v16, %v7386_v10 }
 0x86e   : > { %v5191_v11 = vpop.eup %5190  ;;  %v3925_v38 = vadd.f32 %v7568_v19, %v3889_v63  ;;  %4790 = vmatprep.mubr.msk.bf16.mxu1 %vm827_vm1, %v3954_v34 }
 0x86f   : > { %v3855_v60 = vmul.f32 %v5191_v11, %v7390_v22  ;;  %v3890_v30 = vmul.f32 %v7560_v27, %v3854_v52 }
 0x870   : > { %v5193_v35 = vpop.eup %5192  ;;  %v3955_v51 = vpack.c.bf16 %v3925_v38, %v3924_v28 }
 0x871   : > { %v3856_v41 = vmul.f32 %v5193_v35, %v7395_v12  ;;  %v3891_v8 = vmul.f32 %v7560_v27, %v3855_v60  ;;  %v3926_v21 = vadd.f32 %v7568_v19, %v3890_v30 }
 0x872   : > { %v5195_v36 = vpop.eup %5194  ;;  %4791 = vmatmul.mubr.msk.bf16.vlgmr.msra.gmra.mrb[64].mxu1 %vm827_vm1, %v3955_v51 }
 0x873   : > { %v3857_v10 = vmul.f32 %v5195_v36, %v7401_v48  ;;  %v3927_v44 = vadd.f32 %v7568_v19, %v3891_v8  ;;  %v3892_v1 = vmul.f32 %v7560_v27, %v3856_v41 }
 0x875   : > { %v3956_v22 = vpack.c.bf16 %v3927_v44, %v3926_v21  ;;  %v3893_v25 = vmul.f32 %v7560_v27, %v3857_v10  ;;  %v3928_v12 = vadd.f32 %v7568_v19, %v3892_v1 }
 0x877   : > { %4794 = vmatprep.mubr.msk.bf16.mxu1 %vm827_vm1, %v3956_v22  ;;  %v3929_v53 = vadd.f32 %v7568_v19, %v3893_v25 }
 0x879   : > { %v3684_v17 = vpop.xlane.xlu0 %3683  ;;  %v3957_v23 = vpack.c.bf16 %v3929_v53, %v3928_v12 }
 0x87a   : > { %v3762_v24 = vmul.f32 0.015625, %v3684_v17 }
 0x87b   : > { %v3687_v29 = vpop.xlane.xlu1 %3686  ;;  %4795 = vmatmul.mubr.msk.bf16.gmra.mrb[68].mxu1 %vm827_vm1, %v3957_v23 }
 0x87c   : > { %v3794_v48 = vadd.f32 1e-05, %v3762_v24  ;;  %v3763_v4 = vmul.f32 0.015625, %v3687_v29 }
 0x87d   : > { %v3690_v57 = vpop.xlane.xlu0 %3689 }
 0x87e   : > { %5196 = vrsqrt.f32 %v3794_v48  ;;  %v3795_v13 = vadd.f32 1e-05, %v3763_v4  ;;  %v3764_v49 = vmul.f32 0.015625, %v3690_v57 }
 0x87f   : > { %v3693_v7 = vpop.xlane.xlu1 %3692 }
 0x880   : > { %5198 = vrsqrt.f32 %v3795_v13  ;;  %v3796_v43 = vadd.f32 1e-05, %v3764_v49  ;;  %v3765_v56 = vmul.f32 0.015625, %v3693_v7 }
 0x882   : > { %5200 = vrsqrt.f32 %v3796_v43  ;;  %v3797_v2 = vadd.f32 1e-05, %v3765_v56 }
 0x884   : > { %5202 = vrsqrt.f32 %v3797_v2 }
 0x888   : > { %v5197_v15 = vpop.eup %5196  ;;  %v3696_v26 = vpop.xlane.xlu0 %3695 }
 0x889   : > { %v3858_v37 = vmul.f32 %v5197_v15, %v7411_v0  ;;  %v3766_v16 = vmul.f32 0.015625, %v3696_v26 }
 0x88a   : > { %v5199_v63 = vpop.eup %5198  ;;  %v3699_v34 = vpop.xlane.xlu1 %3698 }
 0x88b   : > { %v3859_v52 = vmul.f32 %v5199_v63, %v7414_v54  ;;  %v3798_v11 = vadd.f32 1e-05, %v3766_v16  ;;  %v3767_v28 = vmul.f32 0.015625, %v3699_v34  ;;  %v3894_v30 = vmul.f32 %v7560_v27, %v3858_v37 }
 0x88c   : > { %v5201_v38 = vpop.eup %5200  ;;  %v3702_v60 = vpop.xlane.xlu0 %3701 }
 0x88d   : > { %v3860_v35 = vmul.f32 %v5201_v38, %v7419_v61  ;;  %5204 = vrsqrt.f32 %v3798_v11  ;;  %v3799_v51 = vadd.f32 1e-05, %v3767_v28  ;;  %v3768_v41 = vmul.f32 0.015625, %v3702_v60 }
 0x88e   : > { %v5203_v8 = vpop.eup %5202  ;;  %v3705_v36 = vpop.xlane.xlu1 %3704  ;;  %v3895_v0 = vmul.f32 %v7560_v27, %v3859_v52  ;;  %v3930_v1 = vadd.f32 %v7568_v19, %v3894_v30 }
 0x88f   : > { %v3861_v10 = vmul.f32 %v5203_v8, %v7425_v20  ;;  %5206 = vrsqrt.f32 %v3799_v51  ;;  %v3800_v21 = vadd.f32 1e-05, %v3768_v41  ;;  %v3769_v54 = vmul.f32 0.015625, %v3705_v36 }
 0x890   : > { %v3708_v44 = vpop.xlane.xlu0 %3707  ;;  %v3931_v22 = vadd.f32 %v7568_v19, %v3895_v0  ;;  %v3896_v25 = vmul.f32 %v7560_v27, %v3860_v35 }
 0x891   : > { %5208 = vrsqrt.f32 %v3800_v21  ;;  %v3801_v61 = vadd.f32 1e-05, %v3769_v54  ;;  %v3770_v12 = vmul.f32 0.015625, %v3708_v44  ;;  %v3897_v53 = vmul.f32 %v7560_v27, %v3861_v10 }
 0x892   : > { %v3711_v17 = vpop.xlane.xlu1 %3710  ;;  %v3958_v23 = vpack.c.bf16 %v3931_v22, %v3930_v1  ;;  %v3932_v24 = vadd.f32 %v7568_v19, %v3896_v25 }
 0x893   : > { %5210 = vrsqrt.f32 %v3801_v61  ;;  %v3802_v20 = vadd.f32 1e-05, %v3770_v12  ;;  %v3771_v29 = vmul.f32 0.015625, %v3711_v17  ;;  %v3933_v48 = vadd.f32 %v7568_v19, %v3897_v53 }
 0x894   : > { %v3714_v4 = vpop.xlane.xlu0 %3713  ;;  %4798 = vmatprep.mubr.msk.bf16.mxu1 %vm827_vm1, %v3958_v23 }
 0x895   : > { %5212 = vrsqrt.f32 %v3802_v20  ;;  %v3803_v57 = vadd.f32 1e-05, %v3771_v29  ;;  %v3772_v13 = vmul.f32 0.015625, %v3714_v4  ;;  %v3959_v49 = vpack.c.bf16 %v3933_v48, %v3932_v24 }
 0x896   : > { %v3717_v7 = vpop.xlane.xlu1 %3716 }
 0x897   : > { %v5205_v43 = vpop.eup %5204  ;;  %5214 = vrsqrt.f32 %v3803_v57  ;;  %v3804_v56 = vadd.f32 1e-05, %v3772_v13  ;;  %v3773_v2 = vmul.f32 0.015625, %v3717_v7  ;;  %4799 = vmatmul.mubr.msk.bf16.gmra.mrb[72].mxu1 %vm827_vm1, %v3959_v49 }
 0x898   : > { %v3862_v15 = vmul.f32 %v5205_v43, %v7438_v46  ;;  %v3720_v26 = vpop.xlane.xlu0 %3719 }
 0x899   : > { %v5207_v37 = vpop.eup %5206  ;;  %5216 = vrsqrt.f32 %v3804_v56  ;;  %v3805_v16 = vadd.f32 1e-05, %v3773_v2  ;;  %v3774_v63 = vmul.f32 0.015625, %v3720_v26 }
 0x89a   : > { %v3863_v34 = vmul.f32 %v5207_v37, %v7441_v9  ;;  %v3723_v52 = vpop.xlane.xlu1 %3722  ;;  %v3898_v11 = vmul.f32 %v7560_v27, %v3862_v15 }
 0x89b   : > { %v5209_v28 = vpop.eup %5208  ;;  %5218 = vrsqrt.f32 %v3805_v16  ;;  %v3806_v38 = vadd.f32 1e-05, %v3774_v63  ;;  %v3775_v60 = vmul.f32 0.015625, %v3723_v52 }
 0x89c   : > { %v3864_v30 = vmul.f32 %v5209_v28, %v7446_v50  ;;  %v3726_v35 = vpop.xlane.xlu0 %3725  ;;  %v3899_v51 = vmul.f32 %v7560_v27, %v3863_v34  ;;  %v3934_v9 = vadd.f32 %v7568_v19, %v3898_v11 }
 0x89d   : > { %v5211_v46 = vpop.eup %5210  ;;  %5220 = vrsqrt.f32 %v3806_v38  ;;  %v3807_v41 = vadd.f32 1e-05, %v3775_v60  ;;  %v3776_v8 = vmul.f32 0.015625, %v3726_v35 }
 0x89e   : > { %v3865_v36 = vmul.f32 %v5211_v46, %v7452_v18  ;;  %v3729_v0 = vpop.xlane.xlu1 %3728  ;;  %v3935_v10 = vadd.f32 %v7568_v19, %v3899_v51  ;;  %v3900_v21 = vmul.f32 %v7560_v27, %v3864_v30 }
 0x89f   : > { %v5213_v54 = vpop.eup %5212  ;;  %5222 = vrsqrt.f32 %v3807_v41  ;;  %v3808_v44 = vadd.f32 1e-05, %v3776_v8  ;;  %v3777_v50 = vmul.f32 0.015625, %v3729_v0 }
 0x8a0   : > { %v3866_v1 = vmul.f32 %v5213_v54, %v7458_v33  ;;  %v3732_v22 = vpop.xlane.xlu0 %3731  ;;  %v3960_v25 = vpack.c.bf16 %v3935_v10, %v3934_v9  ;;  %v3901_v61 = vmul.f32 %v7560_v27, %v3865_v36  ;;  %v3936_v24 = vadd.f32 %v7568_v19, %v3900_v21 }
 0x8a1   : > { %v5215_v12 = vpop.eup %5214  ;;  %5224 = vrsqrt.f32 %v3808_v44  ;;  %v3809_v18 = vadd.f32 1e-05, %v3777_v50  ;;  %v3778_v53 = vmul.f32 0.015625, %v3732_v22 }
 0x8a2   : > { %v3867_v17 = vmul.f32 %v5215_v12, %v7464_v45  ;;  %v3735_v23 = vpop.xlane.xlu1 %3734  ;;  %4802 = vmatprep.mubr.msk.bf16.mxu1 %vm827_vm1, %v3960_v25  ;;  %v3937_v20 = vadd.f32 %v7568_v19, %v3901_v61  ;;  %v3902_v29 = vmul.f32 %v7560_v27, %v3866_v1 }
 0x8a3   : > { %v5217_v33 = vpop.eup %5216  ;;  %5226 = vrsqrt.f32 %v3809_v18  ;;  %v3810_v48 = vadd.f32 1e-05, %v3778_v53  ;;  %v3779_v4 = vmul.f32 0.015625, %v3735_v23 }
 0x8a4   : > { %v3868_v57 = vmul.f32 %v5217_v33, %v7470_v55  ;;  %v3738_v13 = vpop.xlane.xlu0 %3737  ;;  %v3961_v49 = vpack.c.bf16 %v3937_v20, %v3936_v24  ;;  %v3903_v7 = vmul.f32 %v7560_v27, %v3867_v17  ;;  %v3938_v26 = vadd.f32 %v7568_v19, %v3902_v29 }
 0x8a5   : > { %v5219_v45 = vpop.eup %5218  ;;  %5228 = vrsqrt.f32 %v3810_v48  ;;  %v3811_v43 = vadd.f32 1e-05, %v3779_v4  ;;  %v3780_v56 = vmul.f32 0.015625, %v3738_v13 }
 0x8a6   : > { %v3869_v2 = vmul.f32 %v5219_v45, %v7476_v3  ;;  %v3741_v15 = vpop.xlane.xlu1 %3740  ;;  %4803 = vmatmul.mubr.msk.bf16.gmra.mrb[76].mxu1 %vm827_vm1, %v3961_v49  ;;  %v3939_v37 = vadd.f32 %v7568_v19, %v3903_v7  ;;  %v3904_v16 = vmul.f32 %v7560_v27, %v3868_v57 }
 0x8a7   : > { %v5221_v55 = vpop.eup %5220  ;;  %5230 = vrsqrt.f32 %v3811_v43  ;;  %v3812_v63 = vadd.f32 1e-05, %v3780_v56  ;;  %v3781_v34 = vmul.f32 0.015625, %v3741_v15 }
 0x8a8   : > { %v3870_v52 = vmul.f32 %v5221_v55, %v7482_v58  ;;  %v3744_v11 = vpop.xlane.xlu0 %3743  ;;  %v3962_v28 = vpack.c.bf16 %v3939_v37, %v3938_v26  ;;  %v3905_v38 = vmul.f32 %v7560_v27, %v3869_v2  ;;  %v3940_v46 = vadd.f32 %v7568_v19, %v3904_v16 }
 0x8a9   : > { %v5223_v3 = vpop.eup %5222  ;;  %5232 = vrsqrt.f32 %v3812_v63  ;;  %v3813_v60 = vadd.f32 1e-05, %v3781_v34  ;;  %v3782_v30 = vmul.f32 0.015625, %v3744_v11 }
 0x8aa   : > { %v3871_v35 = vmul.f32 %v5223_v3, %v7488_v5  ;;  %v3747_v51 = vpop.xlane.xlu1 %3746  ;;  %4806 = vmatprep.mubr.msk.bf16.mxu1 %vm827_vm1, %v3962_v28  ;;  %v3941_v41 = vadd.f32 %v7568_v19, %v3905_v38  ;;  %v3906_v8 = vmul.f32 %v7560_v27, %v3870_v52 }
 0x8ab   : > { %v5225_v58 = vpop.eup %5224  ;;  %5234 = vrsqrt.f32 %v3813_v60  ;;  %v3814_v36 = vadd.f32 1e-05, %v3782_v30  ;;  %v3783_v0 = vmul.f32 0.015625, %v3747_v51 }
 0x8ac   : > { %v3872_v9 = vmul.f32 %v5225_v58, %v7494_v6  ;;  %v3750_v10 = vpop.xlane.xlu0 %3749  ;;  %v3963_v21 = vpack.c.bf16 %v3941_v41, %v3940_v46  ;;  %v3907_v54 = vmul.f32 %v7560_v27, %v3871_v35  ;;  %v3942_v25 = vadd.f32 %v7568_v19, %v3906_v8 }
 0x8ad   : > { %v5227_v5 = vpop.eup %5226  ;;  %5236 = vrsqrt.f32 %v3814_v36  ;;  %v3815_v44 = vadd.f32 1e-05, %v3783_v0  ;;  %v3784_v50 = vmul.f32 0.015625, %v3750_v10 }
 0x8ae   : > { %v3873_v1 = vmul.f32 %v5227_v5, %v7500_v32  ;;  %v3753_v22 = vpop.xlane.xlu1 %3752  ;;  %4807 = vmatmul.mubr.msk.bf16.gmra.mrb[80].mxu1 %vm827_vm1, %v3963_v21  ;;  %v3943_v61 = vadd.f32 %v7568_v19, %v3907_v54  ;;  %v3908_v12 = vmul.f32 %v7560_v27, %v3872_v9 }
 0x8af   : > { %v5229_v6 = vpop.eup %5228  ;;  %5238 = vrsqrt.f32 %v3815_v44  ;;  %v3816_v18 = vadd.f32 1e-05, %v3784_v50  ;;  %v3785_v53 = vmul.f32 0.015625, %v3753_v22 }
 0x8b0   : > { %v3874_v17 = vmul.f32 %v5229_v6, %v7506_v14  ;;  %v3964_v23 = vpack.c.bf16 %v3943_v61, %v3942_v25  ;;  %v3909_v24 = vmul.f32 %v7560_v27, %v3873_v1  ;;  %v3944_v33 = vadd.f32 %v7568_v19, %v3908_v12 }
 0x8b1   : > { %v5231_v20 = vpop.eup %5230  ;;  %5240 = vrsqrt.f32 %v3816_v18  ;;  %v3817_v32 = vadd.f32 1e-05, %v3785_v53 }
 0x8b2   : > { %v3875_v29 = vmul.f32 %v5231_v20, %v7512_v42  ;;  %4810 = vmatprep.mubr.msk.bf16.mxu1 %vm827_vm1, %v3964_v23  ;;  %v3945_v48 = vadd.f32 %v7568_v19, %v3909_v24  ;;  %v3910_v4 = vmul.f32 %v7560_v27, %v3874_v17 }
 0x8b3   : > { %v5233_v57 = vpop.eup %5232  ;;  %5242 = vrsqrt.f32 %v3817_v32 }
 0x8b4   : > { %v3876_v14 = vmul.f32 %v5233_v57, %v7518_v40  ;;  %v3965_v13 = vpack.c.bf16 %v3945_v48, %v3944_v33  ;;  %v3911_v49 = vmul.f32 %v7560_v27, %v3875_v29  ;;  %v3946_v42 = vadd.f32 %v7568_v19, %v3910_v4 }
 0x8b5   : > { %v5235_v7 = vpop.eup %5234 }
 0x8b6   : > { %v3877_v45 = vmul.f32 %v5235_v7, %v7524_v47  ;;  %4811 = vmatmul.mubr.msk.bf16.gmra.mrb[84].mxu1 %vm827_vm1, %v3965_v13  ;;  %v3947_v43 = vadd.f32 %v7568_v19, %v3911_v49  ;;  %v3912_v56 = vmul.f32 %v7560_v27, %v3876_v14 }
 0x8b7   : > { %v5237_v2 = vpop.eup %5236 }
 0x8b8   : > { %v3878_v15 = vmul.f32 %v5237_v2, %v7530_v39  ;;  %v3966_v26 = vpack.c.bf16 %v3947_v43, %v3946_v42  ;;  %v3913_v40 = vmul.f32 %v7560_v27, %v3877_v45  ;;  %v3948_v47 = vadd.f32 %v7568_v19, %v3912_v56 }
 0x8b9   : > { %v5239_v37 = vpop.eup %5238 }
 0x8ba   : > { %v3879_v16 = vmul.f32 %v5239_v37, %v7536_v31  ;;  %4814 = vmatprep.mubr.msk.bf16.mxu1 %vm827_vm1, %v3966_v26  ;;  %v3949_v55 = vadd.f32 %v7568_v19, %v3913_v40  ;;  %v3914_v63 = vmul.f32 %v7560_v27, %v3878_v15 }
 0x8bb   : > { %v5241_v34 = vpop.eup %5240 }
 0x8bc   : > { %v3880_v52 = vmul.f32 %v5241_v34, %v7542_v62  ;;  %v3967_v11 = vpack.c.bf16 %v3949_v55, %v3948_v47  ;;  %v3915_v39 = vmul.f32 %v7560_v27, %v3879_v16  ;;  %v3950_v31 = vadd.f32 %v7568_v19, %v3914_v63 }
 0x8bd   : > { %v5243_v28 = vpop.eup %5242 }
 0x8be   : > { %v3881_v38 = vmul.f32 %v5243_v28, %v7548_v59  ;;  %4815 = vmatmul.mubr.msk.bf16.gmra.mrb[88].mxu1 %vm827_vm1, %v3967_v11  ;;  %v3951_v3 = vadd.f32 %v7568_v19, %v3915_v39  ;;  %v3916_v60 = vmul.f32 %v7560_v27, %v3880_v52  ;;  %v7682_v59 = vld [vmem:[%s7763_s5 + $0x3] ss:$0 sm:$0xff] }
 0x8c0   : > { %v3968_v30 = vpack.c.bf16 %v3951_v3, %v3950_v31  ;;  %v3917_v35 = vmul.f32 %v7560_v27, %v3881_v38  ;;  %v3952_v62 = vadd.f32 %v7568_v19, %v3916_v60 }
 0x8c2   : > { %4818 = vmatprep.mubr.msk.bf16.mxu1 %vm827_vm1, %v3968_v30  ;;  %v3953_v51 = vadd.f32 %v7568_v19, %v3917_v35 }
 0x8c4   : > { %v3969_v46 = vpack.c.bf16 %v3953_v51, %v3952_v62 }
 0x8c6   : > { %4819 = vmatmul.mubr.msk.bf16.gmra.mrb[92].mxu1 %vm827_vm1, %v3969_v46 }
 0x945   : > { %v4792_v27 = vpop.f32.mrb[64].mxu1 }
 0x946   : > { %v4097_v19 = vadd.f32 %v4792_v27, %v7682_v59  ;;  %v4088_v41 = vpop.f32.mrb[65].mxu1 }
 0x947   : > { %v4089_v8 = vadd.f32 %v7682_v59, %v4088_v41  ;;  %v4793_v58 = vpop.f32.mrb[66].mxu1 }
 0x948   : > { %4217 = vst [vmem:[%s7689_s30 + $0x10] sm:$0xff] %v4097_v19  ;;  %v4100_v36 = vadd.f32 %v4793_v58, %v7682_v59  ;;  %v4091_v0 = vpop.f32.mrb[67].mxu1 }
 0x949   : > { %4215 = vst [vmem:[%s7689_s30] sm:$0xff] %v4089_v8  ;;  %v4092_v9 = vadd.f32 %v7682_v59, %v4091_v0 }
 0x94a   : > { %4218 = vst [vmem:[%s7689_s30 + $0x18] sm:$0xff] %v4100_v36 }
 0x94b   : > { %4216 = vst [vmem:[%s7689_s30 + $0x8] sm:$0xff] %v4092_v9 }
 0x94e   : > { %v4796_v10 = vpop.f32.mrb[68].mxu1 }
 0x94f   : > { %v4113_v21 = vadd.f32 %v4796_v10, %v7682_v59  ;;  %v4104_v54 = vpop.f32.mrb[69].mxu1 }
 0x950   : > { %v4105_v5 = vadd.f32 %v7682_v59, %v4104_v54  ;;  %v4797_v44 = vpop.f32.mrb[70].mxu1 }
 0x951   : > { %4221 = vst [vmem:[%s7689_s30 + $0x30] sm:$0xff] %v4113_v21  ;;  %v4116_v50 = vadd.f32 %v4797_v44, %v7682_v59  ;;  %v4107_v1 = vpop.f32.mrb[71].mxu1 }
 0x952   : > { %4219 = vst [vmem:[%s7689_s30 + $0x20] sm:$0xff] %v4105_v5  ;;  %v4108_v22 = vadd.f32 %v7682_v59, %v4107_v1 }
 0x953   : > { %4222 = vst [vmem:[%s7689_s30 + $0x38] sm:$0xff] %v4116_v50 }
 0x954   : > { %4220 = vst [vmem:[%s7689_s30 + $0x28] sm:$0xff] %v4108_v22 }
 0x96a   : > { %v4800_v25 = vpop.f32.mrb[72].mxu1 }
 0x96b   : > { %v4129_v61 = vadd.f32 %v4800_v25, %v7682_v59  ;;  %v4120_v12 = vpop.f32.mrb[73].mxu1 }
 0x96c   : > { %v4121_v6 = vadd.f32 %v7682_v59, %v4120_v12  ;;  %v4801_v18 = vpop.f32.mrb[74].mxu1 }
 0x96d   : > { %4225 = vst [vmem:[%s7689_s30 + $0x50] sm:$0xff] %v4129_v61  ;;  %v4132_v53 = vadd.f32 %v4801_v18, %v7682_v59  ;;  %v4123_v17 = vpop.f32.mrb[75].mxu1 }
 0x96e   : > { %4223 = vst [vmem:[%s7689_s30 + $0x40] sm:$0xff] %v4121_v6  ;;  %v4124_v23 = vadd.f32 %v7682_v59, %v4123_v17 }
 0x96f   : > { %4226 = vst [vmem:[%s7689_s30 + $0x58] sm:$0xff] %v4132_v53 }
 0x970   : > { %4224 = vst [vmem:[%s7689_s30 + $0x48] sm:$0xff] %v4124_v23 }
 0x979   : > { %v4804_v24 = vpop.f32.mrb[76].mxu1 }
 0x97a   : > { %v4145_v20 = vadd.f32 %v4804_v24, %v7682_v59  ;;  %v4136_v32 = vpop.f32.mrb[77].mxu1 }
 0x97b   : > { %v4137_v29 = vadd.f32 %v7682_v59, %v4136_v32  ;;  %v4805_v33 = vpop.f32.mrb[78].mxu1 }
 0x97c   : > { %4229 = vst [vmem:[%s7689_s30 + $0x70] sm:$0xff] %v4145_v20  ;;  %v4148_v48 = vadd.f32 %v4805_v33, %v7682_v59  ;;  %v4139_v4 = vpop.f32.mrb[79].mxu1 }
 0x97d   : > { %4227 = vst [vmem:[%s7689_s30 + $0x60] sm:$0xff] %v4137_v29  ;;  %v4140_v57 = vadd.f32 %v7682_v59, %v4139_v4 }
 0x97e   : > { %4230 = vst [vmem:[%s7689_s30 + $0x78] sm:$0xff] %v4148_v48 }
 0x97f   : > { %4228 = vst [vmem:[%s7689_s30 + $0x68] sm:$0xff] %v4140_v57 }
 0x981   : > { %v4808_v14 = vpop.f32.mrb[80].mxu1 }
 0x982   : > { %v4161_v13 = vadd.f32 %v4808_v14, %v7682_v59  ;;  %v4152_v49 = vpop.f32.mrb[81].mxu1 }
 0x983   : > { %v4153_v7 = vadd.f32 %v7682_v59, %v4152_v49  ;;  %v4809_v45 = vpop.f32.mrb[82].mxu1 }
 0x984   : > { %4233 = vst [vmem:[%s7689_s30 + $0x90] sm:$0xff] %v4161_v13  ;;  %v4164_v42 = vadd.f32 %v4809_v45, %v7682_v59  ;;  %v4155_v43 = vpop.f32.mrb[83].mxu1 }
 0x985   : > { %4231 = vst [vmem:[%s7689_s30 + $0x80] sm:$0xff] %v4153_v7  ;;  %v4156_v56 = vadd.f32 %v7682_v59, %v4155_v43 }
 0x986   : > { %4234 = vst [vmem:[%s7689_s30 + $0x98] sm:$0xff] %v4164_v42 }
 0x987   : > { %4232 = vst [vmem:[%s7689_s30 + $0x88] sm:$0xff] %v4156_v56 }
 0x989   : > { %v4812_v2 = vpop.f32.mrb[84].mxu1 }
 0x98a   : > { %v4177_v15 = vadd.f32 %v4812_v2, %v7682_v59  ;;  %v4168_v26 = vpop.f32.mrb[85].mxu1 }
 0x98b   : > { %v4169_v40 = vadd.f32 %v7682_v59, %v4168_v26  ;;  %v4813_v37 = vpop.f32.mrb[86].mxu1 }
 0x98c   : > { %4237 = vst [vmem:[%s7689_s30 + $0xb0] sm:$0xff] %v4177_v15  ;;  %v4180_v16 = vadd.f32 %v4813_v37, %v7682_v59  ;;  %v4171_v47 = vpop.f32.mrb[87].mxu1 }
 0x98d   : > { %4235 = vst [vmem:[%s7689_s30 + $0xa0] sm:$0xff] %v4169_v40  ;;  %v4172_v55 = vadd.f32 %v7682_v59, %v4171_v47 }
 0x98e   : > { %4238 = vst [vmem:[%s7689_s30 + $0xb8] sm:$0xff] %v4180_v16 }
 0x98f   : > { %4236 = vst [vmem:[%s7689_s30 + $0xa8] sm:$0xff] %v4172_v55 }
 0x991   : > { %v4816_v63 = vpop.f32.mrb[88].mxu1 }
 0x992   : > { %v4193_v34 = vadd.f32 %v4816_v63, %v7682_v59  ;;  %v4184_v52 = vpop.f32.mrb[89].mxu1 }
 0x993   : > { %v4185_v11 = vadd.f32 %v7682_v59, %v4184_v52  ;;  %v4817_v39 = vpop.f32.mrb[90].mxu1 }
 0x994   : > { %4241 = vst [vmem:[%s7689_s30 + $0xd0] sm:$0xff] %v4193_v34  ;;  %v4196_v28 = vadd.f32 %v4817_v39, %v7682_v59  ;;  %v4187_v38 = vpop.f32.mrb[91].mxu1 }
 0x995   : > { %4239 = vst [vmem:[%s7689_s30 + $0xc0] sm:$0xff] %v4185_v11  ;;  %v4188_v31 = vadd.f32 %v7682_v59, %v4187_v38 }
 0x996   : > { %4242 = vst [vmem:[%s7689_s30 + $0xd8] sm:$0xff] %v4196_v28 }
 0x997   : > { %4240 = vst [vmem:[%s7689_s30 + $0xc8] sm:$0xff] %v4188_v31 }
 0x999   : > { %v4820_v3 = vpop.f32.mrb[92].mxu1 }
 0x99a   : > { %v4209_v60 = vadd.f32 %v4820_v3, %v7682_v59  ;;  %v4200_v30 = vpop.f32.mrb[93].mxu1 }
 0x99b   : > { %v4201_v35 = vadd.f32 %v7682_v59, %v4200_v30  ;;  %v4821_v62 = vpop.f32.mrb[94].mxu1 }
 0x99c   : > { %4245 = vst [vmem:[%s7689_s30 + $0xf0] sm:$0xff] %v4209_v60  ;;  %v4212_v51 = vadd.f32 %v4821_v62, %v7682_v59  ;;  %v4203_v46 = vpop.f32.mrb[95].mxu1 }
 0x99d   : > { %4243 = vst [vmem:[%s7689_s30 + $0xe0] sm:$0xff] %v4201_v35  ;;  %v4204_v27 = vadd.f32 %v7682_v59, %v4203_v46 }
 0x99e   : > { %4246 = vst [vmem:[%s7689_s30 + $0xf8] sm:$0xff] %v4212_v51 }
 0x99f   : > { %4244 = vst [vmem:[%s7689_s30 + $0xe8] sm:$0xff] %v4204_v27 }
 0x9a0 PF: > { %s16_s21 = sadd.s32 1, %s5250_s21  }
 0x9a1   : > { %p13_p4 = scmp.ge.s32.totalorder %s16_s21, 4  }
 0x9a3   :  { %15 = sbr.rel (!%p13_p4) target bundleno = 1 (0x1), region = 76 }

</bundles_post_ra>
